<compile_context>
chip_gen: v7x
topology: tpu7x:2x2x1
jax: 0.10.0
libtpu: 0.0.40
codegen_flags: <defaults>
</compile_context>

<pallas_src>
import functools

import jax
import jax.numpy as jnp
from jax.experimental import pallas as pl
from jax.experimental.pallas import tpu as pltpu

B_TILE = 128  # examples per grid step == MXU M dimension


def cbow_kernel(ids_ref, emb_ref, w1_ref, b1_ref, w2_ref, b2_ref, o_ref,
                h_sc, m_sc, l_sc, *, n_pass):
    # ids_ref: (B_TILE, n_ctx) i32      emb_ref: (V, E) bf16
    # w1_ref:  (F, H_pad) bf16          b1_ref:  (1, H_pad) f32
    # w2_ref:  (H_pad, TV) bf16         b2_ref:  (1, TV) f32
    # o_ref:   (B_TILE, TV) f32
    # h_sc:    (B_TILE, H_pad) bf16     m_sc/l_sc: (B_TILE, 1) f32
    p = pl.program_id(1)          # pass index (0: stats, 1: write) -- 0 only if n_pass==1
    v = pl.program_id(2)          # vocab-tile index
    b_tile, n_ctx = ids_ref.shape
    vocab, embd = emb_ref.shape

    # Embedding gather + layer 1, once per batch tile (first grid step for this i).
    @pl.when(jnp.logical_and(p == 0, v == 0))
    def _():
        ids = ids_ref[...]                                                # (B_TILE, n_ctx)
        viota = jax.lax.broadcasted_iota(jnp.int32, (b_tile, vocab), 1)
        parts = []
        for c in range(n_ctx):                                            # n_ctx is tiny & static
            onehot_c = (viota == ids[:, c:c + 1]).astype(jnp.bfloat16)    # (B_TILE, V)
            # one-hot MXU gather: exactly emb[ids[:, c]]
            parts.append(jnp.dot(onehot_c, emb_ref[...],
                                 preferred_element_type=jnp.float32))     # (B_TILE, E)
        x = jnp.concatenate(parts, axis=-1).astype(jnp.bfloat16)          # (B_TILE, F)
        h_pre = jnp.dot(x, w1_ref[...],
                        preferred_element_type=jnp.float32) + b1_ref[...]
        h_sc[...] = jnp.maximum(h_pre, 0.0).astype(h_sc.dtype)            # ReLU, cached
        m_sc[...] = jnp.full(m_sc.shape, -jnp.inf, m_sc.dtype)
        l_sc[...] = jnp.zeros(l_sc.shape, l_sc.dtype)

    # Layer 2 for the current vocab tile (bf16 operands, f32 accumulate).
    logits = (jnp.dot(h_sc[...], w2_ref[...],
                      preferred_element_type=jnp.float32) + b2_ref[...])  # (B_TILE, TV) f32

    if n_pass == 1:
        # Single vocab tile: plain log-softmax in one shot.
        m = jnp.max(logits, axis=-1, keepdims=True)
        shifted = logits - m
        lse = jnp.log(jnp.sum(jnp.exp(shifted), axis=-1, keepdims=True))
        o_ref[...] = (shifted - lse).astype(o_ref.dtype)
    else:
        # Two-pass online log-sum-exp over V tiles.
        @pl.when(p == 0)
        def _():
            m_prev = m_sc[...]
            m_new = jnp.maximum(m_prev, jnp.max(logits, axis=-1, keepdims=True))
            l_sc[...] = (l_sc[...] * jnp.exp(m_prev - m_new)
                         + jnp.sum(jnp.exp(logits - m_new), axis=-1, keepdims=True))
            m_sc[...] = m_new

        @pl.when(p == 1)
        def _():
            o_ref[...] = (logits - m_sc[...] - jnp.log(l_sc[...])).astype(o_ref.dtype)


def prepare_params(emb_table, w1, b1, w2, b2, *, compute_dtype=jnp.bfloat16):
    """One-time parameter prep (transpose / pad / cast). NOT in the per-call path."""
    vocab, embd = emb_table.shape
    hidden, feat = w1.shape
    assert w2.shape == (vocab, hidden)
    h_pad = ((hidden + 127) // 128) * 128

    emb_p = jnp.asarray(emb_table, compute_dtype)                          # (V, E) bf16
    w1_p = jnp.zeros((feat, h_pad), compute_dtype).at[:, :hidden].set(
        jnp.asarray(w1, compute_dtype).T)                                  # (F, H_pad)
    b1_p = jnp.zeros((1, h_pad), jnp.float32).at[:, :hidden].set(
        jnp.asarray(b1, jnp.float32))
    w2_p = jnp.zeros((h_pad, vocab), compute_dtype).at[:hidden, :].set(
        jnp.asarray(w2, compute_dtype).T)                                  # (H_pad, V)
    b2_p = jnp.asarray(b2, jnp.float32).reshape(1, vocab)
    return {"emb": emb_p, "w1": w1_p, "b1": b1_p, "w2": w2_p, "b2": b2_p}


def _padded_bytes(shape, dtype):
    """Rough VMEM footprint of one block ((8,128)-padded)."""
    shape = (1,) + tuple(shape) if len(shape) == 1 else tuple(shape)
    lead = 1
    for d in shape[:-2]:
        lead *= d
    r = -(-shape[-2] // 8) * 8
    c = -(-shape[-1] // 128) * 128
    return lead * r * c * jnp.dtype(dtype).itemsize


def _pick_v_tile(vocab, h_pad):
    """Keep W2 resident when small; otherwise tile the vocab axis."""
    if h_pad * vocab * 2 <= (8 << 20):
        return vocab
    for tv in (2048, 1024, 512, 256, 128):
        if vocab % tv == 0:
            return tv
    return vocab  # fallback: untiled


def cbow_forward_batch(token_ids, params, *, v_tile=None):
    """token_ids: (B, 2*context_size) int32 -> (B, vocab) log-probabilities."""
    token_ids = jnp.asarray(token_ids, jnp.int32)
    batch, n_ctx = token_ids.shape
    emb_p, w1_p, b1_p, w2_p, b2_p = (params["emb"], params["w1"], params["b1"],
                                     params["w2"], params["b2"])
    vocab, embd = emb_p.shape
    feat, h_pad = w1_p.shape
    assert feat == n_ctx * embd

    tv = v_tile if v_tile is not None else _pick_v_tile(vocab, h_pad)
    if vocab % tv != 0:
        tv = vocab
    num_v = vocab // tv
    n_pass = 1 if num_v == 1 else 2

    b_pad = pl.cdiv(batch, B_TILE) * B_TILE
    ids = jnp.zeros((b_pad, n_ctx), jnp.int32).at[:batch].set(token_ids)

    grid = (b_pad // B_TILE, n_pass, num_v)

    invariant = dict(pipeline_mode=pl.Buffered(1))          # grid-constant blocks
    w2_mode = dict(pipeline_mode=pl.Buffered(1)) if num_v == 1 else {}

    in_specs = [
        pl.BlockSpec((B_TILE, n_ctx), lambda i, p, v: (i, 0)),
        pl.BlockSpec((vocab, embd), lambda i, p, v: (0, 0), **invariant),
        pl.BlockSpec((feat, h_pad), lambda i, p, v: (0, 0), **invariant),
        pl.BlockSpec((1, h_pad), lambda i, p, v: (0, 0), **invariant),
        pl.BlockSpec((h_pad, tv), lambda i, p, v: (0, v), **w2_mode),
        pl.BlockSpec((1, tv), lambda i, p, v: (0, v), **w2_mode),
    ]
    # Pass 0 parks the output window on block (i, 0) and never writes it; pass 1
    # writes every (i, v) block, so only finalized data is ever flushed to HBM.
    out_specs = pl.BlockSpec((B_TILE, tv), lambda i, p, v: (i, v * p))

    grid_spec = pltpu.PrefetchScalarGridSpec(
        num_scalar_prefetch=0,
        grid=grid,
        in_specs=in_specs,
        out_specs=out_specs,
        scratch_shapes=[
            pltpu.VMEM((B_TILE, h_pad), jnp.bfloat16),   # cached hidden activations
            pltpu.VMEM((B_TILE, 1), jnp.float32),        # running max
            pltpu.VMEM((B_TILE, 1), jnp.float32),        # running sum-exp
        ],
    )

    # VMEM budget (block buffers + scratch), with headroom.
    vmem_bytes = (
        2 * _padded_bytes((B_TILE, n_ctx), jnp.int32)
        + _padded_bytes((vocab, embd), emb_p.dtype)
        + _padded_bytes((feat, h_pad), w1_p.dtype)
        + _padded_bytes((1, h_pad), b1_p.dtype)
        + (1 if num_v == 1 else 2) * _padded_bytes((h_pad, tv), w2_p.dtype)
        + (1 if num_v == 1 else 2) * _padded_bytes((1, tv), b2_p.dtype)
        + 2 * _padded_bytes((B_TILE, tv), jnp.float32)
        + _padded_bytes((B_TILE, h_pad), jnp.bfloat16)
        + 2 * _padded_bytes((B_TILE, 1), jnp.float32)
    )
    vmem_limit = int(min(max(2 * vmem_bytes + (4 << 20), 32 << 20), 64 << 20))

    flops = 2 * b_pad * (n_ctx * vocab * embd + feat * h_pad + n_pass * h_pad * vocab)
    bytes_accessed = (4 * ids.size + 2 * emb_p.size + 2 * w1_p.size + 4 * b1_p.size
                      + n_pass * 2 * w2_p.size + n_pass * 4 * b2_p.size
                      + 4 * b_pad * vocab)

    out = pl.pallas_call(
        functools.partial(cbow_kernel, n_pass=n_pass),
        out_shape=jax.ShapeDtypeStruct((b_pad, vocab), jnp.float32),
        grid_spec=grid_spec,
        compiler_params=pltpu.CompilerParams(
            dimension_semantics=("parallel", "arbitrary", "arbitrary"),
            vmem_limit_bytes=vmem_limit),
        cost_estimate=pl.CostEstimate(
            flops=int(flops),
            transcendentals=int(b_pad * (vocab + num_v + 1)),
            bytes_accessed=int(bytes_accessed)),
    )(ids, emb_p, w1_p, b1_p, w2_p, b2_p)
    return out[:batch]


def cbow_forward(inputs, params):
    """Matches PyTorch CBOW.forward: (2*context_size,) ids -> (1, vocab) log-probs."""
    return cbow_forward_batch(jnp.asarray(inputs, jnp.int32).reshape(1, -1), params)


def reference_forward_batch(token_ids, emb_table, w1, b1, w2, b2):
    """Pure-JAX (f32) reference matching the PyTorch semantics, vectorized over B."""
    emb = jnp.take(emb_table, token_ids, axis=0)            # (B, n_ctx, E)
    x = emb.reshape(token_ids.shape[0], -1)                 # (B, F)
    h = jax.nn.relu(x @ w1.T + b1)
    out = h @ w2.T + b2
    return jax.nn.log_softmax(out, axis=-1)


if __name__ == "__main__":
    vocab_size = 512
    embd_size = 16
    context_size = 2          # 2 words each side -> 4 context tokens
    hidden_size = 32
    n_ctx = 2 * context_size
    feat = n_ctx * embd_size  # 64
    batch = 144               # -> b_pad = 256: two batch tiles, padding exercised

    key = jax.random.PRNGKey(0)
    k_emb, k_w1, k_b1, k_w2, k_b2, k_in = jax.random.split(key, 6)

    emb_table = jax.random.normal(k_emb, (vocab_size, embd_size), jnp.float32) * 0.1
    w1 = jax.random.normal(k_w1, (hidden_size, feat), jnp.float32) * 0.1
    b1 = jax.random.normal(k_b1, (hidden_size,), jnp.float32) * 0.1
    w2 = jax.random.normal(k_w2, (vocab_size, hidden_size), jnp.float32) * 0.1
    b2 = jax.random.normal(k_b2, (vocab_size,), jnp.float32) * 0.1

    token_ids = jax.random.randint(k_in, (batch, n_ctx), 0, vocab_size, jnp.int32)

    # One-time prep (transpose / pad / bf16 cast) outside the hot path.
    params = prepare_params(emb_table, w1, b1, w2, b2)
    ref_batch = reference_forward_batch(token_ids, emb_table, w1, b1, w2, b2)

    # Path 1: V untiled (single-pass log-softmax).
    out_full = jax.block_until_ready(cbow_forward_batch(token_ids, params))
    assert out_full.shape == (batch, vocab_size)
    assert jnp.allclose(out_full, ref_batch, atol=2e-2, rtol=2e-2), (
        f"untiled max abs diff {jnp.max(jnp.abs(out_full - ref_batch))}")

    # Path 2: V tiled into 128-wide blocks (two-pass online log-sum-exp).
    out_tiled = jax.block_until_ready(cbow_forward_batch(token_ids, params, v_tile=128))
    assert out_tiled.shape == (batch, vocab_size)
    assert jnp.allclose(out_tiled, ref_batch, atol=2e-2, rtol=2e-2), (
        f"V-tiled max abs diff {jnp.max(jnp.abs(out_tiled - ref_batch))}")

    # Single-example path: exact PyTorch CBOW.forward semantics, (1, vocab) output.
    single = jax.block_until_ready(cbow_forward(token_ids[0], params))
    assert single.shape == (1, vocab_size)
    assert jnp.allclose(single, ref_batch[0:1], atol=2e-2, rtol=2e-2), (
        f"single max abs diff {jnp.max(jnp.abs(single - ref_batch[0:1]))}")

    print("KERNEL_OK")
</pallas_src>

<mosaic_0001>
module attributes {stable_mosaic.version = 11 : i64} {
  func.func @cbow_kernel(%arg0: i32, %arg1: i32, %arg2: i32, %arg3: memref<128x4xi32, #tpu.memory_space<vmem>>, %arg4: memref<512x16xbf16, #tpu.memory_space<vmem>>, %arg5: memref<64x128xbf16, #tpu.memory_space<vmem>>, %arg6: memref<1x128xf32, #tpu.memory_space<vmem>>, %arg7: memref<128x512xbf16, #tpu.memory_space<vmem>>, %arg8: memref<1x512xf32, #tpu.memory_space<vmem>>, %arg9: memref<128x512xf32, #tpu.memory_space<vmem>>, %arg10: memref<128x128xbf16, #tpu.memory_space<vmem>>, %arg11: memref<128x1xf32, #tpu.memory_space<vmem>>, %arg12: memref<128x1xf32, #tpu.memory_space<vmem>>) attributes {dimension_semantics = [#tpu.dimension_semantics<parallel>, #tpu.dimension_semantics<arbitrary>, #tpu.dimension_semantics<arbitrary>], iteration_bounds = array<i64: 2, 1, 1>, scalar_prefetch = 0 : i64, scratch_operands = 3 : i64, tpu.core_type = #tpu.core_type<tc>, window_params = [{transform_indices = @transform_0, window_bounds = array<i64: 128, 4>}, {pipeline_mode = #tpu.pipeline_mode<synchronous>, transform_indices = @transform_1, window_bounds = array<i64: 512, 16>}, {pipeline_mode = #tpu.pipeline_mode<synchronous>, transform_indices = @transform_2, window_bounds = array<i64: 64, 128>}, {pipeline_mode = #tpu.pipeline_mode<synchronous>, transform_indices = @transform_3, window_bounds = array<i64: 1, 128>}, {pipeline_mode = #tpu.pipeline_mode<synchronous>, transform_indices = @transform_4, window_bounds = array<i64: 128, 512>}, {pipeline_mode = #tpu.pipeline_mode<synchronous>, transform_indices = @transform_5, window_bounds = array<i64: 1, 512>}, {transform_indices = @transform_6, window_bounds = array<i64: 128, 512>}]} {
    %c0_i32 = arith.constant 0 : i32
    %0 = arith.cmpi eq, %arg1, %c0_i32 : i32
    %c0_i32_0 = arith.constant 0 : i32
    %1 = arith.cmpi eq, %arg2, %c0_i32_0 : i32
    %2 = arith.andi %0, %1 : i1
    %3 = arith.extui %2 : i1 to i32
    %c0_i32_1 = arith.constant 0 : i32
    %4 = arith.cmpi ne, %3, %c0_i32_1 : i32
    scf.if %4 {
      %c0_11 = arith.constant 0 : index
      %c0_12 = arith.constant 0 : index
      %22 = vector.load %arg3[%c0_11, %c0_12] : memref<128x4xi32, #tpu.memory_space<vmem>>, vector<128x4xi32>
      %23 = tpu.iota {dimensions = array<i32: 1>} : vector<128x512xi32>
      %24 = vector.extract_strided_slice %22 {offsets = [0, 0], sizes = [128, 1], strides = [1, 1]} : vector<128x4xi32> to vector<128x1xi32>
      %25 = vector.broadcast %24 : vector<128x1xi32> to vector<128x512xi32>
      %26 = arith.cmpi eq, %23, %25 : vector<128x512xi32>
      %27 = arith.extui %26 : vector<128x512xi1> to vector<128x512xi32>
      %28 = arith.sitofp %27 : vector<128x512xi32> to vector<128x512xf32>
      %29 = arith.truncf %28 : vector<128x512xf32> to vector<128x512xbf16>
      %c0_13 = arith.constant 0 : index
      %c0_14 = arith.constant 0 : index
      %30 = vector.load %arg4[%c0_13, %c0_14] : memref<512x16xbf16, #tpu.memory_space<vmem>>, vector<512x16xbf16>
      %cst_15 = arith.constant dense<0.000000e+00> : vector<128x16xf32>
      %31 = tpu.matmul %29, %30, %cst_15 {dimension_numbers = #tpu.dot_dimension_numbers<[1], [0], [0], [1], [0, 0, 1, 1], [], []>} : vector<128x512xbf16>, vector<512x16xbf16>, vector<128x16xf32> -> vector<128x16xf32>
      %32 = vector.extract_strided_slice %22 {offsets = [0, 1], sizes = [128, 1], strides = [1, 1]} : vector<128x4xi32> to vector<128x1xi32>
      %33 = vector.broadcast %32 : vector<128x1xi32> to vector<128x512xi32>
      %34 = arith.cmpi eq, %23, %33 : vector<128x512xi32>
      %35 = arith.extui %34 : vector<128x512xi1> to vector<128x512xi32>
      %36 = arith.sitofp %35 : vector<128x512xi32> to vector<128x512xf32>
      %37 = arith.truncf %36 : vector<128x512xf32> to vector<128x512xbf16>
      %c0_16 = arith.constant 0 : index
      %c0_17 = arith.constant 0 : index
      %38 = vector.load %arg4[%c0_16, %c0_17] : memref<512x16xbf16, #tpu.memory_space<vmem>>, vector<512x16xbf16>
      %cst_18 = arith.constant dense<0.000000e+00> : vector<128x16xf32>
      %39 = tpu.matmul %37, %38, %cst_18 {dimension_numbers = #tpu.dot_dimension_numbers<[1], [0], [0], [1], [0, 0, 1, 1], [], []>} : vector<128x512xbf16>, vector<512x16xbf16>, vector<128x16xf32> -> vector<128x16xf32>
      %40 = vector.extract_strided_slice %22 {offsets = [0, 2], sizes = [128, 1], strides = [1, 1]} : vector<128x4xi32> to vector<128x1xi32>
      %41 = vector.broadcast %40 : vector<128x1xi32> to vector<128x512xi32>
      %42 = arith.cmpi eq, %23, %41 : vector<128x512xi32>
      %43 = arith.extui %42 : vector<128x512xi1> to vector<128x512xi32>
      %44 = arith.sitofp %43 : vector<128x512xi32> to vector<128x512xf32>
      %45 = arith.truncf %44 : vector<128x512xf32> to vector<128x512xbf16>
      %c0_19 = arith.constant 0 : index
      %c0_20 = arith.constant 0 : index
      %46 = vector.load %arg4[%c0_19, %c0_20] : memref<512x16xbf16, #tpu.memory_space<vmem>>, vector<512x16xbf16>
      %cst_21 = arith.constant dense<0.000000e+00> : vector<128x16xf32>
      %47 = tpu.matmul %45, %46, %cst_21 {dimension_numbers = #tpu.dot_dimension_numbers<[1], [0], [0], [1], [0, 0, 1, 1], [], []>} : vector<128x512xbf16>, vector<512x16xbf16>, vector<128x16xf32> -> vector<128x16xf32>
      %48 = vector.extract_strided_slice %22 {offsets = [0, 3], sizes = [128, 1], strides = [1, 1]} : vector<128x4xi32> to vector<128x1xi32>
      %49 = vector.broadcast %48 : vector<128x1xi32> to vector<128x512xi32>
      %50 = arith.cmpi eq, %23, %49 : vector<128x512xi32>
      %51 = arith.extui %50 : vector<128x512xi1> to vector<128x512xi32>
      %52 = arith.sitofp %51 : vector<128x512xi32> to vector<128x512xf32>
      %53 = arith.truncf %52 : vector<128x512xf32> to vector<128x512xbf16>
      %c0_22 = arith.constant 0 : index
      %c0_23 = arith.constant 0 : index
      %54 = vector.load %arg4[%c0_22, %c0_23] : memref<512x16xbf16, #tpu.memory_space<vmem>>, vector<512x16xbf16>
      %cst_24 = arith.constant dense<0.000000e+00> : vector<128x16xf32>
      %55 = tpu.matmul %53, %54, %cst_24 {dimension_numbers = #tpu.dot_dimension_numbers<[1], [0], [0], [1], [0, 0, 1, 1], [], []>} : vector<128x512xbf16>, vector<512x16xbf16>, vector<128x16xf32> -> vector<128x16xf32>
      %56 = tpu.concatenate %31, %39, %47, %55 in 1 : vector<128x16xf32>, vector<128x16xf32>, vector<128x16xf32>, vector<128x16xf32> -> vector<128x64xf32>
      %57 = arith.truncf %56 : vector<128x64xf32> to vector<128x64xbf16>
      %c0_25 = arith.constant 0 : index
      %c0_26 = arith.constant 0 : index
      %58 = vector.load %arg5[%c0_25, %c0_26] : memref<64x128xbf16, #tpu.memory_space<vmem>>, vector<64x128xbf16>
      %cst_27 = arith.constant dense<0.000000e+00> : vector<128x128xf32>
      %59 = tpu.matmul %57, %58, %cst_27 {dimension_numbers = #tpu.dot_dimension_numbers<[1], [0], [0], [1], [0, 0, 1, 1], [], []>} : vector<128x64xbf16>, vector<64x128xbf16>, vector<128x128xf32> -> vector<128x128xf32>
      %c0_28 = arith.constant 0 : index
      %c0_29 = arith.constant 0 : index
      %60 = vector.load %arg6[%c0_28, %c0_29] : memref<1x128xf32, #tpu.memory_space<vmem>>, vector<1x128xf32>
      %61 = vector.broadcast %60 : vector<1x128xf32> to vector<128x128xf32>
      %62 = arith.addf %59, %61 : vector<128x128xf32>
      %cst_30 = arith.constant 0.000000e+00 : f32
      %63 = vector.broadcast %cst_30 : f32 to vector<128x128xf32>
      %64 = arith.maximumf %62, %63 : vector<128x128xf32>
      %65 = arith.truncf %64 : vector<128x128xf32> to vector<128x128xbf16>
      %c0_31 = arith.constant 0 : index
      %c0_32 = arith.constant 0 : index
      %66 = vector.load %arg10[%c0_31, %c0_32] : memref<128x128xbf16, #tpu.memory_space<vmem>>, vector<128x128xbf16>
      tpu.vector_store %arg10[%c0_31, %c0_32], %65 {strides = array<i32>} : memref<128x128xbf16, #tpu.memory_space<vmem>>, vector<128x128xbf16>,
      %cst_33 = arith.constant 0xFF800000 : f32
      %67 = vector.broadcast %cst_33 : f32 to vector<128x1xf32>
      %c0_34 = arith.constant 0 : index
      %c0_35 = arith.constant 0 : index
      %68 = vector.load %arg11[%c0_34, %c0_35] : memref<128x1xf32, #tpu.memory_space<vmem>>, vector<128x1xf32>
      tpu.vector_store %arg11[%c0_34, %c0_35], %67 {strides = array<i32>} : memref<128x1xf32, #tpu.memory_space<vmem>>, vector<128x1xf32>,
      %cst_36 = arith.constant 0.000000e+00 : f32
      %69 = vector.broadcast %cst_36 : f32 to vector<128x1xf32>
      %c0_37 = arith.constant 0 : index
      %c0_38 = arith.constant 0 : index
      %70 = vector.load %arg12[%c0_37, %c0_38] : memref<128x1xf32, #tpu.memory_space<vmem>>, vector<128x1xf32>
      tpu.vector_store %arg12[%c0_37, %c0_38], %69 {strides = array<i32>} : memref<128x1xf32, #tpu.memory_space<vmem>>, vector<128x1xf32>,
    } else {
    }
    %c0 = arith.constant 0 : index
    %c0_2 = arith.constant 0 : index
    %5 = vector.load %arg10[%c0, %c0_2] : memref<128x128xbf16, #tpu.memory_space<vmem>>, vector<128x128xbf16>
    %c0_3 = arith.constant 0 : index
    %c0_4 = arith.constant 0 : index
    %6 = vector.load %arg7[%c0_3, %c0_4] : memref<128x512xbf16, #tpu.memory_space<vmem>>, vector<128x512xbf16>
    %cst = arith.constant dense<0.000000e+00> : vector<128x512xf32>
    %7 = tpu.matmul %5, %6, %cst {dimension_numbers = #tpu.dot_dimension_numbers<[1], [0], [0], [1], [0, 0, 1, 1], [], []>} : vector<128x128xbf16>, vector<128x512xbf16>, vector<128x512xf32> -> vector<128x512xf32>
    %c0_5 = arith.constant 0 : index
    %c0_6 = arith.constant 0 : index
    %8 = vector.load %arg8[%c0_5, %c0_6] : memref<1x512xf32, #tpu.memory_space<vmem>>, vector<1x512xf32>
    %9 = vector.broadcast %8 : vector<1x512xf32> to vector<128x512xf32>
    %10 = arith.addf %7, %9 : vector<128x512xf32>
    %cst_7 = arith.constant dense<0xFF800000> : vector<128xf32>
    %11 = vector.multi_reduction <maximumf>, %10, %cst_7 [1] : vector<128x512xf32> to vector<128xf32>
    %12 = vector.shape_cast %11 : vector<128xf32> to vector<128x1xf32>
    %13 = vector.broadcast %12 : vector<128x1xf32> to vector<128x512xf32>
    %14 = arith.subf %10, %13 : vector<128x512xf32>
    %15 = math.exp %14 : vector<128x512xf32>
    %cst_8 = arith.constant dense<0.000000e+00> : vector<128xf32>
    %16 = vector.multi_reduction <add>, %15, %cst_8 [1] : vector<128x512xf32> to vector<128xf32>
    %17 = vector.shape_cast %16 : vector<128xf32> to vector<128x1xf32>
    %18 = math.log %17 : vector<128x1xf32>
    %19 = vector.broadcast %18 : vector<128x1xf32> to vector<128x512xf32>
    %20 = arith.subf %14, %19 : vector<128x512xf32>
    %c0_9 = arith.constant 0 : index
    %c0_10 = arith.constant 0 : index
    %21 = vector.load %arg9[%c0_9, %c0_10] : memref<128x512xf32, #tpu.memory_space<vmem>>, vector<128x512xf32>
    tpu.vector_store %arg9[%c0_9, %c0_10], %20 {strides = array<i32>} : memref<128x512xf32, #tpu.memory_space<vmem>>, vector<128x512xf32>,
    return
  }
  func.func @transform_0(%arg0: i32, %arg1: i32, %arg2: i32) -> (i32, i32) {
    %c0_i32 = arith.constant 0 : i32
    %c0_i32_0 = arith.constant 0 : i32
    return %arg0, %c0_i32 : i32, i32
  }
  func.func @transform_1(%arg0: i32, %arg1: i32, %arg2: i32) -> (i32, i32) {
    %c0_i32 = arith.constant 0 : i32
    %c0_i32_0 = arith.constant 0 : i32
    %c0_i32_1 = arith.constant 0 : i32
    return %c0_i32, %c0_i32_0 : i32, i32
  }
  func.func @transform_2(%arg0: i32, %arg1: i32, %arg2: i32) -> (i32, i32) {
    %c0_i32 = arith.constant 0 : i32
    %c0_i32_0 = arith.constant 0 : i32
    %c0_i32_1 = arith.constant 0 : i32
    return %c0_i32, %c0_i32_0 : i32, i32
  }
  func.func @transform_3(%arg0: i32, %arg1: i32, %arg2: i32) -> (i32, i32) {
    %c0_i32 = arith.constant 0 : i32
    %c0_i32_0 = arith.constant 0 : i32
    %c0_i32_1 = arith.constant 0 : i32
    return %c0_i32, %c0_i32_0 : i32, i32
  }
  func.func @transform_4(%arg0: i32, %arg1: i32, %arg2: i32) -> (i32, i32) {
    %c0_i32 = arith.constant 0 : i32
    %c0_i32_0 = arith.constant 0 : i32
    return %c0_i32, %arg2 : i32, i32
  }
  func.func @transform_5(%arg0: i32, %arg1: i32, %arg2: i32) -> (i32, i32) {
    %c0_i32 = arith.constant 0 : i32
    %c0_i32_0 = arith.constant 0 : i32
    return %c0_i32, %arg2 : i32, i32
  }
  func.func @transform_6(%arg0: i32, %arg1: i32, %arg2: i32) -> (i32, i32) {
    %0 = arith.muli %arg2, %arg1 : i32
    %c0_i32 = arith.constant 0 : i32
    return %arg0, %0 : i32, i32
  }
}

</mosaic_0001>

<bundles_post_ra>
// kernel: tpu_custom_call.1
= control target key start
LH: loop header
LB: loop body
LE: loop exit
PB: predicated region body
PF: predicated region fallthrough
CT: control target
= control target key end

     0   :  { %11 = vsyncpa [#allocation6], 0  ;;  %s7886_s0 = inlined_call_operand.vmem [shape: s32[256,4], index: 0, kind: input, shape index: {}]   ;;  %s7887_s1 = inlined_call_operand.vmem [shape: bf16[512,16], index: 1, kind: input, shape index: {}]   ;;  %s7888_s2 = inlined_call_operand.vmem [shape: bf16[64,128], index: 2, kind: input, shape index: {}]   ;;  %s7889_s3 = inlined_call_operand.vmem [shape: f32[1,128], index: 3, kind: input, shape index: {}]   ;;  %s7890_s4 = inlined_call_operand.vmem [shape: bf16[128,512], index: 4, kind: input, shape index: {}]   ;;  %s7891_s5 = inlined_call_operand.vmem [shape: f32[1,512], index: 5, kind: input, shape index: {}]   ;;  %s7892_s6 = inlined_call_operand.hbm [shape: f32[256,512], index: 6, kind: output, shape index: {}]  }
   0x1   :  { %13 = vsyncpa [#allocation6 + $0x1], 0  ;;  %s5791_s21 = smov 0   ;;  %s5793_s22 = smov 0  }
   0x2   :  { %s5795_s23 = smov 0   ;;  %s5797_s24 = smov 0  }
   0x3   :  { %s5799_s25 = smov 0   ;;  %s5801_s26 = smov 0  }
   0x4 LB: > { %s4025_s27 = sadd.s32 4294967295, %s5744_s26   ;;  %s4026_s28 = sadd.s32 4294967294, %s5744_s26   ;;  %s5744_s26 = sphi %s5801_s26, %s19_s26   ;;  %s5740_s25 = sphi %s5799_s25, %s8013_s25   ;;  %s5736_s24 = sphi %s5797_s24, %s8012_s24   ;;  %s5732_s23 = sphi %s5795_s23, %s8011_s23   ;;  %s5728_s22 = sphi %s5793_s22, %s8010_s22   ;;  %s5724_s21 = sphi %s5791_s21, %s8009_s21  }
   0x5   : > { %s38_s29 = sadd.s32 1, %s5740_s25  ;;  %s190_s30 = sadd.s32 1, %s5732_s23 }
   0x6   : > { %p40_p0 = scmp.ge.s32.totalorder %s38_s29, 2  ;;  %p200_p1 = scmp.ne.s32.totalorder %s5732_s23, %s5728_s22 }
   0x7   : > { %p201_p2 = scmp.eq.s32.totalorder %s4025_s27, 1  ;;  %p206_p3 = scmp.ne.s32.totalorder %s5728_s22, %s5724_s21 }
   0x8   : > { %s8015_s29 = smov (%p40_p0, %s38_s29), 0  ;;  %p207_p5 = scmp.eq.s32.totalorder %s4026_s28, 1 }
   0x9   : > { %p5831_p4 = por %p201_p2, %p200_p1  ;;  %s185_s8 = ssub.s32 %s5740_s25, %s8015_s29 }
   0xa   : > { %p4031_p6 = scmp.ge.s32.totalorder %s5744_s26, 1  ;;  %p188_p7 = scmp.eq.s32.totalorder %s185_s8, 0 }
   0xb   : > { %p5838_p8 = por %p207_p5, %p206_p3  ;;  %p260_p9 = scmp.lt.s32.totalorder %s5744_s26, 3 }
   0xc   : > { %s5844_s10 = scalar_select %p188_p7, %s5732_s23, %s190_s30  }
   0xd   : > { %p261_p10 = pnand %p4031_p6, %p260_p9 }
   0xf   : > { %264 = sbr.rel (%p261_p10) target bundleno = 1559 (0x617), region = 44 }
  0x16   : > { %s4033_s11 = sshll.u32 %s5736_s24, 4  ;;  %v7894_v0 = vmov 0   ;;  %v5852_v1 = vld [vmem:[%s7887_s1 + $0x40] sm:$0xff]   ;;  %v5875_v5 = vld [vmem:[%s7887_s1 + $0x48] sm:$0xff]   ;;  %v5926_v15 = vld [vmem:[%s7887_s1 + $0x50] sm:$0xff]   ;;  %v5747_v49 = vmov 1   ;;  %v7893_v52 = vlaneseq }
  0x17   : > { %5263 = vset.pattern.permute.xlu1 %v7894_v0  ;;  %5262 = vset.pattern.permute.xlu0 %v7894_v0  ;;  %p300_p11 = scmp.lt.s32.totalorder %s4033_s11, 31  ;;  %v5857_v2 = vld [vmem:[%s7887_s1 + $0xc0] sm:$0xff]   ;;  %v5886_v6 = vld [vmem:[%s7887_s1 + $0xc8] sm:$0xff]   ;;  %v5938_v18 = vld [vmem:[%s7887_s1 + $0xd0] sm:$0xff]   ;;  %v5748_v50 = vmov 2   ;;  %v5749_v51 = vmov 3  }
  0x18   : > { %4632 = vmatprep.subr.bf16.mxu0 %v5852_v1  ;;  %v5863_v3 = vld [vmem:[%s7887_s1] sm:$0xff]   ;;  %4696 = vmatprep.subr.bf16.mxu1 %v5857_v2  ;;  %v5915_v13 = vld [vmem:[%s7887_s1 + $0x8] sm:$0xff]   ;;  %v5945_v19 = vld [vmem:[%s7887_s1 + $0x10] sm:$0xff]   ;;  %v6159_v53 = vand.u32 127, %v7893_v52  ;;  %v5750_v61 = vmov 1.0|1.0  }
  0x19   : > { %s8017_s11 = smov (!%p300_p11, %s4033_s11), 31  ;;  %v5869_v4 = vld [vmem:[%s7887_s1 + $0x80] sm:$0xff]   ;;  %4633 = vmatpush3.bf16.msra.mxu0 %v5863_v3  ;;  %v5920_v14 = vld [vmem:[%s7887_s1 + $0x88] sm:$0xff]   ;;  %v5952_v20 = vld [vmem:[%s7887_s1 + $0x90] sm:$0xff]   ;;  %s296_s27 = sand.u32 1, %s5728_s22  }
  0x1a   : > { %s4034_s20 = sshll.u32 %s8017_s11, 3  ;;  %4697 = vmatpush3.bf16.msra.mxu1 %v5869_v4  ;;  %4634 = vmatprep.subr.bf16.mxu0 %v5875_v5  ;;  %v5958_v21 = vld [vmem:[%s7887_s1 + $0x58] sm:$0xff]   ;;  %v5990_v27 = vld [vmem:[%s7887_s1 + $0x60] sm:$0xff]   ;;  %v6022_v33 = vld [vmem:[%s7887_s1 + $0x68] sm:$0xff]   ;;  %v6163_v56 = vadd.s32 128, %v6159_v53  ;;  %v6166_v57 = vadd.s32 384, %v6159_v53 }
  0x1b   : > { %s5880_s12 = scalar_lea.vmem %s7886_s0, %s4034_s20  ;;  %4698 = vmatprep.subr.bf16.mxu1 %v5886_v6  ;;  %v5970_v24 = vld [vmem:[%s7887_s1 + $0xd8] sm:$0xff]   ;;  %v6002_v30 = vld [vmem:[%s7887_s1 + $0xe0] sm:$0xff]   ;;  %v6034_v36 = vld [vmem:[%s7887_s1 + $0xe8] sm:$0xff]   ;;  %v6169_v59 = vadd.s32 256, %v6159_v53  ;;  %s5751_s20 = smov 16  }
  0x1c   : > { %v5889_v7 = vld [vmem:[%s5880_s12 + $0x10] sm:$0xff]  ;;  %v5892_v8 = vld [vmem:[%s5880_s12] sm:$0xff]  ;;  %v5898_v9 = vld [vmem:[%s5880_s12 + $0x18] sm:$0xff]  ;;  %s5752_s11 = smov 32   ;;  %s4032_s28 = sshll.u32 %s296_s27, 9 }
  0x1d   : > { %354 = vperm.xlu1 %5263, %v5889_v7   ;;  %348 = vperm.xlu0 %5262, %v5892_v8   ;;  %v5901_v10 = vld [vmem:[%s5880_s12 + $0x8] sm:$0xff]  ;;  %v5910_v12 = vld [vmem:[%s5880_s12 + $0x20] sm:$0xff]  ;;  %v5929_v16 = vld [vmem:[%s5880_s12 + $0x38] sm:$0xff]  ;;  %s7702_s30 = scalar_lea.vmem [#allocation5], %s4032_s28  ;;  %s4631_s8 = sshll.u32 %s5736_s24, 13 }
  0x1e   : > { %v5905_v11 = vld [vmem:[%s5880_s12 + $0x28] sm:$0xff]  ;;  %4635 = vmatpush3.bf16.msra.mxu0 %v5915_v13  ;;  %v5932_v17 = vld [vmem:[%s5880_s12 + $0x30] sm:$0xff]  ;;  %4699 = vmatpush3.bf16.msra.mxu1 %v5920_v14  ;;  %v5964_v23 = vld [vmem:[%s5880_s12 + $0x40] sm:$0xff]  ;;  %s7825_s15 = scalar_lea.hbm %s7892_s6, %s4631_s8  ;;  %s7839_s24 = scalar_lea.sflag [#allocation6], %s296_s27 }
  0x1f   : > { %4636 = vmatprep.subr.bf16.mxu0 %v5926_v15  ;;  %4700 = vmatprep.subr.bf16.mxu1 %v5938_v18  ;;  %v5961_v22 = vld [vmem:[%s5880_s12 + $0x48] sm:$0xff]  ;;  %v5977_v25 = vld [vmem:[%s7887_s1 + $0x18] sm:$0xff]   ;;  %v5996_v29 = vld [vmem:[%s5880_s12 + $0x50] sm:$0xff]  ;;  %s5754_s17 = smov [#allocation5]  }
  0x20   : > { %v5984_v26 = vld [vmem:[%s7887_s1 + $0x98] sm:$0xff]   ;;  %v6009_v31 = vld [vmem:[%s7887_s1 + $0x20] sm:$0xff]   ;;  %v6025_v34 = vld [vmem:[%s5880_s12 + $0x68] sm:$0xff]  ;;  %s5670_s18 = sshll.u32 %s5754_s17, 4  ;;  %s5671_s18 = int_to_ptr.vmem [resolvable:$false] %s5670_s18 }
  0x21   : > { %357 = vperm.xlu1 %5263, %v5898_v9   ;;  %351 = vperm.xlu0 %5262, %v5901_v10   ;;  %v5993_v28 = vld [vmem:[%s5880_s12 + $0x58] sm:$0xff]  ;;  %v6016_v32 = vld [vmem:[%s7887_s1 + $0xa0] sm:$0xff]   ;;  %v6041_v37 = vld [vmem:[%s7887_s1 + $0x28] sm:$0xff]   ;;  %s5672_s19 = scalar_lea.vmem %s5671_s18, 16384 }
  0x22   : > { %4637 = vmatpush3.bf16.msra.mxu0 %v5945_v19  ;;  %4701 = vmatpush3.bf16.msra.mxu1 %v5952_v20  ;;  %v6028_v35 = vld [vmem:[%s5880_s12 + $0x60] sm:$0xff]  ;;  %v6048_v38 = vld [vmem:[%s7887_s1 + $0xa8] sm:$0xff]   ;;  %v6054_v39 = vld [vmem:[%s7887_s1 + $0x70] sm:$0xff]  }
  0x23   : > { %4638 = vmatprep.subr.bf16.mxu0 %v5958_v21  ;;  %4702 = vmatprep.subr.bf16.mxu1 %v5970_v24  ;;  %v6057_v40 = vld [vmem:[%s5880_s12 + $0x78] sm:$0xff]  ;;  %v6060_v41 = vld [vmem:[%s5880_s12 + $0x70] sm:$0xff]  ;;  %s5753_s12 = smov 48  }
  0x24   : > { %v6066_v42 = vld [vmem:[%s7887_s1 + $0xf0] sm:$0xff]   ;;  %v6086_v45 = vld [vmem:[%s7887_s1 + $0x78] sm:$0xff]  }
  0x25   : > { %363 = vperm.xlu1 %5263, %v5905_v11   ;;  %360 = vperm.xlu0 %5262, %v5910_v12   ;;  %v6073_v43 = vld [vmem:[%s7887_s1 + $0x30] sm:$0xff]   ;;  %v6092_v46 = vld [vmem:[%s7887_s1 + $0xf8] sm:$0xff]  }
  0x26   : > { %4639 = vmatpush3.bf16.msra.mxu0 %v5977_v25  ;;  %4703 = vmatpush3.bf16.msra.mxu1 %v5984_v26  ;;  %v6080_v44 = vld [vmem:[%s7887_s1 + $0xb0] sm:$0xff]   ;;  %v6099_v47 = vld [vmem:[%s7887_s1 + $0x38] sm:$0xff]  }
  0x27   : > { %4640 = vmatprep.subr.bf16.mxu0 %v5990_v27  ;;  %4704 = vmatprep.subr.bf16.mxu1 %v6002_v30  ;;  %v6106_v48 = vld [vmem:[%s7887_s1 + $0xb8] sm:$0xff]  }
  0x29   : > { %369 = vperm.xlu1 %5263, %v5929_v16   ;;  %366 = vperm.xlu0 %5262, %v5932_v17  }
  0x2a   : > { %4641 = vmatpush3.bf16.msra.mxu0 %v6009_v31  ;;  %4705 = vmatpush3.bf16.msra.mxu1 %v6016_v32 }
  0x2b   : > { %4642 = vmatprep.subr.bf16.mxu0 %v6022_v33  ;;  %4706 = vmatprep.subr.bf16.mxu1 %v6034_v36 }
  0x2d   : > { %375 = vperm.xlu1 %5263, %v5961_v22   ;;  %372 = vperm.xlu0 %5262, %v5964_v23  }
  0x2e   : > { %4643 = vmatpush3.bf16.msra.mxu0 %v6041_v37  ;;  %4707 = vmatpush3.bf16.msra.mxu1 %v6048_v38 }
  0x2f   : > { %4644 = vmatprep.subr.bf16.mxu0 %v6054_v39  ;;  %4708 = vmatprep.subr.bf16.mxu1 %v6066_v42 }
  0x31   : > { %381 = vperm.xlu1 %5263, %v5993_v28   ;;  %378 = vperm.xlu0 %5262, %v5996_v29  }
  0x32   : > { %4645 = vmatpush3.bf16.msra.mxu0 %v6073_v43  ;;  %4709 = vmatpush3.bf16.msra.mxu1 %v6080_v44 }
  0x33   : > { %4646 = vmatprep.subr.bf16.mxu0 %v6086_v45  ;;  %4710 = vmatprep.subr.bf16.mxu1 %v6092_v46 }
  0x35   : > { %387 = vperm.xlu1 %5263, %v6025_v34   ;;  %384 = vperm.xlu0 %5262, %v6028_v35  }
  0x36   : > { %4647 = vmatpush3.bf16.msra.mxu0 %v6099_v47  ;;  %4711 = vmatpush3.bf16.msra.mxu1 %v6106_v48 }
  0x37   : > { %4760 = vmatprep.subr.bf16.mxu0 %v5852_v1  ;;  %4824 = vmatprep.subr.bf16.mxu1 %v5857_v2 }
  0x39   : > { %393 = vperm.xlu1 %5263, %v6057_v40   ;;  %390 = vperm.xlu0 %5262, %v6060_v41  }
  0x3d   : > { %5265 = vset.pattern.permute.xlu1 %v5747_v49  ;;  %5264 = vset.pattern.permute.xlu0 %v5747_v49  ;;  %v5648_v49 = vld [vmem:[%s7887_s1 + $0x18] sm:$0xff]  }
  0x3e   : > { %1073 = vperm.xlu1 %5265, %v5901_v10   ;;  %1070 = vperm.xlu0 %5264, %v5892_v8  }
  0x42   : > { %1076 = vperm.xlu1 %5265, %v5889_v7   ;;  %1079 = vperm.xlu0 %5264, %v5898_v9  }
  0x46   : > { %1082 = vperm.xlu1 %5265, %v5910_v12   ;;  %1085 = vperm.xlu0 %5264, %v5905_v11  }
  0x4a   : > { %1088 = vperm.xlu1 %5265, %v5932_v17   ;;  %1091 = vperm.xlu0 %5264, %v5929_v16  }
  0x4e   : > { %1094 = vperm.xlu1 %5265, %v5964_v23   ;;  %1097 = vperm.xlu0 %5264, %v5961_v22  }
  0x52   : > { %1100 = vperm.xlu1 %5265, %v5996_v29   ;;  %1103 = vperm.xlu0 %5264, %v5993_v28  }
  0x56   : > { %1106 = vperm.xlu1 %5265, %v6028_v35   ;;  %1109 = vperm.xlu0 %5264, %v6025_v34  }
  0x5a   : > { %1112 = vperm.xlu1 %5265, %v6060_v41   ;;  %1115 = vperm.xlu0 %5264, %v6057_v40  }
  0x5e   : > { %5266 = vset.pattern.permute.xlu1 %v5748_v50  ;;  %5267 = vset.pattern.permute.xlu0 %v5748_v50  ;;  %v5649_v50 = vld [vmem:[%s7887_s1 + $0x98] sm:$0xff]  }
  0x5f   : > { %1536 = vperm.xlu1 %5266, %v5892_v8   ;;  %1539 = vperm.xlu0 %5267, %v5901_v10  }
  0x63   : > { %1542 = vperm.xlu1 %5266, %v5889_v7   ;;  %1548 = vperm.xlu0 %5267, %v5910_v12  }
  0x67   : > { %1545 = vperm.xlu1 %5266, %v5898_v9   ;;  %1554 = vperm.xlu0 %5267, %v5932_v17  }
  0x6b   : > { %1551 = vperm.xlu1 %5266, %v5905_v11   ;;  %1560 = vperm.xlu0 %5267, %v5964_v23  }
  0x6f   : > { %1557 = vperm.xlu1 %5266, %v5929_v16   ;;  %1566 = vperm.xlu0 %5267, %v5996_v29  }
  0x73   : > { %1563 = vperm.xlu1 %5266, %v5961_v22   ;;  %1572 = vperm.xlu0 %5267, %v6028_v35  }
  0x77   : > { %1569 = vperm.xlu1 %5266, %v5993_v28   ;;  %1578 = vperm.xlu0 %5267, %v6060_v41  }
  0x7b   : > { %1575 = vperm.xlu1 %5266, %v6025_v34   ;;  %5268 = vset.pattern.permute.xlu0 %v5749_v51 }
  0x7c   : > { %2002 = vperm.xlu0 %5268, %v5892_v8  }
  0x7f   : > { %1581 = vperm.xlu1 %5266, %v6057_v40  }
  0x80   : > { %2011 = vperm.xlu0 %5268, %v5898_v9  }
  0x83   : > { %5269 = vset.pattern.permute.xlu1 %v5749_v51  ;;  %v5650_v51 = vld [vmem:[%s7887_s1 + $0x60] sm:$0xff]  }
  0x84   : > { %2005 = vperm.xlu1 %5269, %v5901_v10   ;;  %2017 = vperm.xlu0 %5268, %v5905_v11  }
  0x88   : > { %2008 = vperm.xlu1 %5269, %v5889_v7   ;;  %2023 = vperm.xlu0 %5268, %v5929_v16  }
  0x8c   : > { %2014 = vperm.xlu1 %5269, %v5910_v12   ;;  %2029 = vperm.xlu0 %5268, %v5961_v22  }
  0x90   : > { %2020 = vperm.xlu1 %5269, %v5932_v17   ;;  %2035 = vperm.xlu0 %5268, %v5993_v28  }
  0x94   : > { %2026 = vperm.xlu1 %5269, %v5964_v23   ;;  %2041 = vperm.xlu0 %5268, %v6025_v34  }
  0x98   : > { %2032 = vperm.xlu1 %5269, %v5996_v29   ;;  %2047 = vperm.xlu0 %5268, %v6057_v40   ;;  %v5641_v40 = vld [vmem:[%s7887_s1 + $0x88] sm:$0xff]  }
  0x9c   : > { %v355_v54 = vpop.permute.xlu1 %354  ;;  %v349_v55 = vpop.permute.xlu0 %348  ;;  %2038 = vperm.xlu1 %5269, %v6028_v35  }
  0x9d   : > { %vm396_vm0 = vcmp.eq.s32.totalorder %v6163_v56, %v349_v55  ;;  %vm398_vm5 = vcmp.eq.s32.totalorder %v6166_v57, %v349_v55  ;;  %vm395_vm8 = vcmp.eq.s32.totalorder %v6159_v53, %v349_v55  ;;  %vm404_vm9 = vcmp.eq.s32.totalorder %v6163_v56, %v355_v54 }
  0x9e   : > { %vm397_vm12 = vcmp.eq.s32.totalorder %v6169_v59, %v349_v55  ;;  %vm406_vm13 = vcmp.eq.s32.totalorder %v6166_v57, %v355_v54  ;;  %v5652_v55 = vld [vmem:[%s7887_s1 + $0x20] sm:$0xff]  }
  0xa0   : > { %v352_v58 = vpop.permute.xlu0 %351  ;;  %2044 = vperm.xlu1 %5269, %v6060_v41   ;;  %v358_v60 = vpop.permute.xlu1 %357  ;;  %v5642_v41 = vld [vmem:[%s7887_s1 + $0x50] sm:$0xff]  }
  0xa1   : > { %vm400_vm1 = vcmp.eq.s32.totalorder %v6163_v56, %v352_v58  ;;  %vm402_vm2 = vcmp.eq.s32.totalorder %v6166_v57, %v352_v58  ;;  %vm399_vm3 = vcmp.eq.s32.totalorder %v6159_v53, %v352_v58  ;;  %vm401_vm6 = vcmp.eq.s32.totalorder %v6169_v59, %v352_v58  ;;  %v5653_v58 = vld [vmem:[%s7887_s1 + $0xa0] sm:$0xff]  }
  0xa2   : > { %vm4131_vm4 = vmpackc.low %vm400_vm1, %vm396_vm0  ;;  %vm408_vm10 = vcmp.eq.s32.totalorder %v6163_v56, %v358_v60  ;;  %vm410_vm14 = vcmp.eq.s32.totalorder %v6166_v57, %v358_v60 }
  0xa3   : > { %4132 = vmatprep.mubr.msk.bf16.mxu0 %vm4131_vm4, %v5750_v61  ;;  %vm4163_vm7 = vmpackc.low %vm402_vm2, %vm398_vm5  ;;  %vm403_vm2 = vcmp.eq.s32.totalorder %v6159_v53, %v355_v54  ;;  %vm405_vm4 = vcmp.eq.s32.totalorder %v6169_v59, %v355_v54  ;;  %vm409_vm5 = vcmp.eq.s32.totalorder %v6169_v59, %v358_v60  ;;  %v5651_v54 = vld [vmem:[%s7887_s1 + $0xe0] sm:$0xff]  }
  0xa4   : > { %4164 = vmatprep.mubr.msk.bf16.mxu1 %vm4163_vm7, %v5750_v61  ;;  %vm4133_vm11 = vmpackc.low %vm399_vm3, %vm395_vm8  ;;  %v364_v62 = vpop.permute.xlu1 %363  ;;  %v361_v63 = vpop.permute.xlu0 %360  ;;  %vm407_vm3 = vcmp.eq.s32.totalorder %v6159_v53, %v358_v60  ;;  %v5654_v60 = vld [vmem:[%s7887_s1 + $0x68] sm:$0xff]  }
  0xa5   : > { %4134 = vmatmul.mubr.msk.bf16.vlgmr.msra.gmra.mrb[0].mxu0 %vm4133_vm11, %v5750_v61  ;;  %vm4165_vm15 = vmpackc.low %vm401_vm6, %vm397_vm12  ;;  %vm412_vm6 = vcmp.eq.s32.totalorder %v6163_v56, %v361_v63  ;;  %vm416_vm7 = vcmp.eq.s32.totalorder %v6163_v56, %v364_v62 }
  0xa6   : > { %4166 = vmatmul.mubr.msk.bf16.vlgmr.msra.gmra.mrb[0].mxu1 %vm4165_vm15, %v5750_v61  ;;  %4761 = vmatpush3.bf16.msra.mxu0 %v5863_v3  ;;  %vm4135_vm0 = vmpackc.low %vm408_vm10, %vm404_vm9  ;;  %vm414_vm9 = vcmp.eq.s32.totalorder %v6166_v57, %v361_v63  ;;  %vm418_vm10 = vcmp.eq.s32.totalorder %v6166_v57, %v364_v62  ;;  %vm415_vm15 = vcmp.eq.s32.totalorder %v6159_v53, %v364_v62 }
  0xa7   : > { %4825 = vmatpush3.bf16.msra.mxu1 %v5869_v4  ;;  %4136 = vmatprep.mubr.msk.bf16.mxu0 %vm4135_vm0, %v5750_v61  ;;  %vm4167_vm1 = vmpackc.low %vm410_vm14, %vm406_vm13  ;;  %vm411_vm14 = vcmp.eq.s32.totalorder %v6159_v53, %v361_v63  ;;  %vm413_vm0 = vcmp.eq.s32.totalorder %v6169_v59, %v361_v63 }
  0xa8   : > { %4168 = vmatprep.mubr.msk.bf16.mxu1 %vm4167_vm1, %v5750_v61  ;;  %4762 = vmatprep.subr.bf16.mxu0 %v5875_v5  ;;  %vm4137_vm8 = vmpackc.low %vm407_vm3, %vm403_vm2  ;;  %v370_v7 = vpop.permute.xlu1 %369  ;;  %v367_v8 = vpop.permute.xlu0 %366  ;;  %vm417_vm1 = vcmp.eq.s32.totalorder %v6169_v59, %v364_v62 }
  0xa9   : > { %4826 = vmatprep.subr.bf16.mxu1 %v5886_v6  ;;  %vm4169_vm11 = vmpackc.low %vm409_vm5, %vm405_vm4  ;;  %vm420_vm2 = vcmp.eq.s32.totalorder %v6163_v56, %v367_v8  ;;  %vm424_vm3 = vcmp.eq.s32.totalorder %v6163_v56, %v370_v7  ;;  %vm422_vm5 = vcmp.eq.s32.totalorder %v6166_v57, %v367_v8 }
  0xaa   : > { %4763 = vmatpush3.bf16.msra.mxu0 %v5915_v13  ;;  %vm4139_vm12 = vmpackc.low %vm416_vm7, %vm412_vm6  ;;  %vm426_vm6 = vcmp.eq.s32.totalorder %v6166_v57, %v370_v7 }
  0xab   : > { %4827 = vmatpush3.bf16.msra.mxu1 %v5920_v14  ;;  %4764 = vmatprep.subr.bf16.mxu0 %v5926_v15  ;;  %vm4171_vm13 = vmpackc.low %vm418_vm10, %vm414_vm9  ;;  %vm419_vm10 = vcmp.eq.s32.totalorder %v6159_v53, %v367_v8 }
  0xac   : > { %4828 = vmatprep.subr.bf16.mxu1 %v5938_v18  ;;  %vm4141_vm4 = vmpackc.low %vm415_vm15, %vm411_vm14  ;;  %v376_v9 = vpop.permute.xlu1 %375  ;;  %v373_v10 = vpop.permute.xlu0 %372 }
  0xad   : > { %4138 = vmatmul.mubr.msk.bf16.gmra.mrb[4].mxu0 %vm4137_vm8, %v5750_v61  ;;  %vm4173_vm7 = vmpackc.low %vm417_vm1, %vm413_vm0  ;;  %vm428_vm14 = vcmp.eq.s32.totalorder %v6163_v56, %v373_v10  ;;  %vm432_vm15 = vcmp.eq.s32.totalorder %v6163_v56, %v376_v9  ;;  %vm430_vm1 = vcmp.eq.s32.totalorder %v6166_v57, %v373_v10 }
  0xae   : > { %4170 = vmatmul.mubr.msk.bf16.gmra.mrb[4].mxu1 %vm4169_vm11, %v5750_v61  ;;  %4140 = vmatprep.mubr.msk.bf16.mxu0 %vm4139_vm12, %v5750_v61  ;;  %vm4143_vm8 = vmpackc.low %vm424_vm3, %vm420_vm2  ;;  %vm423_vm11 = vcmp.eq.s32.totalorder %v6159_v53, %v370_v7  ;;  %vm421_vm12 = vcmp.eq.s32.totalorder %v6169_v59, %v367_v8  ;;  %vm434_vm2 = vcmp.eq.s32.totalorder %v6166_v57, %v376_v9  ;;  %v5656_v8 = vld [vmem:[%s7887_s1 + $0x28] sm:$0xff]  }
  0xaf   : > { %4172 = vmatprep.mubr.msk.bf16.mxu1 %vm4171_vm13, %v5750_v61  ;;  %4765 = vmatpush3.bf16.msra.mxu0 %v5945_v19  ;;  %vm4175_vm9 = vmpackc.low %vm426_vm6, %vm422_vm5  ;;  %vm425_vm13 = vcmp.eq.s32.totalorder %v6169_v59, %v370_v7  ;;  %vm427_vm6 = vcmp.eq.s32.totalorder %v6159_v53, %v373_v10  ;;  %v5655_v7 = vld [vmem:[%s7887_s1 + $0xe8] sm:$0xff]  }
  0xb0   : > { %4829 = vmatpush3.bf16.msra.mxu1 %v5952_v20  ;;  %4766 = vmatprep.subr.bf16.mxu0 %v5958_v21  ;;  %vm4145_vm0 = vmpackc.low %vm423_vm11, %vm419_vm10  ;;  %v382_v11 = vpop.permute.xlu1 %381  ;;  %v379_v12 = vpop.permute.xlu0 %378 }
  0xb1   : > { %4830 = vmatprep.subr.bf16.mxu1 %v5970_v24  ;;  %vm4177_vm3 = vmpackc.low %vm425_vm13, %vm421_vm12  ;;  %vm436_vm10 = vcmp.eq.s32.totalorder %v6163_v56, %v379_v12  ;;  %vm440_vm11 = vcmp.eq.s32.totalorder %v6163_v56, %v382_v11  ;;  %vm438_vm13 = vcmp.eq.s32.totalorder %v6166_v57, %v379_v12 }
  0xb2   : > { %vm4179_vm5 = vmpackc.low %vm434_vm2, %vm430_vm1  ;;  %vm435_vm2 = vcmp.eq.s32.totalorder %v6159_v53, %v379_v12 }
  0xb3   : > { %4767 = vmatpush3.bf16.msra.mxu0 %v5977_v25 }
  0xb4   : > { %4831 = vmatpush3.bf16.msra.mxu1 %v5984_v26  ;;  %4768 = vmatprep.subr.bf16.mxu0 %v5990_v27  ;;  %v388_v16 = vpop.permute.xlu1 %387  ;;  %v385_v17 = vpop.permute.xlu0 %384 }
  0xb5   : > { %4142 = vmatmul.mubr.msk.bf16.gmra.mrb[8].mxu0 %vm4141_vm4, %v5750_v61  ;;  %4832 = vmatprep.subr.bf16.mxu1 %v6002_v30  ;;  %vm4147_vm4 = vmpackc.low %vm432_vm15, %vm428_vm14  ;;  %vm442_vm14 = vcmp.eq.s32.totalorder %v6166_v57, %v382_v11 }
  0xb6   : > { %4174 = vmatmul.mubr.msk.bf16.gmra.mrb[8].mxu1 %vm4173_vm7, %v5750_v61  ;;  %4144 = vmatprep.mubr.msk.bf16.mxu0 %vm4143_vm8, %v5750_v61  ;;  %vm431_vm7 = vcmp.eq.s32.totalorder %v6159_v53, %v376_v9  ;;  %vm429_vm8 = vcmp.eq.s32.totalorder %v6169_v59, %v373_v10  ;;  %vm4183_vm1 = vmpackc.low %vm442_vm14, %vm438_vm13  ;;  %vm443_vm14 = vcmp.eq.s32.totalorder %v6159_v53, %v385_v17  ;;  %v5658_v10 = vld [vmem:[%s7887_s1 + $0x70] sm:$0xff]  }
  0xb7   : > { %4176 = vmatprep.mubr.msk.bf16.mxu1 %vm4175_vm9, %v5750_v61  ;;  %4769 = vmatpush3.bf16.msra.mxu0 %v6009_v31  ;;  %vm433_vm9 = vcmp.eq.s32.totalorder %v6169_v59, %v376_v9  ;;  %vm4149_vm12 = vmpackc.low %vm431_vm7, %vm427_vm6  ;;  %vm444_vm6 = vcmp.eq.s32.totalorder %v6163_v56, %v385_v17  ;;  %vm448_vm7 = vcmp.eq.s32.totalorder %v6163_v56, %v388_v16  ;;  %v5657_v9 = vld [vmem:[%s7887_s1 + $0xa8] sm:$0xff]  }
  0xb8   : > { %4833 = vmatpush3.bf16.msra.mxu1 %v6016_v32  ;;  %4770 = vmatprep.subr.bf16.mxu0 %v6022_v33  ;;  %vm4181_vm15 = vmpackc.low %vm433_vm9, %vm429_vm8  ;;  %vm446_vm9 = vcmp.eq.s32.totalorder %v6166_v57, %v385_v17 }
  0xb9   : > { %4834 = vmatprep.subr.bf16.mxu1 %v6034_v36 }
  0xbb   : > { %4771 = vmatpush3.bf16.msra.mxu0 %v6041_v37 }
  0xbc   : > { %4835 = vmatpush3.bf16.msra.mxu1 %v6048_v38  ;;  %4772 = vmatprep.subr.bf16.mxu0 %v6054_v39 }
  0xbd   : > { %4146 = vmatmul.mubr.msk.bf16.gmra.mrb[12].mxu0 %vm4145_vm0, %v5750_v61  ;;  %4836 = vmatprep.subr.bf16.mxu1 %v6066_v42  ;;  %vm4151_vm0 = vmpackc.low %vm440_vm11, %vm436_vm10  ;;  %vm450_vm10 = vcmp.eq.s32.totalorder %v6166_v57, %v388_v16 }
  0xbe   : > { %4178 = vmatmul.mubr.msk.bf16.gmra.mrb[12].mxu1 %vm4177_vm3, %v5750_v61  ;;  %4148 = vmatprep.mubr.msk.bf16.mxu0 %vm4147_vm4, %v5750_v61  ;;  %vm439_vm3 = vcmp.eq.s32.totalorder %v6159_v53, %v382_v11  ;;  %vm437_vm4 = vcmp.eq.s32.totalorder %v6169_v59, %v379_v12  ;;  %vm4187_vm13 = vmpackc.low %vm450_vm10, %vm446_vm9  ;;  %v5660_v12 = vld [vmem:[%s7887_s1 + $0x30] sm:$0xff]  }
  0xbf   : > { %4180 = vmatprep.mubr.msk.bf16.mxu1 %vm4179_vm5, %v5750_v61  ;;  %4773 = vmatpush3.bf16.msra.mxu0 %v6073_v43  ;;  %vm441_vm5 = vcmp.eq.s32.totalorder %v6169_v59, %v382_v11  ;;  %vm4153_vm8 = vmpackc.low %vm439_vm3, %vm435_vm2  ;;  %v5659_v11 = vld [vmem:[%s7887_s1 + $0xf0] sm:$0xff]  }
  0xc0   : > { %4837 = vmatpush3.bf16.msra.mxu1 %v6080_v44  ;;  %4774 = vmatprep.subr.bf16.mxu0 %v6086_v45  ;;  %vm4185_vm11 = vmpackc.low %vm441_vm5, %vm437_vm4 }
  0xc1   : > { %4838 = vmatprep.subr.bf16.mxu1 %v6092_v46 }
  0xc3   : > { %4775 = vmatpush3.bf16.msra.mxu0 %v6099_v47 }
  0xc4   : > { %4839 = vmatpush3.bf16.msra.mxu1 %v6106_v48  ;;  %4888 = vmatprep.subr.bf16.mxu0 %v5852_v1  ;;  %v394_v1 = vpop.permute.xlu1 %393 }
  0xc5   : > { %4150 = vmatmul.mubr.msk.bf16.gmra.mrb[16].mxu0 %vm4149_vm12, %v5750_v61  ;;  %4952 = vmatprep.subr.bf16.mxu1 %v5857_v2  ;;  %vm4155_vm12 = vmpackc.low %vm448_vm7, %vm444_vm6  ;;  %v391_v2 = vpop.permute.xlu0 %390  ;;  %vm456_vm3 = vcmp.eq.s32.totalorder %v6163_v56, %v394_v1  ;;  %vm458_vm6 = vcmp.eq.s32.totalorder %v6166_v57, %v394_v1 }
  0xc6   : > { %4182 = vmatmul.mubr.msk.bf16.gmra.mrb[16].mxu1 %vm4181_vm15, %v5750_v61  ;;  %4152 = vmatprep.mubr.msk.bf16.mxu0 %vm4151_vm0, %v5750_v61  ;;  %vm447_vm15 = vcmp.eq.s32.totalorder %v6159_v53, %v388_v16  ;;  %vm445_vm0 = vcmp.eq.s32.totalorder %v6169_v59, %v385_v17  ;;  %vm452_vm2 = vcmp.eq.s32.totalorder %v6163_v56, %v391_v2  ;;  %v5662_v17 = vld [vmem:[%s7887_s1 + $0x78] sm:$0xff]  }
  0xc7   : > { %4184 = vmatprep.mubr.msk.bf16.mxu1 %vm4183_vm1, %v5750_v61  ;;  %vm449_vm1 = vcmp.eq.s32.totalorder %v6169_v59, %v388_v16  ;;  %vm4157_vm4 = vmpackc.low %vm447_vm15, %vm443_vm14  ;;  %vm454_vm5 = vcmp.eq.s32.totalorder %v6166_v57, %v391_v2  ;;  %vm451_vm10 = vcmp.eq.s32.totalorder %v6159_v53, %v391_v2  ;;  %v5661_v16 = vld [vmem:[%s7887_s1 + $0xb0] sm:$0xff]  }
  0xc8   : > { %vm4189_vm7 = vmpackc.low %vm449_vm1, %vm445_vm0  ;;  %v1074_v22 = vpop.permute.xlu1 %1073  ;;  %vm453_vm1 = vcmp.eq.s32.totalorder %v6169_v59, %v391_v2 }
  0xc9   : > { %vm4191_vm9 = vmpackc.low %vm458_vm6, %vm454_vm5  ;;  %v1071_v23 = vpop.permute.xlu0 %1070  ;;  %vm1124_vm15 = vcmp.eq.s32.totalorder %v6166_v57, %v1074_v22  ;;  %vm1121_vm6 = vcmp.eq.s32.totalorder %v6159_v53, %v1074_v22 }
  0xca   : > { %vm1120_vm14 = vcmp.eq.s32.totalorder %v6166_v57, %v1071_v23 }
  0xcc   : > { %v1077_v28 = vpop.permute.xlu1 %1076 }
  0xcd   : > { %4154 = vmatmul.mubr.msk.bf16.gmra.mrb[20].mxu0 %vm4153_vm8, %v5750_v61  ;;  %vm4159_vm8 = vmpackc.low %vm456_vm3, %vm452_vm2  ;;  %vm457_vm2 = vcmp.eq.s32.totalorder %v6169_v59, %v394_v1  ;;  %v1080_v29 = vpop.permute.xlu0 %1079 }
  0xce   : > { %4186 = vmatmul.mubr.msk.bf16.gmra.mrb[20].mxu1 %vm4185_vm11, %v5750_v61  ;;  %4156 = vmatprep.mubr.msk.bf16.mxu0 %vm4155_vm12, %v5750_v61  ;;  %vm455_vm11 = vcmp.eq.s32.totalorder %v6159_v53, %v394_v1  ;;  %vm1118_vm12 = vcmp.eq.s32.totalorder %v6163_v56, %v1071_v23  ;;  %vm4193_vm5 = vmpackc.low %vm457_vm2, %vm453_vm1  ;;  %vm1125_vm2 = vcmp.eq.s32.totalorder %v6159_v53, %v1077_v28 }
  0xcf   : > { %4188 = vmatprep.mubr.msk.bf16.mxu1 %vm4187_vm13, %v5750_v61  ;;  %vm1122_vm13 = vcmp.eq.s32.totalorder %v6163_v56, %v1074_v22  ;;  %vm4161_vm0 = vmpackc.low %vm455_vm11, %vm451_vm10 }
  0xd0   : > { %vm4259_vm3 = vmpackc.low %vm1122_vm13, %vm1118_vm12  ;;  %vm1126_vm12 = vcmp.eq.s32.totalorder %v6163_v56, %v1077_v28  ;;  %vm1130_vm13 = vcmp.eq.s32.totalorder %v6163_v56, %v1080_v29  ;;  %v1083_v34 = vpop.permute.xlu1 %1082 }
  0xd1   : > { %v1086_v35 = vpop.permute.xlu0 %1085 }
  0xd5   : > { %4158 = vmatmul.mubr.msk.bf16.gmra.mrb[24].mxu0 %vm4157_vm4, %v5750_v61  ;;  %vm4291_vm4 = vmpackc.low %vm1124_vm15, %vm1120_vm14  ;;  %vm1128_vm14 = vcmp.eq.s32.totalorder %v6166_v57, %v1077_v28  ;;  %vm1132_vm15 = vcmp.eq.s32.totalorder %v6166_v57, %v1080_v29 }
  0xd6   : > { %4190 = vmatmul.mubr.msk.bf16.gmra.mrb[24].mxu1 %vm4189_vm7, %v5750_v61  ;;  %4160 = vmatprep.mubr.msk.bf16.mxu0 %vm4159_vm8, %v5750_v61  ;;  %vm1117_vm7 = vcmp.eq.s32.totalorder %v6159_v53, %v1071_v23  ;;  %vm1123_vm8 = vcmp.eq.s32.totalorder %v6169_v59, %v1074_v22  ;;  %vm4295_vm1 = vmpackc.low %vm1132_vm15, %vm1128_vm14  ;;  %vm1133_vm14 = vcmp.eq.s32.totalorder %v6159_v53, %v1083_v34  ;;  %v5663_v22 = vld [vmem:[%s7887_s1 + $0xf8] sm:$0xff]  }
  0xd7   : > { %4192 = vmatprep.mubr.msk.bf16.mxu1 %vm4191_vm9, %v5750_v61  ;;  %vm1119_vm9 = vcmp.eq.s32.totalorder %v6169_v59, %v1071_v23  ;;  %vm4261_vm10 = vmpackc.low %vm1121_vm6, %vm1117_vm7  ;;  %vm1134_vm6 = vcmp.eq.s32.totalorder %v6163_v56, %v1083_v34  ;;  %vm1138_vm7 = vcmp.eq.s32.totalorder %v6163_v56, %v1086_v35  ;;  %vm1137_vm15 = vcmp.eq.s32.totalorder %v6159_v53, %v1086_v35  ;;  %v5664_v23 = vld [vmem:[%s7887_s1 + $0x38] sm:$0xff]  }
  0xd8   : > { %vm4293_vm11 = vmpackc.low %vm1123_vm8, %vm1119_vm9  ;;  %vm1136_vm9 = vcmp.eq.s32.totalorder %v6166_v57, %v1083_v34 }
  0xdd   : > { %4162 = vmatmul.mubr.msk.bf16.gmra.mrb[28].mxu0 %vm4161_vm0, %v5750_v61  ;;  %vm4263_vm0 = vmpackc.low %vm1130_vm13, %vm1126_vm12 }
  0xde   : > { %4194 = vmatmul.mubr.msk.bf16.gmra.mrb[28].mxu1 %vm4193_vm5, %v5750_v61  ;;  %4260 = vmatprep.mubr.msk.bf16.mxu0 %vm4259_vm3, %v5750_v61  ;;  %vm1129_vm3 = vcmp.eq.s32.totalorder %v6159_v53, %v1080_v29  ;;  %vm1131_vm5 = vcmp.eq.s32.totalorder %v6169_v59, %v1080_v29  ;;  %vm4267_vm12 = vmpackc.low %vm1138_vm7, %vm1134_vm6 }
  0xdf   : > { %4292 = vmatprep.mubr.msk.bf16.mxu1 %vm4291_vm4, %v5750_v61  ;;  %vm1127_vm4 = vcmp.eq.s32.totalorder %v6169_v59, %v1077_v28  ;;  %vm4265_vm8 = vmpackc.low %vm1129_vm3, %vm1125_vm2  ;;  %v5665_v28 = vld [vmem:[%s7887_s1 + $0xb8] sm:$0xff]  }
  0xe5   : > { %4262 = vmatmul.mubr.msk.bf16.vlgmr.msra.gmra.mrb[32].mxu0 %vm4261_vm10, %v5750_v61  ;;  %vm1140_vm10 = vcmp.eq.s32.totalorder %v6166_v57, %v1086_v35 }
  0xe6   : > { %4294 = vmatmul.mubr.msk.bf16.vlgmr.msra.gmra.mrb[32].mxu1 %vm4293_vm11, %v5750_v61  ;;  %4889 = vmatpush3.bf16.msra.mxu0 %v5863_v3  ;;  %vm4297_vm11 = vmpackc.low %vm1131_vm5, %vm1127_vm4  ;;  %v1089_v3 = vpop.permute.xlu1 %1088 }
  0xe7   : > { %4953 = vmatpush3.bf16.msra.mxu1 %v5869_v4  ;;  %4264 = vmatprep.mubr.msk.bf16.mxu0 %vm4263_vm0, %v5750_v61  ;;  %vm4299_vm13 = vmpackc.low %vm1140_vm10, %vm1136_vm9  ;;  %v1092_v4 = vpop.permute.xlu0 %1091  ;;  %vm1135_vm0 = vcmp.eq.s32.totalorder %v6169_v59, %v1083_v34  ;;  %vm1142_vm2 = vcmp.eq.s32.totalorder %v6163_v56, %v1089_v3  ;;  %vm1144_vm5 = vcmp.eq.s32.totalorder %v6166_v57, %v1089_v3 }
  0xe8   : > { %4296 = vmatprep.mubr.msk.bf16.mxu1 %vm4295_vm1, %v5750_v61  ;;  %4890 = vmatprep.subr.bf16.mxu0 %v5875_v5  ;;  %vm1139_vm1 = vcmp.eq.s32.totalorder %v6169_v59, %v1086_v35  ;;  %vm1146_vm3 = vcmp.eq.s32.totalorder %v6163_v56, %v1092_v4  ;;  %vm4269_vm4 = vmpackc.low %vm1137_vm15, %vm1133_vm14  ;;  %vm1148_vm6 = vcmp.eq.s32.totalorder %v6166_v57, %v1092_v4 }
  0xe9   : > { %4954 = vmatprep.subr.bf16.mxu1 %v5886_v6  ;;  %vm4301_vm7 = vmpackc.low %vm1139_vm1, %vm1135_vm0  ;;  %vm1141_vm10 = vcmp.eq.s32.totalorder %v6159_v53, %v1089_v3 }
  0xea   : > { %4891 = vmatpush3.bf16.msra.mxu0 %v5915_v13  ;;  %vm4303_vm9 = vmpackc.low %vm1148_vm6, %vm1144_vm5  ;;  %v1095_v5 = vpop.permute.xlu1 %1094 }
  0xeb   : > { %4955 = vmatpush3.bf16.msra.mxu1 %v5920_v14  ;;  %4892 = vmatprep.subr.bf16.mxu0 %v5926_v15  ;;  %v1098_v6 = vpop.permute.xlu0 %1097  ;;  %vm1150_vm14 = vcmp.eq.s32.totalorder %v6163_v56, %v1095_v5  ;;  %vm1152_vm1 = vcmp.eq.s32.totalorder %v6166_v57, %v1095_v5  ;;  %vm1149_vm6 = vcmp.eq.s32.totalorder %v6159_v53, %v1095_v5  ;;  %v5634_v15 = vld [vmem:[%s7887_s1 + $0x40] sm:$0xff]  }
  0xec   : > { %4956 = vmatprep.subr.bf16.mxu1 %v5938_v18  ;;  %vm1154_vm15 = vcmp.eq.s32.totalorder %v6163_v56, %v1098_v6  ;;  %v5635_v18 = vld [vmem:[%s7887_s1 + $0xc0] sm:$0xff]  }
  0xed   : > { %4266 = vmatmul.mubr.msk.bf16.gmra.mrb[36].mxu0 %vm4265_vm8, %v5750_v61  ;;  %vm4271_vm8 = vmpackc.low %vm1146_vm3, %vm1142_vm2  ;;  %vm1156_vm2 = vcmp.eq.s32.totalorder %v6166_v57, %v1098_v6 }
  0xee   : > { %4298 = vmatmul.mubr.msk.bf16.gmra.mrb[36].mxu1 %vm4297_vm11, %v5750_v61  ;;  %4268 = vmatprep.mubr.msk.bf16.mxu0 %vm4267_vm12, %v5750_v61  ;;  %vm1145_vm11 = vcmp.eq.s32.totalorder %v6159_v53, %v1092_v4  ;;  %vm1143_vm12 = vcmp.eq.s32.totalorder %v6169_v59, %v1089_v3  ;;  %vm4307_vm5 = vmpackc.low %vm1156_vm2, %vm1152_vm1  ;;  %v1101_v13 = vpop.permute.xlu1 %1100 }
  0xef   : > { %4300 = vmatprep.mubr.msk.bf16.mxu1 %vm4299_vm13, %v5750_v61  ;;  %4893 = vmatpush3.bf16.msra.mxu0 %v5945_v19  ;;  %vm1147_vm13 = vcmp.eq.s32.totalorder %v6169_v59, %v1092_v4  ;;  %vm4273_vm0 = vmpackc.low %vm1145_vm11, %vm1141_vm10  ;;  %v1104_v14 = vpop.permute.xlu0 %1103  ;;  %vm1158_vm10 = vcmp.eq.s32.totalorder %v6163_v56, %v1101_v13  ;;  %vm1157_vm2 = vcmp.eq.s32.totalorder %v6159_v53, %v1101_v13 }
  0xf0   : > { %4957 = vmatpush3.bf16.msra.mxu1 %v5952_v20  ;;  %4894 = vmatprep.subr.bf16.mxu0 %v5958_v21  ;;  %vm4305_vm3 = vmpackc.low %vm1147_vm13, %vm1143_vm12  ;;  %vm1162_vm11 = vcmp.eq.s32.totalorder %v6163_v56, %v1104_v14  ;;  %vm1160_vm13 = vcmp.eq.s32.totalorder %v6166_v57, %v1101_v13 }
  0xf1   : > { %4958 = vmatprep.subr.bf16.mxu1 %v5970_v24 }
  0xf2   : > { %v1107_v19 = vpop.permute.xlu1 %1106 }
  0xf3   : > { %4895 = vmatpush3.bf16.msra.mxu0 %v5977_v25  ;;  %v1110_v20 = vpop.permute.xlu0 %1109 }
  0xf4   : > { %4959 = vmatpush3.bf16.msra.mxu1 %v5984_v26  ;;  %4896 = vmatprep.subr.bf16.mxu0 %v5990_v27 }
  0xf5   : > { %4270 = vmatmul.mubr.msk.bf16.gmra.mrb[40].mxu0 %vm4269_vm4, %v5750_v61  ;;  %4960 = vmatprep.subr.bf16.mxu1 %v6002_v30  ;;  %vm4275_vm4 = vmpackc.low %vm1154_vm15, %vm1150_vm14  ;;  %vm1164_vm14 = vcmp.eq.s32.totalorder %v6166_v57, %v1104_v14 }
  0xf6   : > { %4302 = vmatmul.mubr.msk.bf16.gmra.mrb[40].mxu1 %vm4301_vm7, %v5750_v61  ;;  %4272 = vmatprep.mubr.msk.bf16.mxu0 %vm4271_vm8, %v5750_v61  ;;  %vm1153_vm7 = vcmp.eq.s32.totalorder %v6159_v53, %v1098_v6  ;;  %vm1151_vm8 = vcmp.eq.s32.totalorder %v6169_v59, %v1095_v5  ;;  %vm4311_vm1 = vmpackc.low %vm1164_vm14, %vm1160_vm13  ;;  %v1113_v21 = vpop.permute.xlu1 %1112  ;;  %vm1165_vm14 = vcmp.eq.s32.totalorder %v6159_v53, %v1107_v19 }
  0xf7   : > { %4304 = vmatprep.mubr.msk.bf16.mxu1 %vm4303_vm9, %v5750_v61  ;;  %4897 = vmatpush3.bf16.msra.mxu0 %v6009_v31  ;;  %vm1155_vm9 = vcmp.eq.s32.totalorder %v6169_v59, %v1098_v6  ;;  %vm4277_vm12 = vmpackc.low %vm1153_vm7, %vm1149_vm6  ;;  %vm1166_vm6 = vcmp.eq.s32.totalorder %v6163_v56, %v1107_v19  ;;  %vm1170_vm7 = vcmp.eq.s32.totalorder %v6163_v56, %v1110_v20  ;;  %v1116_v24 = vpop.permute.xlu0 %1115  ;;  %v5636_v31 = vld [vmem:[%s7887_s1] sm:$0xff]  }
  0xf8   : > { %4961 = vmatpush3.bf16.msra.mxu1 %v6016_v32  ;;  %4898 = vmatprep.subr.bf16.mxu0 %v6022_v33  ;;  %vm4309_vm15 = vmpackc.low %vm1155_vm9, %vm1151_vm8  ;;  %vm1168_vm9 = vcmp.eq.s32.totalorder %v6166_v57, %v1107_v19  ;;  %v5637_v32 = vld [vmem:[%s7887_s1 + $0x80] sm:$0xff]   ;;  %v5638_v33 = vld [vmem:[%s7887_s1 + $0x48] sm:$0xff]  }
  0xf9   : > { %4962 = vmatprep.subr.bf16.mxu1 %v6034_v36 }
  0xfa   : > { %v1537_v25 = vpop.permute.xlu1 %1536 }
  0xfb   : > { %4899 = vmatpush3.bf16.msra.mxu0 %v6041_v37  ;;  %v1540_v26 = vpop.permute.xlu0 %1539 }
  0xfc   : > { %4963 = vmatpush3.bf16.msra.mxu1 %v6048_v38  ;;  %4900 = vmatprep.subr.bf16.mxu0 %v6054_v39  ;;  %v5639_v38 = vld [vmem:[%s7887_s1 + $0xc8] sm:$0xff]  }
  0xfd   : > { %4274 = vmatmul.mubr.msk.bf16.gmra.mrb[44].mxu0 %vm4273_vm0, %v5750_v61  ;;  %4964 = vmatprep.subr.bf16.mxu1 %v6066_v42  ;;  %vm4279_vm0 = vmpackc.low %vm1162_vm11, %vm1158_vm10  ;;  %vm1172_vm10 = vcmp.eq.s32.totalorder %v6166_v57, %v1110_v20  ;;  %v5640_v39 = vld [vmem:[%s7887_s1 + $0x8] sm:$0xff]   ;;  %v5643_v42 = vld [vmem:[%s7887_s1 + $0xd0] sm:$0xff]  }
  0xfe   : > { %4306 = vmatmul.mubr.msk.bf16.gmra.mrb[44].mxu1 %vm4305_vm3, %v5750_v61  ;;  %4276 = vmatprep.mubr.msk.bf16.mxu0 %vm4275_vm4, %v5750_v61  ;;  %vm1161_vm3 = vcmp.eq.s32.totalorder %v6159_v53, %v1104_v14  ;;  %vm1159_vm4 = vcmp.eq.s32.totalorder %v6169_v59, %v1101_v13  ;;  %vm4315_vm13 = vmpackc.low %vm1172_vm10, %vm1168_vm9  ;;  %vm1173_vm10 = vcmp.eq.s32.totalorder %v6159_v53, %v1113_v21  ;;  %v1543_v27 = vpop.permute.xlu1 %1542 }
  0xff   : > { %4308 = vmatprep.mubr.msk.bf16.mxu1 %vm4307_vm5, %v5750_v61  ;;  %4901 = vmatpush3.bf16.msra.mxu0 %v6073_v43  ;;  %vm1163_vm5 = vcmp.eq.s32.totalorder %v6169_v59, %v1104_v14  ;;  %vm4281_vm8 = vmpackc.low %vm1161_vm3, %vm1157_vm2  ;;  %vm1174_vm2 = vcmp.eq.s32.totalorder %v6163_v56, %v1113_v21  ;;  %vm1178_vm3 = vcmp.eq.s32.totalorder %v6163_v56, %v1116_v24  ;;  %v1549_v37 = vpop.permute.xlu0 %1548  ;;  %v5644_v43 = vld [vmem:[%s7887_s1 + $0x10] sm:$0xff]  }
 0x100   : > { %4965 = vmatpush3.bf16.msra.mxu1 %v6080_v44  ;;  %4902 = vmatprep.subr.bf16.mxu0 %v6086_v45  ;;  %vm4313_vm11 = vmpackc.low %vm1163_vm5, %vm1159_vm4  ;;  %vm1176_vm5 = vcmp.eq.s32.totalorder %v6166_v57, %v1113_v21  ;;  %v5645_v44 = vld [vmem:[%s7887_s1 + $0x90] sm:$0xff]   ;;  %v5646_v45 = vld [vmem:[%s7887_s1 + $0x58] sm:$0xff]  }
 0x101   : > { %4966 = vmatprep.subr.bf16.mxu1 %v6092_v46 }
 0x102   : > { %v1546_v30 = vpop.permute.xlu1 %1545 }
 0x103   : > { %4903 = vmatpush3.bf16.msra.mxu0 %v6099_v47  ;;  %v1555_v47 = vpop.permute.xlu0 %1554 }
 0x104   : > { %4967 = vmatpush3.bf16.msra.mxu1 %v6106_v48  ;;  %5016 = vmatprep.subr.bf16.mxu0 %v5634_v15  ;;  %v5647_v48 = vld [vmem:[%s7887_s1 + $0xd8] sm:$0xff]  }
 0x105   : > { %4278 = vmatmul.mubr.msk.bf16.gmra.mrb[48].mxu0 %vm4277_vm12, %v5750_v61  ;;  %5080 = vmatprep.subr.bf16.mxu1 %v5635_v18  ;;  %vm4283_vm12 = vmpackc.low %vm1170_vm7, %vm1166_vm6  ;;  %vm1180_vm6 = vcmp.eq.s32.totalorder %v6166_v57, %v1116_v24 }
 0x106   : > { %4310 = vmatmul.mubr.msk.bf16.gmra.mrb[48].mxu1 %vm4309_vm15, %v5750_v61  ;;  %4280 = vmatprep.mubr.msk.bf16.mxu0 %vm4279_vm0, %v5750_v61  ;;  %vm1169_vm15 = vcmp.eq.s32.totalorder %v6159_v53, %v1110_v20  ;;  %vm1167_vm0 = vcmp.eq.s32.totalorder %v6169_v59, %v1107_v19  ;;  %vm4319_vm9 = vmpackc.low %vm1180_vm6, %vm1176_vm5  ;;  %vm1583_vm6 = vcmp.eq.s32.totalorder %v6159_v53, %v1537_v25  ;;  %v1552_v36 = vpop.permute.xlu1 %1551 }
 0x107   : > { %4312 = vmatprep.mubr.msk.bf16.mxu1 %vm4311_vm1, %v5750_v61  ;;  %vm1171_vm1 = vcmp.eq.s32.totalorder %v6169_v59, %v1110_v20  ;;  %vm4285_vm4 = vmpackc.low %vm1169_vm15, %vm1165_vm14  ;;  %vm1586_vm14 = vcmp.eq.s32.totalorder %v6166_v57, %v1537_v25  ;;  %vm1590_vm15 = vcmp.eq.s32.totalorder %v6166_v57, %v1540_v26  ;;  %v1561_v63 = vpop.permute.xlu0 %1560 }
 0x108   : > { %vm4317_vm7 = vmpackc.low %vm1171_vm1, %vm1167_vm0  ;;  %vm1175_vm1 = vcmp.eq.s32.totalorder %v6169_v59, %v1113_v21 }
 0x10a   : > { %v1558_v46 = vpop.permute.xlu1 %1557 }
 0x10b   : > { %v1567_v2 = vpop.permute.xlu0 %1566 }
 0x10d   : > { %4282 = vmatmul.mubr.msk.bf16.gmra.mrb[52].mxu0 %vm4281_vm8, %v5750_v61  ;;  %vm4287_vm8 = vmpackc.low %vm1178_vm3, %vm1174_vm2  ;;  %vm1179_vm2 = vcmp.eq.s32.totalorder %v6169_v59, %v1116_v24 }
 0x10e   : > { %4314 = vmatmul.mubr.msk.bf16.gmra.mrb[52].mxu1 %vm4313_vm11, %v5750_v61  ;;  %4284 = vmatprep.mubr.msk.bf16.mxu0 %vm4283_vm12, %v5750_v61  ;;  %vm1177_vm11 = vcmp.eq.s32.totalorder %v6159_v53, %v1116_v24  ;;  %vm1584_vm12 = vcmp.eq.s32.totalorder %v6163_v56, %v1537_v25  ;;  %vm4321_vm5 = vmpackc.low %vm1179_vm2, %vm1175_vm1  ;;  %vm1591_vm2 = vcmp.eq.s32.totalorder %v6159_v53, %v1543_v27  ;;  %v1564_v62 = vpop.permute.xlu1 %1563 }
 0x10f   : > { %4316 = vmatprep.mubr.msk.bf16.mxu1 %vm4315_vm13, %v5750_v61  ;;  %vm1588_vm13 = vcmp.eq.s32.totalorder %v6163_v56, %v1540_v26  ;;  %vm4289_vm0 = vmpackc.low %vm1177_vm11, %vm1173_vm10  ;;  %v1573_v34 = vpop.permute.xlu0 %1572 }
 0x110   : > { %vm4387_vm3 = vmpackc.low %vm1588_vm13, %vm1584_vm12  ;;  %vm1592_vm12 = vcmp.eq.s32.totalorder %v6163_v56, %v1543_v27  ;;  %vm1596_vm13 = vcmp.eq.s32.totalorder %v6163_v56, %v1546_v30 }
 0x112   : > { %v1570_v1 = vpop.permute.xlu1 %1569 }
 0x113   : > { %v1579_v3 = vpop.permute.xlu0 %1578 }
 0x115   : > { %4286 = vmatmul.mubr.msk.bf16.gmra.mrb[56].mxu0 %vm4285_vm4, %v5750_v61  ;;  %vm4419_vm4 = vmpackc.low %vm1590_vm15, %vm1586_vm14  ;;  %vm1594_vm14 = vcmp.eq.s32.totalorder %v6166_v57, %v1543_v27  ;;  %vm1598_vm15 = vcmp.eq.s32.totalorder %v6166_v57, %v1546_v30 }
 0x116   : > { %4318 = vmatmul.mubr.msk.bf16.gmra.mrb[56].mxu1 %vm4317_vm7, %v5750_v61  ;;  %4288 = vmatprep.mubr.msk.bf16.mxu0 %vm4287_vm8, %v5750_v61  ;;  %vm1587_vm7 = vcmp.eq.s32.totalorder %v6159_v53, %v1540_v26  ;;  %vm1585_vm8 = vcmp.eq.s32.totalorder %v6169_v59, %v1537_v25  ;;  %vm4423_vm1 = vmpackc.low %vm1598_vm15, %vm1594_vm14  ;;  %vm1599_vm14 = vcmp.eq.s32.totalorder %v6159_v53, %v1549_v37  ;;  %v1576_v29 = vpop.permute.xlu1 %1575 }
 0x117   : > { %4320 = vmatprep.mubr.msk.bf16.mxu1 %vm4319_vm9, %v5750_v61  ;;  %vm1589_vm9 = vcmp.eq.s32.totalorder %v6169_v59, %v1540_v26  ;;  %vm4389_vm10 = vmpackc.low %vm1587_vm7, %vm1583_vm6  ;;  %vm1600_vm6 = vcmp.eq.s32.totalorder %v6163_v56, %v1549_v37  ;;  %vm1604_vm7 = vcmp.eq.s32.totalorder %v6163_v56, %v1552_v36  ;;  %vm1603_vm15 = vcmp.eq.s32.totalorder %v6159_v53, %v1552_v36  ;;  %v2003_v5 = vpop.permute.xlu0 %2002 }
 0x118   : > { %vm4421_vm11 = vmpackc.low %vm1589_vm9, %vm1585_vm8  ;;  %vm1602_vm9 = vcmp.eq.s32.totalorder %v6166_v57, %v1549_v37 }
 0x11a   : > { %v1582_v35 = vpop.permute.xlu1 %1581 }
 0x11b   : > { %v2012_v13 = vpop.permute.xlu0 %2011 }
 0x11d   : > { %4290 = vmatmul.mubr.msk.bf16.gmra.mrb[60].mxu0 %vm4289_vm0, %v5750_v61  ;;  %vm4391_vm0 = vmpackc.low %vm1596_vm13, %vm1592_vm12 }
 0x11e   : > { %4322 = vmatmul.mubr.msk.bf16.gmra.mrb[60].mxu1 %vm4321_vm5, %v5750_v61  ;;  %4388 = vmatprep.mubr.msk.bf16.mxu0 %vm4387_vm3, %v5750_v61  ;;  %vm1595_vm3 = vcmp.eq.s32.totalorder %v6159_v53, %v1546_v30  ;;  %vm1597_vm5 = vcmp.eq.s32.totalorder %v6169_v59, %v1546_v30  ;;  %vm4395_vm12 = vmpackc.low %vm1604_vm7, %vm1600_vm6  ;;  %vm1614_vm6 = vcmp.eq.s32.totalorder %v6166_v57, %v1558_v46  ;;  %v2006_v4 = vpop.permute.xlu1 %2005 }
 0x11f   : > { %4420 = vmatprep.mubr.msk.bf16.mxu1 %vm4419_vm4, %v5750_v61  ;;  %vm1593_vm4 = vcmp.eq.s32.totalorder %v6169_v59, %v1543_v27  ;;  %vm4393_vm8 = vmpackc.low %vm1595_vm3, %vm1591_vm2  ;;  %vm1608_vm2 = vcmp.eq.s32.totalorder %v6163_v56, %v1555_v47  ;;  %vm1612_vm3 = vcmp.eq.s32.totalorder %v6163_v56, %v1558_v46  ;;  %v2018_v15 = vpop.permute.xlu0 %2017 }
 0x122   : > { %v2009_v6 = vpop.permute.xlu1 %2008 }
 0x123   : > { %v2024_v19 = vpop.permute.xlu0 %2023 }
 0x125   : > { %4390 = vmatmul.mubr.msk.bf16.vlgmr.msra.gmra.mrb[64].mxu0 %vm4389_vm10, %v5750_v61  ;;  %vm1606_vm10 = vcmp.eq.s32.totalorder %v6166_v57, %v1552_v36 }
 0x126   : > { %4422 = vmatmul.mubr.msk.bf16.vlgmr.msra.gmra.mrb[64].mxu1 %vm4421_vm11, %v5750_v61  ;;  %5017 = vmatpush3.bf16.msra.mxu0 %v5636_v31  ;;  %vm4425_vm11 = vmpackc.low %vm1597_vm5, %vm1593_vm4  ;;  %vm1610_vm5 = vcmp.eq.s32.totalorder %v6166_v57, %v1555_v47  ;;  %v2015_v14 = vpop.permute.xlu1 %2014 }
 0x127   : > { %5081 = vmatpush3.bf16.msra.mxu1 %v5637_v32  ;;  %4392 = vmatprep.mubr.msk.bf16.mxu0 %vm4391_vm0, %v5750_v61  ;;  %vm4427_vm13 = vmpackc.low %vm1606_vm10, %vm1602_vm9  ;;  %vm1601_vm0 = vcmp.eq.s32.totalorder %v6169_v59, %v1549_v37  ;;  %vm1607_vm10 = vcmp.eq.s32.totalorder %v6159_v53, %v1555_v47  ;;  %v2030_v20 = vpop.permute.xlu0 %2029 }
 0x128   : > { %4424 = vmatprep.mubr.msk.bf16.mxu1 %vm4423_vm1, %v5750_v61  ;;  %5018 = vmatprep.subr.bf16.mxu0 %v5638_v33  ;;  %vm1605_vm1 = vcmp.eq.s32.totalorder %v6169_v59, %v1552_v36  ;;  %vm4397_vm4 = vmpackc.low %vm1603_vm15, %vm1599_vm14  ;;  %vm1616_vm14 = vcmp.eq.s32.totalorder %v6163_v56, %v1561_v63  ;;  %vm1620_vm15 = vcmp.eq.s32.totalorder %v6163_v56, %v1564_v62 }
 0x129   : > { %5082 = vmatprep.subr.bf16.mxu1 %v5639_v38  ;;  %vm4429_vm7 = vmpackc.low %vm1605_vm1, %vm1601_vm0  ;;  %vm1618_vm1 = vcmp.eq.s32.totalorder %v6166_v57, %v1561_v63 }
 0x12a   : > { %5019 = vmatpush3.bf16.msra.mxu0 %v5640_v39  ;;  %vm4431_vm9 = vmpackc.low %vm1614_vm6, %vm1610_vm5  ;;  %vm1615_vm6 = vcmp.eq.s32.totalorder %v6159_v53, %v1561_v63  ;;  %v2021_v18 = vpop.permute.xlu1 %2020 }
 0x12b   : > { %5083 = vmatpush3.bf16.msra.mxu1 %v5641_v40  ;;  %5020 = vmatprep.subr.bf16.mxu0 %v5642_v41  ;;  %v2036_v41 = vpop.permute.xlu0 %2035 }
 0x12c   : > { %5084 = vmatprep.subr.bf16.mxu1 %v5643_v42 }
 0x12d   : > { %4394 = vmatmul.mubr.msk.bf16.gmra.mrb[68].mxu0 %vm4393_vm8, %v5750_v61  ;;  %vm4399_vm8 = vmpackc.low %vm1612_vm3, %vm1608_vm2  ;;  %vm1622_vm2 = vcmp.eq.s32.totalorder %v6166_v57, %v1564_v62 }
 0x12e   : > { %4426 = vmatmul.mubr.msk.bf16.gmra.mrb[68].mxu1 %vm4425_vm11, %v5750_v61  ;;  %4396 = vmatprep.mubr.msk.bf16.mxu0 %vm4395_vm12, %v5750_v61  ;;  %vm1611_vm11 = vcmp.eq.s32.totalorder %v6159_v53, %v1558_v46  ;;  %vm1609_vm12 = vcmp.eq.s32.totalorder %v6169_v59, %v1555_v47  ;;  %vm4435_vm5 = vmpackc.low %vm1622_vm2, %vm1618_vm1  ;;  %vm1623_vm2 = vcmp.eq.s32.totalorder %v6159_v53, %v1567_v2  ;;  %v2027_v21 = vpop.permute.xlu1 %2026 }
 0x12f   : > { %4428 = vmatprep.mubr.msk.bf16.mxu1 %vm4427_vm13, %v5750_v61  ;;  %5021 = vmatpush3.bf16.msra.mxu0 %v5644_v43  ;;  %vm1613_vm13 = vcmp.eq.s32.totalorder %v6169_v59, %v1558_v46  ;;  %vm4401_vm0 = vmpackc.low %vm1611_vm11, %vm1607_vm10  ;;  %vm1624_vm10 = vcmp.eq.s32.totalorder %v6163_v56, %v1567_v2  ;;  %vm1628_vm11 = vcmp.eq.s32.totalorder %v6163_v56, %v1570_v1 }
 0x130   : > { %5085 = vmatpush3.bf16.msra.mxu1 %v5645_v44  ;;  %5022 = vmatprep.subr.bf16.mxu0 %v5646_v45  ;;  %vm4433_vm3 = vmpackc.low %vm1613_vm13, %vm1609_vm12  ;;  %vm1626_vm13 = vcmp.eq.s32.totalorder %v6166_v57, %v1567_v2 }
 0x131   : > { %5086 = vmatprep.subr.bf16.mxu1 %v5647_v48 }
 0x132   : > { %v2033_v43 = vpop.permute.xlu1 %2032 }
 0x133   : > { %5023 = vmatpush3.bf16.msra.mxu0 %v5648_v49 }
 0x134   : > { %5087 = vmatpush3.bf16.msra.mxu1 %v5649_v50  ;;  %5024 = vmatprep.subr.bf16.mxu0 %v5650_v51 }
 0x135   : > { %4398 = vmatmul.mubr.msk.bf16.gmra.mrb[72].mxu0 %vm4397_vm4, %v5750_v61  ;;  %5088 = vmatprep.subr.bf16.mxu1 %v5651_v54  ;;  %vm4403_vm4 = vmpackc.low %vm1620_vm15, %vm1616_vm14  ;;  %vm1630_vm14 = vcmp.eq.s32.totalorder %v6166_v57, %v1570_v1 }
 0x136   : > { %4430 = vmatmul.mubr.msk.bf16.gmra.mrb[72].mxu1 %vm4429_vm7, %v5750_v61  ;;  %4400 = vmatprep.mubr.msk.bf16.mxu0 %vm4399_vm8, %v5750_v61  ;;  %vm1619_vm7 = vcmp.eq.s32.totalorder %v6159_v53, %v1564_v62  ;;  %vm1617_vm8 = vcmp.eq.s32.totalorder %v6169_v59, %v1561_v63  ;;  %vm4439_vm1 = vmpackc.low %vm1630_vm14, %vm1626_vm13  ;;  %vm1631_vm14 = vcmp.eq.s32.totalorder %v6159_v53, %v1573_v34  ;;  %v2042_v63 = vpop.permute.xlu0 %2041 }
 0x137   : > { %4432 = vmatprep.mubr.msk.bf16.mxu1 %vm4431_vm9, %v5750_v61  ;;  %5025 = vmatpush3.bf16.msra.mxu0 %v5652_v55  ;;  %vm1621_vm9 = vcmp.eq.s32.totalorder %v6169_v59, %v1564_v62  ;;  %vm4405_vm12 = vmpackc.low %vm1619_vm7, %vm1615_vm6  ;;  %vm1632_vm6 = vcmp.eq.s32.totalorder %v6163_v56, %v1573_v34  ;;  %vm1636_vm7 = vcmp.eq.s32.totalorder %v6163_v56, %v1576_v29 }
 0x138   : > { %5089 = vmatpush3.bf16.msra.mxu1 %v5653_v58  ;;  %5026 = vmatprep.subr.bf16.mxu0 %v5654_v60  ;;  %vm4437_vm15 = vmpackc.low %vm1621_vm9, %vm1617_vm8  ;;  %vm1634_vm9 = vcmp.eq.s32.totalorder %v6166_v57, %v1573_v34 }
 0x139   : > { %5090 = vmatprep.subr.bf16.mxu1 %v5655_v7 }
 0x13b   : > { %5027 = vmatpush3.bf16.msra.mxu0 %v5656_v8  ;;  %v2039_v8 = vpop.permute.xlu1 %2038 }
 0x13c   : > { %5091 = vmatpush3.bf16.msra.mxu1 %v5657_v9  ;;  %5028 = vmatprep.subr.bf16.mxu0 %v5658_v10 }
 0x13d   : > { %4402 = vmatmul.mubr.msk.bf16.gmra.mrb[76].mxu0 %vm4401_vm0, %v5750_v61  ;;  %5092 = vmatprep.subr.bf16.mxu1 %v5659_v11  ;;  %vm4407_vm0 = vmpackc.low %vm1628_vm11, %vm1624_vm10  ;;  %vm1638_vm10 = vcmp.eq.s32.totalorder %v6166_v57, %v1576_v29 }
 0x13e   : > { %4434 = vmatmul.mubr.msk.bf16.gmra.mrb[76].mxu1 %vm4433_vm3, %v5750_v61  ;;  %4404 = vmatprep.mubr.msk.bf16.mxu0 %vm4403_vm4, %v5750_v61  ;;  %vm1627_vm3 = vcmp.eq.s32.totalorder %v6159_v53, %v1570_v1  ;;  %vm1625_vm4 = vcmp.eq.s32.totalorder %v6169_v59, %v1567_v2  ;;  %vm4443_vm13 = vmpackc.low %vm1638_vm10, %vm1634_vm9  ;;  %vm1639_vm10 = vcmp.eq.s32.totalorder %v6159_v53, %v1579_v3 }
 0x13f   : > { %4436 = vmatprep.mubr.msk.bf16.mxu1 %vm4435_vm5, %v5750_v61  ;;  %5029 = vmatpush3.bf16.msra.mxu0 %v5660_v12  ;;  %vm1629_vm5 = vcmp.eq.s32.totalorder %v6169_v59, %v1570_v1  ;;  %vm4409_vm8 = vmpackc.low %vm1627_vm3, %vm1623_vm2  ;;  %vm1640_vm2 = vcmp.eq.s32.totalorder %v6163_v56, %v1579_v3  ;;  %vm1644_vm3 = vcmp.eq.s32.totalorder %v6163_v56, %v1582_v35 }
 0x140   : > { %5093 = vmatpush3.bf16.msra.mxu1 %v5661_v16  ;;  %5030 = vmatprep.subr.bf16.mxu0 %v5662_v17  ;;  %vm4441_vm11 = vmpackc.low %vm1629_vm5, %vm1625_vm4  ;;  %vm1642_vm5 = vcmp.eq.s32.totalorder %v6166_v57, %v1579_v3 }
 0x141   : > { %5094 = vmatprep.subr.bf16.mxu1 %v5663_v22 }
 0x143   : > { %5031 = vmatpush3.bf16.msra.mxu0 %v5664_v23 }
 0x144   : > { %5095 = vmatpush3.bf16.msra.mxu1 %v5665_v28 }
 0x145   : > { %4406 = vmatmul.mubr.msk.bf16.gmra.mrb[80].mxu0 %vm4405_vm12, %v5750_v61  ;;  %vm4411_vm12 = vmpackc.low %vm1636_vm7, %vm1632_vm6  ;;  %vm1646_vm6 = vcmp.eq.s32.totalorder %v6166_v57, %v1582_v35 }
 0x146   : > { %4438 = vmatmul.mubr.msk.bf16.gmra.mrb[80].mxu1 %vm4437_vm15, %v5750_v61  ;;  %4408 = vmatprep.mubr.msk.bf16.mxu0 %vm4407_vm0, %v5750_v61  ;;  %vm1635_vm15 = vcmp.eq.s32.totalorder %v6159_v53, %v1576_v29  ;;  %vm1633_vm0 = vcmp.eq.s32.totalorder %v6169_v59, %v1573_v34  ;;  %vm4447_vm9 = vmpackc.low %vm1646_vm6, %vm1642_vm5  ;;  %vm2053_vm6 = vcmp.eq.s32.totalorder %v6159_v53, %v2006_v4 }
 0x147   : > { %4440 = vmatprep.mubr.msk.bf16.mxu1 %vm4439_vm1, %v5750_v61  ;;  %vm1637_vm1 = vcmp.eq.s32.totalorder %v6169_v59, %v1576_v29  ;;  %vm4413_vm4 = vmpackc.low %vm1635_vm15, %vm1631_vm14  ;;  %vm2052_vm14 = vcmp.eq.s32.totalorder %v6166_v57, %v2003_v5  ;;  %vm2056_vm15 = vcmp.eq.s32.totalorder %v6166_v57, %v2006_v4 }
 0x148   : > { %vm4445_vm7 = vmpackc.low %vm1637_vm1, %vm1633_vm0  ;;  %vm1641_vm1 = vcmp.eq.s32.totalorder %v6169_v59, %v1579_v3  ;;  %v2048_v3 = vpop.permute.xlu0 %2047 }
 0x14d   : > { %4410 = vmatmul.mubr.msk.bf16.gmra.mrb[84].mxu0 %vm4409_vm8, %v5750_v61  ;;  %vm4415_vm8 = vmpackc.low %vm1644_vm3, %vm1640_vm2  ;;  %vm1645_vm2 = vcmp.eq.s32.totalorder %v6169_v59, %v1582_v35 }
 0x14e   : > { %4442 = vmatmul.mubr.msk.bf16.gmra.mrb[84].mxu1 %vm4441_vm11, %v5750_v61  ;;  %4412 = vmatprep.mubr.msk.bf16.mxu0 %vm4411_vm12, %v5750_v61  ;;  %vm1643_vm11 = vcmp.eq.s32.totalorder %v6159_v53, %v1582_v35  ;;  %vm2050_vm12 = vcmp.eq.s32.totalorder %v6163_v56, %v2003_v5  ;;  %vm4449_vm5 = vmpackc.low %vm1645_vm2, %vm1641_vm1  ;;  %vm2057_vm2 = vcmp.eq.s32.totalorder %v6159_v53, %v2009_v6  ;;  %v2045_v35 = vpop.permute.xlu1 %2044 }
 0x14f   : > { %4444 = vmatprep.mubr.msk.bf16.mxu1 %vm4443_vm13, %v5750_v61  ;;  %vm2054_vm13 = vcmp.eq.s32.totalorder %v6163_v56, %v2006_v4  ;;  %vm4417_vm0 = vmpackc.low %vm1643_vm11, %vm1639_vm10  ;;  %vm2058_vm11 = vcmp.eq.s32.totalorder %v6163_v56, %v2009_v6 }
 0x150   : > { %vm4515_vm3 = vmpackc.low %vm2054_vm13, %vm2050_vm12  ;;  %vm2062_vm12 = vcmp.eq.s32.totalorder %v6163_v56, %v2012_v13 }
 0x155   : > { %4414 = vmatmul.mubr.msk.bf16.gmra.mrb[88].mxu0 %vm4413_vm4, %v5750_v61  ;;  %vm4547_vm4 = vmpackc.low %vm2056_vm15, %vm2052_vm14  ;;  %vm2060_vm14 = vcmp.eq.s32.totalorder %v6166_v57, %v2009_v6  ;;  %vm2064_vm15 = vcmp.eq.s32.totalorder %v6166_v57, %v2012_v13 }
 0x156   : > { %4446 = vmatmul.mubr.msk.bf16.gmra.mrb[88].mxu1 %vm4445_vm7, %v5750_v61  ;;  %4416 = vmatprep.mubr.msk.bf16.mxu0 %vm4415_vm8, %v5750_v61  ;;  %vm2049_vm7 = vcmp.eq.s32.totalorder %v6159_v53, %v2003_v5  ;;  %vm2055_vm8 = vcmp.eq.s32.totalorder %v6169_v59, %v2006_v4  ;;  %vm4551_vm1 = vmpackc.low %vm2064_vm15, %vm2060_vm14  ;;  %vm2065_vm14 = vcmp.eq.s32.totalorder %v6159_v53, %v2015_v14 }
 0x157   : > { %4448 = vmatprep.mubr.msk.bf16.mxu1 %vm4447_vm9, %v5750_v61  ;;  %vm2051_vm9 = vcmp.eq.s32.totalorder %v6169_v59, %v2003_v5  ;;  %vm4517_vm10 = vmpackc.low %vm2053_vm6, %vm2049_vm7  ;;  %vm2066_vm6 = vcmp.eq.s32.totalorder %v6163_v56, %v2015_v14  ;;  %vm2070_vm7 = vcmp.eq.s32.totalorder %v6163_v56, %v2018_v15  ;;  %vm2069_vm15 = vcmp.eq.s32.totalorder %v6159_v53, %v2018_v15 }
 0x158   : > { %vm4549_vm13 = vmpackc.low %vm2055_vm8, %vm2051_vm9  ;;  %vm2068_vm9 = vcmp.eq.s32.totalorder %v6166_v57, %v2015_v14 }
 0x15d   : > { %4418 = vmatmul.mubr.msk.bf16.gmra.mrb[92].mxu0 %vm4417_vm0, %v5750_v61  ;;  %vm4519_vm0 = vmpackc.low %vm2062_vm12, %vm2058_vm11 }
 0x15e   : > { %4450 = vmatmul.mubr.msk.bf16.gmra.mrb[92].mxu1 %vm4449_vm5, %v5750_v61  ;;  %4516 = vmatprep.mubr.msk.bf16.mxu0 %vm4515_vm3, %v5750_v61  ;;  %vm2061_vm3 = vcmp.eq.s32.totalorder %v6159_v53, %v2012_v13  ;;  %vm2063_vm5 = vcmp.eq.s32.totalorder %v6169_v59, %v2012_v13  ;;  %vm4523_vm12 = vmpackc.low %vm2070_vm7, %vm2066_vm6  ;;  %vm2080_vm6 = vcmp.eq.s32.totalorder %v6166_v57, %v2024_v19 }
 0x15f   : > { %4548 = vmatprep.mubr.msk.bf16.mxu1 %vm4547_vm4, %v5750_v61  ;;  %vm2059_vm4 = vcmp.eq.s32.totalorder %v6169_v59, %v2009_v6  ;;  %vm4521_vm8 = vmpackc.low %vm2061_vm3, %vm2057_vm2  ;;  %vm2074_vm2 = vcmp.eq.s32.totalorder %v6163_v56, %v2021_v18  ;;  %vm2078_vm3 = vcmp.eq.s32.totalorder %v6163_v56, %v2024_v19 }
 0x160   : > { %vm4553_vm11 = vmpackc.low %vm2063_vm5, %vm2059_vm4  ;;  %vm2076_vm5 = vcmp.eq.s32.totalorder %v6166_v57, %v2021_v18 }
 0x161   : > { %vm4525_vm4 = vmpackc.low %vm2069_vm15, %vm2065_vm14  ;;  %vm2082_vm14 = vcmp.eq.s32.totalorder %v6163_v56, %v2027_v21  ;;  %vm2086_vm15 = vcmp.eq.s32.totalorder %v6163_v56, %v2030_v20 }
 0x165   : > { %4518 = vmatmul.mubr.msk.bf16.vlgmr.msra.gmra.mrb[96].mxu0 %vm4517_vm10, %v5750_v61  ;;  %vm2072_vm10 = vcmp.eq.s32.totalorder %v6166_v57, %v2018_v15 }
 0x166   : > { %4550 = vmatmul.mubr.msk.bf16.vlgmr.msra.gmra.mrb[96].mxu1 %vm4549_vm13, %v5750_v61  ;;  %4520 = vmatprep.mubr.msk.bf16.mxu0 %vm4519_vm0, %v5750_v61  ;;  %vm4555_vm13 = vmpackc.low %vm2072_vm10, %vm2068_vm9  ;;  %vm2067_vm0 = vcmp.eq.s32.totalorder %v6169_v59, %v2015_v14  ;;  %vm2073_vm10 = vcmp.eq.s32.totalorder %v6159_v53, %v2021_v18 }
 0x167   : > { %4552 = vmatprep.mubr.msk.bf16.mxu1 %vm4551_vm1, %v5750_v61  ;;  %vm2071_vm1 = vcmp.eq.s32.totalorder %v6169_v59, %v2018_v15  ;;  %vm4559_vm9 = vmpackc.low %vm2080_vm6, %vm2076_vm5  ;;  %vm2081_vm6 = vcmp.eq.s32.totalorder %v6159_v53, %v2027_v21 }
 0x168   : > { %vm4557_vm7 = vmpackc.low %vm2071_vm1, %vm2067_vm0  ;;  %vm2084_vm1 = vcmp.eq.s32.totalorder %v6166_v57, %v2027_v21 }
 0x16d   : > { %4522 = vmatmul.mubr.msk.bf16.gmra.mrb[100].mxu0 %vm4521_vm8, %v5750_v61  ;;  %vm4527_vm8 = vmpackc.low %vm2078_vm3, %vm2074_vm2  ;;  %vm2088_vm2 = vcmp.eq.s32.totalorder %v6166_v57, %v2030_v20 }
 0x16e   : > { %4554 = vmatmul.mubr.msk.bf16.gmra.mrb[100].mxu1 %vm4553_vm11, %v5750_v61  ;;  %4524 = vmatprep.mubr.msk.bf16.mxu0 %vm4523_vm12, %v5750_v61  ;;  %vm2077_vm11 = vcmp.eq.s32.totalorder %v6159_v53, %v2024_v19  ;;  %vm2075_vm12 = vcmp.eq.s32.totalorder %v6169_v59, %v2021_v18  ;;  %vm4563_vm5 = vmpackc.low %vm2088_vm2, %vm2084_vm1  ;;  %vm2089_vm2 = vcmp.eq.s32.totalorder %v6159_v53, %v2033_v43 }
 0x16f   : > { %4556 = vmatprep.mubr.msk.bf16.mxu1 %vm4555_vm13, %v5750_v61  ;;  %vm2079_vm13 = vcmp.eq.s32.totalorder %v6169_v59, %v2024_v19  ;;  %vm4529_vm0 = vmpackc.low %vm2077_vm11, %vm2073_vm10  ;;  %vm2090_vm10 = vcmp.eq.s32.totalorder %v6163_v56, %v2033_v43  ;;  %vm2094_vm11 = vcmp.eq.s32.totalorder %v6163_v56, %v2036_v41 }
 0x170   : > { %vm4561_vm3 = vmpackc.low %vm2079_vm13, %vm2075_vm12  ;;  %vm2092_vm13 = vcmp.eq.s32.totalorder %v6166_v57, %v2033_v43 }
 0x175   : > { %4526 = vmatmul.mubr.msk.bf16.gmra.mrb[104].mxu0 %vm4525_vm4, %v5750_v61  ;;  %vm4531_vm4 = vmpackc.low %vm2086_vm15, %vm2082_vm14  ;;  %vm2096_vm14 = vcmp.eq.s32.totalorder %v6166_v57, %v2036_v41 }
 0x176   : > { %4558 = vmatmul.mubr.msk.bf16.gmra.mrb[104].mxu1 %vm4557_vm7, %v5750_v61  ;;  %4528 = vmatprep.mubr.msk.bf16.mxu0 %vm4527_vm8, %v5750_v61  ;;  %vm2085_vm7 = vcmp.eq.s32.totalorder %v6159_v53, %v2030_v20  ;;  %vm2083_vm8 = vcmp.eq.s32.totalorder %v6169_v59, %v2027_v21  ;;  %vm4567_vm1 = vmpackc.low %vm2096_vm14, %vm2092_vm13  ;;  %vm2097_vm14 = vcmp.eq.s32.totalorder %v6159_v53, %v2039_v8 }
 0x177   : > { %4560 = vmatprep.mubr.msk.bf16.mxu1 %vm4559_vm9, %v5750_v61  ;;  %vm2087_vm9 = vcmp.eq.s32.totalorder %v6169_v59, %v2030_v20  ;;  %vm4533_vm12 = vmpackc.low %vm2085_vm7, %vm2081_vm6  ;;  %vm2098_vm6 = vcmp.eq.s32.totalorder %v6163_v56, %v2039_v8  ;;  %vm2102_vm7 = vcmp.eq.s32.totalorder %v6163_v56, %v2042_v63 }
 0x178   : > { %v4648_v24 = vpop.f32.mrb[0].mxu0  ;;  %vm4565_vm15 = vmpackc.low %vm2087_vm9, %vm2083_vm8  ;;  %vm2100_vm9 = vcmp.eq.s32.totalorder %v6166_v57, %v2039_v8 }
 0x179   : > { %v4712_v25 = vpop.f32.mrb[0].mxu1  ;;  %v4649_v26 = vpop.f32.mrb[1].mxu0 }
 0x17a   : > { %v4650_v27 = vadd.f32 %v4649_v26, %v4648_v24  ;;  %v4713_v30 = vpop.f32.mrb[1].mxu1  ;;  %v4651_v31 = vpop.f32.mrb[2].mxu0 }
 0x17b   : > { %v4714_v32 = vadd.f32 %v4713_v30, %v4712_v25  ;;  %v4715_v33 = vpop.f32.mrb[2].mxu1  ;;  %v4652_v36 = vpop.f32.mrb[3].mxu0 }
 0x17c   : > { %v4653_v37 = vadd.f32 %v4652_v36, %v4651_v31  ;;  %v4716_v38 = vpop.f32.mrb[3].mxu1 }
 0x17d   : > { %v6674_v39 = vadd.f32 %v4714_v32, %v4650_v27  ;;  %v4717_v40 = vadd.f32 %v4716_v38, %v4715_v33  ;;  %4530 = vmatmul.mubr.msk.bf16.gmra.mrb[108].mxu0 %vm4529_vm0, %v5750_v61  ;;  %vm4535_vm0 = vmpackc.low %vm2094_vm11, %vm2090_vm10  ;;  %vm2104_vm10 = vcmp.eq.s32.totalorder %v6166_v57, %v2042_v63 }
 0x17e   : > { %4562 = vmatmul.mubr.msk.bf16.gmra.mrb[108].mxu1 %vm4561_vm3, %v5750_v61  ;;  %4532 = vmatprep.mubr.msk.bf16.mxu0 %vm4531_vm4, %v5750_v61  ;;  %vm2093_vm3 = vcmp.eq.s32.totalorder %v6159_v53, %v2036_v41  ;;  %vm2091_vm4 = vcmp.eq.s32.totalorder %v6169_v59, %v2033_v43  ;;  %vm4571_vm13 = vmpackc.low %vm2104_vm10, %vm2100_vm9  ;;  %vm2105_vm10 = vcmp.eq.s32.totalorder %v6159_v53, %v2045_v35 }
 0x17f   : > { %v6679_v42 = vadd.f32 %v4717_v40, %v4653_v37  ;;  %4564 = vmatprep.mubr.msk.bf16.mxu1 %vm4563_vm5, %v5750_v61  ;;  %vm2095_vm5 = vcmp.eq.s32.totalorder %v6169_v59, %v2036_v41  ;;  %vm4537_vm8 = vmpackc.low %vm2093_vm3, %vm2089_vm2  ;;  %vm2106_vm2 = vcmp.eq.s32.totalorder %v6163_v56, %v2045_v35  ;;  %vm2110_vm3 = vcmp.eq.s32.totalorder %v6163_v56, %v2048_v3 }
 0x180   : > { %v4654_v44 = vpop.f32.mrb[4].mxu0  ;;  %vm4569_vm11 = vmpackc.low %vm2095_vm5, %vm2091_vm4  ;;  %vm2108_vm5 = vcmp.eq.s32.totalorder %v6166_v57, %v2045_v35 }
 0x181   : > { %v4718_v45 = vpop.f32.mrb[4].mxu1  ;;  %v4655_v46 = vpop.f32.mrb[5].mxu0 }
 0x182   : > { %v4656_v47 = vadd.f32 %v4655_v46, %v4654_v44  ;;  %v4719_v48 = vpop.f32.mrb[5].mxu1  ;;  %v4657_v49 = vpop.f32.mrb[6].mxu0 }
 0x183   : > { %v4720_v50 = vadd.f32 %v4719_v48, %v4718_v45  ;;  %v4721_v51 = vpop.f32.mrb[6].mxu1  ;;  %v4658_v54 = vpop.f32.mrb[7].mxu0 }
 0x184   : > { %v4659_v55 = vadd.f32 %v4658_v54, %v4657_v49  ;;  %v4722_v58 = vpop.f32.mrb[7].mxu1 }
 0x185   : > { %v6692_v60 = vadd.f32 %v4720_v50, %v4656_v47  ;;  %v4723_v62 = vadd.f32 %v4722_v58, %v4721_v51  ;;  %4534 = vmatmul.mubr.msk.bf16.gmra.mrb[112].mxu0 %vm4533_vm12, %v5750_v61  ;;  %vm4539_vm12 = vmpackc.low %vm2102_vm7, %vm2098_vm6  ;;  %vm2112_vm6 = vcmp.eq.s32.totalorder %v6166_v57, %v2048_v3 }
 0x186   : > { %4566 = vmatmul.mubr.msk.bf16.gmra.mrb[112].mxu1 %vm4565_vm15, %v5750_v61  ;;  %4536 = vmatprep.mubr.msk.bf16.mxu0 %vm4535_vm0, %v5750_v61  ;;  %vm2101_vm15 = vcmp.eq.s32.totalorder %v6159_v53, %v2042_v63  ;;  %vm2099_vm0 = vcmp.eq.s32.totalorder %v6169_v59, %v2039_v8  ;;  %vm4575_vm9 = vmpackc.low %vm2112_vm6, %vm2108_vm5 }
 0x187   : > { %v6697_v7 = vadd.f32 %v4723_v62, %v4659_v55  ;;  %4568 = vmatprep.mubr.msk.bf16.mxu1 %vm4567_vm1, %v5750_v61  ;;  %vm2103_vm1 = vcmp.eq.s32.totalorder %v6169_v59, %v2042_v63  ;;  %vm4541_vm4 = vmpackc.low %vm2101_vm15, %vm2097_vm14 }
 0x188   : > { %v4660_v9 = vpop.f32.mrb[8].mxu0  ;;  %vm4573_vm7 = vmpackc.low %vm2103_vm1, %vm2099_vm0  ;;  %vm2659_vm0 = vcmask 130048   ;;  %vm2676_vm1 = vcmask 261120  }
 0x189   : > { %v4724_v10 = vpop.f32.mrb[8].mxu1  ;;  %v4661_v11 = vpop.f32.mrb[9].mxu0 }
 0x18a   : > { %v4662_v12 = vadd.f32 %v4661_v11, %v4660_v9  ;;  %v4725_v16 = vpop.f32.mrb[9].mxu1  ;;  %v4663_v17 = vpop.f32.mrb[10].mxu0 }
 0x18b   : > { %v4726_v1 = vadd.f32 %v4725_v16, %v4724_v10  ;;  %v4727_v2 = vpop.f32.mrb[10].mxu1  ;;  %v4664_v22 = vpop.f32.mrb[11].mxu0 }
 0x18c   : > { %v4665_v23 = vadd.f32 %v4664_v22, %v4663_v17  ;;  %v4728_v28 = vpop.f32.mrb[11].mxu1 }
 0x18d   : > { %v6710_v29 = vadd.f32 %v4726_v1, %v4662_v12  ;;  %v4729_v34 = vadd.f32 %v4728_v28, %v4727_v2  ;;  %4538 = vmatmul.mubr.msk.bf16.gmra.mrb[116].mxu0 %vm4537_vm8, %v5750_v61  ;;  %vm4543_vm8 = vmpackc.low %vm2110_vm3, %vm2106_vm2  ;;  %vm2693_vm2 = vcmask 392192   ;;  %vm2757_vm3 = vcmask 523264  }
 0x18e   : > { %4570 = vmatmul.mubr.msk.bf16.gmra.mrb[116].mxu1 %vm4569_vm11, %v5750_v61  ;;  %4540 = vmatprep.mubr.msk.bf16.mxu0 %vm4539_vm12, %v5750_v61  ;;  %vm2109_vm11 = vcmp.eq.s32.totalorder %v6159_v53, %v2048_v3  ;;  %vm2107_vm12 = vcmp.eq.s32.totalorder %v6169_v59, %v2045_v35 }
 0x18f   : > { %v6715_v4 = vadd.f32 %v4729_v34, %v4665_v23  ;;  %4572 = vmatprep.mubr.msk.bf16.mxu1 %vm4571_vm13, %v5750_v61  ;;  %vm2111_vm13 = vcmp.eq.s32.totalorder %v6169_v59, %v2048_v3  ;;  %vm4545_vm14 = vmpackc.low %vm2109_vm11, %vm2105_vm10 }
 0x190   : > { %v4666_v5 = vpop.f32.mrb[12].mxu0  ;;  %vm4577_vm15 = vmpackc.low %vm2111_vm13, %vm2107_vm12 }
 0x191   : > { %v4730_v6 = vpop.f32.mrb[12].mxu1  ;;  %v4667_v13 = vpop.f32.mrb[13].mxu0 }
 0x192   : > { %v4668_v14 = vadd.f32 %v4667_v13, %v4666_v5  ;;  %v4731_v15 = vpop.f32.mrb[13].mxu1  ;;  %v4669_v18 = vpop.f32.mrb[14].mxu0 }
 0x193   : > { %v4732_v19 = vadd.f32 %v4731_v15, %v4730_v6  ;;  %v4733_v20 = vpop.f32.mrb[14].mxu1  ;;  %v4670_v21 = vpop.f32.mrb[15].mxu0 }
 0x194   : > { %v4671_v24 = vadd.f32 %v4670_v21, %v4669_v18  ;;  %v4734_v25 = vpop.f32.mrb[15].mxu1 }
 0x195   : > { %v6728_v26 = vadd.f32 %v4732_v19, %v4668_v14  ;;  %v4735_v27 = vadd.f32 %v4734_v25, %v4733_v20  ;;  %4542 = vmatmul.mubr.msk.bf16.gmra.mrb[120].mxu0 %vm4541_vm4, %v5750_v61 }
 0x196   : > { %4574 = vmatmul.mubr.msk.bf16.gmra.mrb[120].mxu1 %vm4573_vm7, %v5750_v61  ;;  %4544 = vmatprep.mubr.msk.bf16.mxu0 %vm4543_vm8, %v5750_v61 }
 0x197   : > { %v6733_v56 = vadd.f32 %v4735_v27, %v4671_v24  ;;  %4576 = vmatprep.mubr.msk.bf16.mxu1 %vm4575_vm9, %v5750_v61 }
 0x198   : > { %v4672_v57 = vpop.f32.mrb[16].mxu0 }
 0x199   : > { %v4736_v30 = vpop.f32.mrb[16].mxu1  ;;  %v4673_v31 = vpop.f32.mrb[17].mxu0 }
 0x19a   : > { %v4674_v32 = vadd.f32 %v4673_v31, %v4672_v57  ;;  %v4737_v33 = vpop.f32.mrb[17].mxu1  ;;  %v4675_v36 = vpop.f32.mrb[18].mxu0 }
 0x19b   : > { %v4738_v37 = vadd.f32 %v4737_v33, %v4736_v30  ;;  %v4739_v38 = vpop.f32.mrb[18].mxu1  ;;  %v4676_v40 = vpop.f32.mrb[19].mxu0 }
 0x19c   : > { %v4677_v41 = vadd.f32 %v4676_v40, %v4675_v36  ;;  %v4740_v43 = vpop.f32.mrb[19].mxu1 }
 0x19d   : > { %v6740_v44 = vadd.f32 %v4738_v37, %v4674_v32  ;;  %v4741_v45 = vadd.f32 %v4740_v43, %v4739_v38  ;;  %4546 = vmatmul.mubr.msk.bf16.gmra.mrb[124].mxu0 %vm4545_vm14, %v5750_v61 }
 0x19e   : > { %4578 = vmatmul.mubr.msk.bf16.gmra.mrb[124].mxu1 %vm4577_vm15, %v5750_v61 }
 0x19f   : > { %v6744_v53 = vadd.f32 %v4741_v45, %v4677_v41  ;;  %3198 = vmatprep.mubr.bf16.mxu1 %v7894_v0 }
 0x1a0   : > { %v4678_v46 = vpop.f32.mrb[20].mxu0 }
 0x1a1   : > { %v4742_v59 = vpop.f32.mrb[20].mxu1  ;;  %v4679_v47 = vpop.f32.mrb[21].mxu0 }
 0x1a2   : > { %v4680_v48 = vadd.f32 %v4679_v47, %v4678_v46  ;;  %v4743_v49 = vpop.f32.mrb[21].mxu1  ;;  %v4681_v50 = vpop.f32.mrb[22].mxu0 }
 0x1a3   : > { %v4744_v51 = vadd.f32 %v4743_v49, %v4742_v59  ;;  %v4745_v54 = vpop.f32.mrb[22].mxu1  ;;  %v4682_v55 = vpop.f32.mrb[23].mxu0 }
 0x1a4   : > { %v4683_v58 = vadd.f32 %v4682_v55, %v4681_v50  ;;  %v4746_v62 = vpop.f32.mrb[23].mxu1 }
 0x1a5   : > { %v6747_v63 = vadd.f32 %v4744_v51, %v4680_v48  ;;  %v4747_v8 = vadd.f32 %v4746_v62, %v4745_v54 }
 0x1a7   : > { %v6749_v9 = vadd.f32 %v4747_v8, %v4683_v58 }
 0x1a8   : > { %v4684_v61 = vpop.f32.mrb[24].mxu0 }
 0x1a9   : > { %v4748_v10 = vpop.f32.mrb[24].mxu1  ;;  %v4685_v11 = vpop.f32.mrb[25].mxu0 }
 0x1aa   : > { %v4686_v12 = vadd.f32 %v4685_v11, %v4684_v61  ;;  %v4749_v16 = vpop.f32.mrb[25].mxu1  ;;  %v4687_v17 = vpop.f32.mrb[26].mxu0 }
 0x1ab   : > { %v4750_v1 = vadd.f32 %v4749_v16, %v4748_v10  ;;  %v4751_v2 = vpop.f32.mrb[26].mxu1  ;;  %v4688_v22 = vpop.f32.mrb[27].mxu0 }
 0x1ac   : > { %v4689_v23 = vadd.f32 %v4688_v22, %v4687_v17  ;;  %v4752_v28 = vpop.f32.mrb[27].mxu1 }
 0x1ad   : > { %v6751_v34 = vadd.f32 %v4750_v1, %v4686_v12  ;;  %v4753_v35 = vadd.f32 %v4752_v28, %v4751_v2 }
 0x1af   : > { %v6753_v3 = vadd.f32 %v4753_v35, %v4689_v23 }
 0x1b0   : > { %v4690_v5 = vpop.f32.mrb[28].mxu0 }
 0x1b1   : > { %v4754_v6 = vpop.f32.mrb[28].mxu1  ;;  %v4691_v13 = vpop.f32.mrb[29].mxu0 }
 0x1b2   : > { %v4692_v14 = vadd.f32 %v4691_v13, %v4690_v5  ;;  %v4755_v15 = vpop.f32.mrb[29].mxu1  ;;  %v4693_v18 = vpop.f32.mrb[30].mxu0 }
 0x1b3   : > { %v4756_v19 = vadd.f32 %v4755_v15, %v4754_v6  ;;  %v4757_v20 = vpop.f32.mrb[30].mxu1  ;;  %v4694_v21 = vpop.f32.mrb[31].mxu0 }
 0x1b4   : > { %v4695_v24 = vadd.f32 %v4694_v21, %v4693_v18  ;;  %v4758_v25 = vpop.f32.mrb[31].mxu1 }
 0x1b5   : > { %v6755_v27 = vadd.f32 %v4756_v19, %v4692_v14  ;;  %v4759_v57 = vadd.f32 %v4758_v25, %v4757_v20 }
 0x1b7   : > { %v6757_v30 = vadd.f32 %v4759_v57, %v4695_v24 }
 0x1b8   : > { %v4776_v31 = vpop.f32.mrb[32].mxu0 }
 0x1b9   : > { %v4840_v32 = vpop.f32.mrb[32].mxu1  ;;  %v4777_v33 = vpop.f32.mrb[33].mxu0 }
 0x1ba   : > { %v4778_v36 = vadd.f32 %v4777_v33, %v4776_v31  ;;  %v4841_v37 = vpop.f32.mrb[33].mxu1  ;;  %v4779_v38 = vpop.f32.mrb[34].mxu0 }
 0x1bb   : > { %v4842_v40 = vadd.f32 %v4841_v37, %v4840_v32  ;;  %v4843_v41 = vpop.f32.mrb[34].mxu1  ;;  %v4780_v43 = vpop.f32.mrb[35].mxu0 }
 0x1bc   : > { %v4781_v45 = vadd.f32 %v4780_v43, %v4779_v38  ;;  %v4844_v46 = vpop.f32.mrb[35].mxu1 }
 0x1bd   : > { %v1473_v59 = vadd.f32 %v4842_v40, %v4778_v36  ;;  %v4845_v47 = vadd.f32 %v4844_v46, %v4843_v41 }
 0x1bf   : > { %v1476_v48 = vadd.f32 %v4845_v47, %v4781_v45 }
 0x1c0   : > { %v4782_v49 = vpop.f32.mrb[36].mxu0 }
 0x1c1   : > { %v4846_v50 = vpop.f32.mrb[36].mxu1  ;;  %v4783_v51 = vpop.f32.mrb[37].mxu0  ;;  %v5270_v54 = vpack.i.bf16 %v1476_v48, %v1473_v59 }
 0x1c2   : > { %v4784_v55 = vadd.f32 %v4783_v51, %v4782_v49  ;;  %v4847_v58 = vpop.f32.mrb[37].mxu1  ;;  %v4785_v62 = vpop.f32.mrb[38].mxu0 }
 0x1c3   : > { %v4848_v8 = vadd.f32 %v4847_v58, %v4846_v50  ;;  %5271 = vrot.lane.b32.xlu1 %v5270_v54, %s5751_s20  ;;  %v4849_v61 = vpop.f32.mrb[38].mxu1  ;;  %v4786_v10 = vpop.f32.mrb[39].mxu0 }
 0x1c4   : > { %v4787_v11 = vadd.f32 %v4786_v10, %v4785_v62  ;;  %v4850_v12 = vpop.f32.mrb[39].mxu1 }
 0x1c5   : > { %v1481_v16 = vadd.f32 %v4848_v8, %v4784_v55  ;;  %v4851_v17 = vadd.f32 %v4850_v12, %v4849_v61 }
 0x1c7   : > { %v1484_v1 = vadd.f32 %v4851_v17, %v4787_v11 }
 0x1c8   : > { %v4788_v2 = vpop.f32.mrb[40].mxu0 }
 0x1c9   : > { %v4852_v22 = vpop.f32.mrb[40].mxu1  ;;  %v4789_v23 = vpop.f32.mrb[41].mxu0  ;;  %v5275_v28 = vpack.i.bf16 %v1484_v1, %v1481_v16 }
 0x1ca   : > { %v4790_v35 = vadd.f32 %v4789_v23, %v4788_v2  ;;  %v4853_v5 = vpop.f32.mrb[41].mxu1  ;;  %v4791_v6 = vpop.f32.mrb[42].mxu0 }
 0x1cb   : > { %v4854_v13 = vadd.f32 %v4853_v5, %v4852_v22  ;;  %5276 = vrot.lane.b32.xlu0 %v5275_v28, %s5751_s20  ;;  %v4855_v14 = vpop.f32.mrb[42].mxu1  ;;  %v4792_v15 = vpop.f32.mrb[43].mxu0 }
 0x1cc   : > { %v4793_v18 = vadd.f32 %v4792_v15, %v4791_v6  ;;  %v4856_v19 = vpop.f32.mrb[43].mxu1 }
 0x1cd   : > { %v6761_v20 = vadd.f32 %v4854_v13, %v4790_v35  ;;  %v4857_v21 = vadd.f32 %v4856_v19, %v4855_v14 }
 0x1cf   : > { %v6763_v24 = vadd.f32 %v4857_v21, %v4793_v18 }
 0x1d0   : > { %v4794_v25 = vpop.f32.mrb[44].mxu0 }
 0x1d1   : > { %v4858_v57 = vpop.f32.mrb[44].mxu1  ;;  %v4795_v31 = vpop.f32.mrb[45].mxu0  ;;  %v5300_v32 = vpack.i.bf16 %v6763_v24, %v6761_v20 }
 0x1d2   : > { %v4796_v33 = vadd.f32 %v4795_v31, %v4794_v25  ;;  %v4859_v36 = vpop.f32.mrb[45].mxu1  ;;  %v4797_v37 = vpop.f32.mrb[46].mxu0 }
 0x1d3   : > { %v4860_v38 = vadd.f32 %v4859_v36, %v4858_v57  ;;  %v4861_v40 = vpop.f32.mrb[46].mxu1  ;;  %v4798_v41 = vpop.f32.mrb[47].mxu0 }
 0x1d4   : > { %v4799_v43 = vadd.f32 %v4798_v41, %v4797_v37  ;;  %v4862_v45 = vpop.f32.mrb[47].mxu1 }
 0x1d5   : > { %v6767_v46 = vadd.f32 %v4860_v38, %v4796_v33  ;;  %v4863_v59 = vadd.f32 %v4862_v45, %v4861_v40 }
 0x1d7   : > { %v6769_v47 = vadd.f32 %v4863_v59, %v4799_v43 }
 0x1d8   : > { %v4800_v48 = vpop.f32.mrb[48].mxu0 }
 0x1d9   : > { %v4864_v49 = vpop.f32.mrb[48].mxu1  ;;  %v4801_v50 = vpop.f32.mrb[49].mxu0 }
 0x1da   : > { %v4802_v54 = vadd.f32 %v4801_v50, %v4800_v48  ;;  %v4865_v55 = vpop.f32.mrb[49].mxu1  ;;  %v4803_v58 = vpop.f32.mrb[50].mxu0 }
 0x1db   : > { %v4866_v62 = vadd.f32 %v4865_v55, %v4864_v49  ;;  %v4867_v8 = vpop.f32.mrb[50].mxu1  ;;  %v4804_v61 = vpop.f32.mrb[51].mxu0 }
 0x1dc   : > { %v4805_v10 = vadd.f32 %v4804_v61, %v4803_v58  ;;  %v4868_v11 = vpop.f32.mrb[51].mxu1 }
 0x1dd   : > { %v6773_v12 = vadd.f32 %v4866_v62, %v4802_v54  ;;  %v4869_v16 = vadd.f32 %v4868_v11, %v4867_v8 }
 0x1df   : > { %v6775_v17 = vadd.f32 %v4869_v16, %v4805_v10 }
 0x1e0   : > { %v4806_v1 = vpop.f32.mrb[52].mxu0 }
 0x1e1   : > { %v4870_v2 = vpop.f32.mrb[52].mxu1  ;;  %v4807_v22 = vpop.f32.mrb[53].mxu0 }
 0x1e2   : > { %v4808_v28 = vadd.f32 %v4807_v22, %v4806_v1  ;;  %v4871_v35 = vpop.f32.mrb[53].mxu1  ;;  %v4809_v5 = vpop.f32.mrb[54].mxu0 }
 0x1e3   : > { %v4872_v6 = vadd.f32 %v4871_v35, %v4870_v2  ;;  %v4873_v13 = vpop.f32.mrb[54].mxu1  ;;  %v4810_v14 = vpop.f32.mrb[55].mxu0 }
 0x1e4   : > { %v4811_v15 = vadd.f32 %v4810_v14, %v4809_v5  ;;  %v4874_v18 = vpop.f32.mrb[55].mxu1 }
 0x1e5   : > { %v6779_v19 = vadd.f32 %v4872_v6, %v4808_v28  ;;  %v4875_v21 = vadd.f32 %v4874_v18, %v4873_v13 }
 0x1e7   : > { %v6781_v25 = vadd.f32 %v4875_v21, %v4811_v15 }
 0x1e8   : > { %v4812_v57 = vpop.f32.mrb[56].mxu0 }
 0x1e9   : > { %v4876_v31 = vpop.f32.mrb[56].mxu1  ;;  %v4813_v33 = vpop.f32.mrb[57].mxu0 }
 0x1ea   : > { %v4814_v37 = vadd.f32 %v4813_v33, %v4812_v57  ;;  %v4877_v38 = vpop.f32.mrb[57].mxu1  ;;  %v4815_v40 = vpop.f32.mrb[58].mxu0 }
 0x1eb   : > { %v4878_v41 = vadd.f32 %v4877_v38, %v4876_v31  ;;  %v4879_v43 = vpop.f32.mrb[58].mxu1  ;;  %v4816_v45 = vpop.f32.mrb[59].mxu0 }
 0x1ec   : > { %v4817_v59 = vadd.f32 %v4816_v45, %v4815_v40  ;;  %v4880_v48 = vpop.f32.mrb[59].mxu1 }
 0x1ed   : > { %v6785_v49 = vadd.f32 %v4878_v41, %v4814_v37  ;;  %v4881_v50 = vadd.f32 %v4880_v48, %v4879_v43 }
 0x1ef   : > { %v6787_v54 = vadd.f32 %v4881_v50, %v4817_v59  ;;  %v5422_v50 = vld [vmem:[%s7888_s2] sm:$0xff]  }
 0x1f0   : > { %v4818_v55 = vpop.f32.mrb[60].mxu0  ;;  %5156 = vmatprep.subr.bf16.mxu0 %v5422_v50 }
 0x1f1   : > { %v4882_v58 = vpop.f32.mrb[60].mxu1  ;;  %v4819_v62 = vpop.f32.mrb[61].mxu0  ;;  %5157 = vmatpush3.bf16.msra.mxu0 %v5422_v50 }
 0x1f2   : > { %v4820_v61 = vadd.f32 %v4819_v62, %v4818_v55  ;;  %v4883_v10 = vpop.f32.mrb[61].mxu1  ;;  %v4821_v11 = vpop.f32.mrb[62].mxu0  ;;  %v5423_v55 = vld [vmem:[%s7888_s2 + $0x8] sm:$0xff]  }
 0x1f3   : > { %v4884_v16 = vadd.f32 %v4883_v10, %v4882_v58  ;;  %v4885_v1 = vpop.f32.mrb[62].mxu1  ;;  %v4822_v2 = vpop.f32.mrb[63].mxu0  ;;  %5158 = vmatprep.subr.bf16.mxu0 %v5423_v55 }
 0x1f4   : > { %v4823_v22 = vadd.f32 %v4822_v2, %v4821_v11  ;;  %v4886_v28 = vpop.f32.mrb[63].mxu1 }
 0x1f5   : > { %v6791_v35 = vadd.f32 %v4884_v16, %v4820_v61  ;;  %v4887_v5 = vadd.f32 %v4886_v28, %v4885_v1  ;;  %5159 = vmatpush3.bf16.msra.mxu0 %v5423_v55 }
 0x1f7   : > { %v6793_v6 = vadd.f32 %v4887_v5, %v4823_v22 }
 0x1f8   : > { %v4904_v13 = vpop.f32.mrb[64].mxu0 }
 0x1f9   : > { %v4968_v14 = vpop.f32.mrb[64].mxu1  ;;  %v4905_v15 = vpop.f32.mrb[65].mxu0 }
 0x1fa   : > { %v4906_v21 = vadd.f32 %v4905_v15, %v4904_v13  ;;  %v4969_v57 = vpop.f32.mrb[65].mxu1  ;;  %v4907_v31 = vpop.f32.mrb[66].mxu0  ;;  %v5424_v13 = vld [vmem:[%s7888_s2 + $0x10] sm:$0xff]  }
 0x1fb   : > { %v4970_v33 = vadd.f32 %v4969_v57, %v4968_v14  ;;  %v4971_v37 = vpop.f32.mrb[66].mxu1  ;;  %v4908_v38 = vpop.f32.mrb[67].mxu0  ;;  %5160 = vmatprep.subr.bf16.mxu0 %v5424_v13 }
 0x1fc   : > { %v4909_v40 = vadd.f32 %v4908_v38, %v4907_v31  ;;  %v4972_v41 = vpop.f32.mrb[67].mxu1  ;;  %v5425_v31 = vld [vmem:[%s7888_s2 + $0x18] sm:$0xff]   ;;  %5161 = vmatpush3.bf16.msra.mxu0 %v5424_v13 }
 0x1fd   : > { %v1939_v43 = vadd.f32 %v4970_v33, %v4906_v21  ;;  %v4973_v45 = vadd.f32 %v4972_v41, %v4971_v37  ;;  %5162 = vmatprep.subr.bf16.mxu0 %v5425_v31 }
 0x1ff   : > { %v1942_v59 = vadd.f32 %v4973_v45, %v4909_v40 }
 0x200   : > { %v4910_v48 = vpop.f32.mrb[68].mxu0  ;;  %5163 = vmatpush3.bf16.msra.mxu0 %v5425_v31 }
 0x201   : > { %v4974_v58 = vpop.f32.mrb[68].mxu1  ;;  %v4911_v62 = vpop.f32.mrb[69].mxu0  ;;  %v5280_v61 = vpack.i.bf16 %v1942_v59, %v1939_v43 }
 0x202   : > { %v4912_v10 = vadd.f32 %v4911_v62, %v4910_v48  ;;  %v4975_v11 = vpop.f32.mrb[69].mxu1  ;;  %v4913_v16 = vpop.f32.mrb[70].mxu0 }
 0x203   : > { %v4976_v1 = vadd.f32 %v4975_v11, %v4974_v58  ;;  %v4977_v2 = vpop.f32.mrb[70].mxu1  ;;  %5281 = vrot.lane.b32.xlu1 %v5280_v61, %s5752_s11  ;;  %v4914_v22 = vpop.f32.mrb[71].mxu0 }
 0x204   : > { %v4915_v28 = vadd.f32 %v4914_v22, %v4913_v16  ;;  %v4978_v5 = vpop.f32.mrb[71].mxu1 }
 0x205   : > { %v1947_v14 = vadd.f32 %v4976_v1, %v4912_v10  ;;  %v4979_v15 = vadd.f32 %v4978_v5, %v4977_v2 }
 0x207   : > { %v1950_v21 = vadd.f32 %v4979_v15, %v4915_v28 }
 0x208   : > { %v4916_v57 = vpop.f32.mrb[72].mxu0 }
 0x209   : > { %v4980_v33 = vpop.f32.mrb[72].mxu1  ;;  %v4917_v37 = vpop.f32.mrb[73].mxu0  ;;  %v5285_v38 = vpack.i.bf16 %v1950_v21, %v1947_v14 }
 0x20a   : > { %v4918_v40 = vadd.f32 %v4917_v37, %v4916_v57  ;;  %v4981_v41 = vpop.f32.mrb[73].mxu1  ;;  %v4919_v43 = vpop.f32.mrb[74].mxu0 }
 0x20b   : > { %v4982_v45 = vadd.f32 %v4981_v41, %v4980_v33  ;;  %5286 = vrot.lane.b32.xlu0 %v5285_v38, %s5752_s11  ;;  %v4983_v59 = vpop.f32.mrb[74].mxu1  ;;  %v4920_v48 = vpop.f32.mrb[75].mxu0 }
 0x20c   : > { %v4921_v50 = vadd.f32 %v4920_v48, %v4919_v43  ;;  %v4984_v55 = vpop.f32.mrb[75].mxu1 }
 0x20d   : > { %v6811_v58 = vadd.f32 %v4982_v45, %v4918_v40  ;;  %v4985_v62 = vadd.f32 %v4984_v55, %v4983_v59 }
 0x20f   : > { %v6813_v61 = vadd.f32 %v4985_v62, %v4921_v50 }
 0x210   : > { %v4922_v10 = vpop.f32.mrb[76].mxu0 }
 0x211   : > { %v4986_v11 = vpop.f32.mrb[76].mxu1  ;;  %v4923_v16 = vpop.f32.mrb[77].mxu0 }
 0x212   : > { %v4924_v2 = vadd.f32 %v4923_v16, %v4922_v10  ;;  %v4987_v22 = vpop.f32.mrb[77].mxu1  ;;  %v4925_v28 = vpop.f32.mrb[78].mxu0 }
 0x213   : > { %v4988_v5 = vadd.f32 %v4987_v22, %v4986_v11  ;;  %v4989_v13 = vpop.f32.mrb[78].mxu1  ;;  %v4926_v14 = vpop.f32.mrb[79].mxu0 }
 0x214   : > { %v4927_v15 = vadd.f32 %v4926_v14, %v4925_v28  ;;  %v4990_v21 = vpop.f32.mrb[79].mxu1 }
 0x215   : > { %v6817_v57 = vadd.f32 %v4988_v5, %v4924_v2  ;;  %v4991_v33 = vadd.f32 %v4990_v21, %v4989_v13 }
 0x217   : > { %v6819_v37 = vadd.f32 %v4991_v33, %v4927_v15 }
 0x218   : > { %v4928_v31 = vpop.f32.mrb[80].mxu0 }
 0x219   : > { %v4992_v38 = vpop.f32.mrb[80].mxu1  ;;  %v4929_v40 = vpop.f32.mrb[81].mxu0 }
 0x21a   : > { %v4930_v43 = vadd.f32 %v4929_v40, %v4928_v31  ;;  %v4993_v45 = vpop.f32.mrb[81].mxu1  ;;  %v4931_v59 = vpop.f32.mrb[82].mxu0 }
 0x21b   : > { %v4994_v48 = vadd.f32 %v4993_v45, %v4992_v38  ;;  %v4995_v50 = vpop.f32.mrb[82].mxu1  ;;  %v4932_v55 = vpop.f32.mrb[83].mxu0 }
 0x21c   : > { %v4933_v62 = vadd.f32 %v4932_v55, %v4931_v59  ;;  %v4996_v10 = vpop.f32.mrb[83].mxu1 }
 0x21d   : > { %v6823_v11 = vadd.f32 %v4994_v48, %v4930_v43  ;;  %v4997_v16 = vadd.f32 %v4996_v10, %v4995_v50 }
 0x21f   : > { %v6825_v2 = vadd.f32 %v4997_v16, %v4933_v62 }
 0x220   : > { %v4934_v22 = vpop.f32.mrb[84].mxu0 }
 0x221   : > { %v4998_v28 = vpop.f32.mrb[84].mxu1  ;;  %v4935_v5 = vpop.f32.mrb[85].mxu0 }
 0x222   : > { %v4936_v14 = vadd.f32 %v4935_v5, %v4934_v22  ;;  %v4999_v15 = vpop.f32.mrb[85].mxu1  ;;  %v4937_v21 = vpop.f32.mrb[86].mxu0 }
 0x223   : > { %v5000_v33 = vadd.f32 %v4999_v15, %v4998_v28  ;;  %v5001_v31 = vpop.f32.mrb[86].mxu1  ;;  %v4938_v38 = vpop.f32.mrb[87].mxu0 }
 0x224   : > { %v4939_v40 = vadd.f32 %v4938_v38, %v4937_v21  ;;  %v5002_v45 = vpop.f32.mrb[87].mxu1 }
 0x225   : > { %v6829_v59 = vadd.f32 %v5000_v33, %v4936_v14  ;;  %v5003_v43 = vadd.f32 %v5002_v45, %v5001_v31 }
 0x227   : > { %v6831_v48 = vadd.f32 %v5003_v43, %v4939_v40 }
 0x228   : > { %v4940_v50 = vpop.f32.mrb[88].mxu0 }
 0x229   : > { %v5004_v55 = vpop.f32.mrb[88].mxu1  ;;  %v4941_v62 = vpop.f32.mrb[89].mxu0 }
 0x22a   : > { %v4942_v16 = vadd.f32 %v4941_v62, %v4940_v50  ;;  %v5005_v22 = vpop.f32.mrb[89].mxu1  ;;  %v4943_v5 = vpop.f32.mrb[90].mxu0 }
 0x22b   : > { %v5006_v52 = vadd.f32 %v5005_v22, %v5004_v55  ;;  %v5007_v28 = vpop.f32.mrb[90].mxu1  ;;  %v4944_v15 = vpop.f32.mrb[91].mxu0 }
 0x22c   : > { %v4945_v0 = vadd.f32 %v4944_v15, %v4943_v5  ;;  %v5008_v21 = vpop.f32.mrb[91].mxu1 }
 0x22d   : > { %v6835_v38 = vadd.f32 %v5006_v52, %v4942_v16  ;;  %v5009_v14 = vadd.f32 %v5008_v21, %v5007_v28 }
 0x22f   : > { %v6837_v33 = vadd.f32 %v5009_v14, %v4945_v0 }
 0x230   : > { %v4946_v31 = vpop.f32.mrb[92].mxu0 }
 0x231   : > { %v5010_v40 = vpop.f32.mrb[92].mxu1  ;;  %v4947_v45 = vpop.f32.mrb[93].mxu0 }
 0x232   : > { %v4948_v18 = vadd.f32 %v4947_v45, %v4946_v31  ;;  %v5011_v50 = vpop.f32.mrb[93].mxu1  ;;  %v4949_v62 = vpop.f32.mrb[94].mxu0 }
 0x233   : > { %v5012_v8 = vadd.f32 %v5011_v50, %v5010_v40  ;;  %v5013_v55 = vpop.f32.mrb[94].mxu1  ;;  %v4950_v22 = vpop.f32.mrb[95].mxu0 }
 0x234   : > { %v4951_v10 = vadd.f32 %v4950_v22, %v4949_v62  ;;  %v5014_v5 = vpop.f32.mrb[95].mxu1 }
 0x235   : > { %v6841_v15 = vadd.f32 %v5012_v8, %v4948_v18  ;;  %v5015_v52 = vadd.f32 %v5014_v5, %v5013_v55 }
 0x237   : > { %v6843_v16 = vadd.f32 %v5015_v52, %v4951_v10 }
 0x238   : > { %v5032_v0 = vpop.f32.mrb[96].mxu0 }
 0x239   : > { %v5096_v28 = vpop.f32.mrb[96].mxu1  ;;  %v5033_v21 = vpop.f32.mrb[97].mxu0  ;;  %v5375_v14 = vpack.i.bf16 %v6843_v16, %v6841_v15  ;;  %v5431_v15 = vld [vmem:[%s7890_s4 + $0x24] ss:$16 sps:$4 sm:$0xff]  }
 0x23a   : > { %v5034_v43 = vadd.f32 %v5033_v21, %v5032_v0  ;;  %v5097_v31 = vpop.f32.mrb[97].mxu1  ;;  %v5035_v45 = vpop.f32.mrb[98].mxu0 }
 0x23b   : > { %v5098_v36 = vadd.f32 %v5097_v31, %v5096_v28  ;;  %v5099_v40 = vpop.f32.mrb[98].mxu1  ;;  %v5036_v50 = vpop.f32.mrb[99].mxu0 }
 0x23c   : > { %v5037_v13 = vadd.f32 %v5036_v50, %v5035_v45  ;;  %v5100_v62 = vpop.f32.mrb[99].mxu1 }
 0x23d   : > { %v2405_v22 = vadd.f32 %v5098_v36, %v5034_v43  ;;  %v5101_v8 = vadd.f32 %v5100_v62, %v5099_v40 }
 0x23f   : > { %v2408_v18 = vadd.f32 %v5101_v8, %v5037_v13 }
 0x240   : > { %v5038_v55 = vpop.f32.mrb[100].mxu0 }
 0x241   : > { %v5102_v10 = vpop.f32.mrb[100].mxu1  ;;  %v5039_v5 = vpop.f32.mrb[101].mxu0  ;;  %v5290_v52 = vpack.i.bf16 %v2408_v18, %v2405_v22 }
 0x242   : > { %v5040_v23 = vadd.f32 %v5039_v5, %v5038_v55  ;;  %v5103_v41 = vpop.f32.mrb[101].mxu1  ;;  %v5041_v51 = vpop.f32.mrb[102].mxu0  ;;  %v7932_v5 = vpack.i.bf16 %v6769_v47, %v6767_v46 }
 0x243   : > { %v5104_v1 = vadd.f32 %v5103_v41, %v5102_v10  ;;  %5291 = vrot.lane.b32.xlu1 %v5290_v52, %s5753_s12  ;;  %v5105_v0 = vpop.f32.mrb[102].mxu1  ;;  %v5042_v28 = vpop.f32.mrb[103].mxu0 }
 0x244   : > { %v5043_v21 = vadd.f32 %v5042_v28, %v5041_v51  ;;  %v5106_v31 = vpop.f32.mrb[103].mxu1  ;;  %v7931_v51 = vpack.i.bf16 %v6813_v61, %v6811_v58 }
 0x245   : > { %v2413_v45 = vadd.f32 %v5104_v1, %v5040_v23  ;;  %v5107_v50 = vadd.f32 %v5106_v31, %v5105_v0 }
 0x247   : > { %v2416_v36 = vadd.f32 %v5107_v50, %v5043_v21  ;;  %5301 = vrot.lane.b32.xlu1 %v5300_v32, %s5751_s20  ;;  %v7933_v50 = vpack.i.bf16 %v6819_v37, %v6817_v57 }
 0x248   : > { %v5044_v13 = vpop.f32.mrb[104].mxu0 }
 0x249   : > { %v5108_v43 = vpop.f32.mrb[104].mxu1  ;;  %v5045_v40 = vpop.f32.mrb[105].mxu0  ;;  %v5295_v62 = vpack.i.bf16 %v2416_v36, %v2413_v45 }
 0x24a   : > { %v5046_v41 = vadd.f32 %v5045_v40, %v5044_v13  ;;  %v5109_v22 = vpop.f32.mrb[105].mxu1  ;;  %v5047_v8 = vpop.f32.mrb[106].mxu0 }
 0x24b   : > { %v5110_v18 = vadd.f32 %v5109_v22, %v5108_v43  ;;  %5311 = vrot.lane.b32.xlu1 %v7931_v51, %s5752_s11  ;;  %5296 = vrot.lane.b32.xlu0 %v5295_v62, %s5753_s12  ;;  %v5111_v23 = vpop.f32.mrb[106].mxu1  ;;  %v5048_v1 = vpop.f32.mrb[107].mxu0 }
 0x24c   : > { %v5049_v55 = vadd.f32 %v5048_v1, %v5047_v8  ;;  %v5112_v20 = vpop.f32.mrb[107].mxu1 }
 0x24d   : > { %v2421_v24 = vadd.f32 %v5110_v18, %v5046_v41  ;;  %v5113_v32 = vadd.f32 %v5112_v20, %v5111_v23  ;;  %v7934_v41 = vpack.i.bf16 %v6775_v17, %v6773_v12 }
 0x24f   : > { %v2424_v10 = vadd.f32 %v5113_v32, %v5049_v55  ;;  %5306 = vrot.lane.b32.xlu0 %v7932_v5, %s5751_s20  ;;  %v7935_v55 = vpack.i.bf16 %v6825_v2, %v6823_v11 }
 0x250   : > { %v5050_v52 = vpop.f32.mrb[108].mxu0 }
 0x251   : > { %v5114_v0 = vpop.f32.mrb[108].mxu1  ;;  %v5051_v28 = vpop.f32.mrb[109].mxu0  ;;  %v5320_v21 = vpack.i.bf16 %v2424_v10, %v2421_v24 }
 0x252   : > { %v5052_v58 = vadd.f32 %v5051_v28, %v5050_v52  ;;  %v5115_v61 = vpop.f32.mrb[109].mxu1  ;;  %v5053_v31 = vpop.f32.mrb[110].mxu0  ;;  %v7936_v52 = vpack.i.bf16 %v6781_v25, %v6779_v19 }
 0x253   : > { %v5116_v45 = vadd.f32 %v5115_v61, %v5114_v0  ;;  %5316 = vrot.lane.b32.xlu0 %v7933_v50, %s5752_s11  ;;  %5321 = vrot.lane.b32.xlu1 %v5320_v21, %s5753_s12  ;;  %v5117_v36 = vpop.f32.mrb[110].mxu1  ;;  %v5054_v13 = vpop.f32.mrb[111].mxu0 }
 0x254   : > { %v5055_v43 = vadd.f32 %v5054_v13, %v5053_v31  ;;  %v5118_v46 = vpop.f32.mrb[111].mxu1 }
 0x255   : > { %v2429_v47 = vadd.f32 %v5116_v45, %v5052_v58  ;;  %v5119_v40 = vadd.f32 %v5118_v46, %v5117_v36  ;;  %v7937_v45 = vpack.i.bf16 %v6831_v48, %v6829_v59 }
 0x257   : > { %v2432_v62 = vadd.f32 %v5119_v40, %v5055_v43  ;;  %5331 = vrot.lane.b32.xlu1 %v7934_v41, %s5751_s20 }
 0x258   : > { %v5056_v22 = vpop.f32.mrb[112].mxu0 }
 0x259   : > { %v5120_v8 = vpop.f32.mrb[112].mxu1  ;;  %v5057_v18 = vpop.f32.mrb[113].mxu0  ;;  %v5325_v51 = vpack.i.bf16 %v2432_v62, %v2429_v47  ;;  %v7938_v47 = vpack.i.bf16 %v6787_v54, %v6785_v49 }
 0x25a   : > { %v5058_v57 = vadd.f32 %v5057_v18, %v5056_v22  ;;  %v5121_v37 = vpop.f32.mrb[113].mxu1  ;;  %v5059_v23 = vpop.f32.mrb[114].mxu0 }
 0x25b   : > { %v5122_v1 = vadd.f32 %v5121_v37, %v5120_v8  ;;  %5341 = vrot.lane.b32.xlu1 %v7935_v55, %s5752_s11  ;;  %5326 = vrot.lane.b32.xlu0 %v5325_v51, %s5753_s12  ;;  %v5123_v20 = vpop.f32.mrb[114].mxu1  ;;  %v5060_v24 = vpop.f32.mrb[115].mxu0  ;;  %v7939_v51 = vpack.i.bf16 %v6837_v33, %v6835_v38 }
 0x25c   : > { %v5061_v32 = vadd.f32 %v5060_v24, %v5059_v23  ;;  %v5124_v12 = vpop.f32.mrb[115].mxu1 }
 0x25d   : > { %v2437_v17 = vadd.f32 %v5122_v1, %v5058_v57  ;;  %v5125_v10 = vadd.f32 %v5124_v12, %v5123_v20  ;;  %v7940_v20 = vpack.i.bf16 %v6793_v6, %v6791_v35  ;;  %v5426_v6 = vld [vmem:[%s7890_s4] ss:$16 sps:$4 sm:$0xff]  }
 0x25f   : > { %v2440_v5 = vadd.f32 %v5125_v10, %v5061_v32  ;;  %5336 = vrot.lane.b32.xlu0 %v7936_v52, %s5751_s20 }
 0x260   : > { %v5062_v0 = vpop.f32.mrb[116].mxu0 }
 0x261   : > { %v5126_v28 = vpop.f32.mrb[116].mxu1  ;;  %v5063_v21 = vpop.f32.mrb[117].mxu0  ;;  %v5350_v58 = vpack.i.bf16 %v2440_v5, %v2437_v17 }
 0x262   : > { %v5064_v11 = vadd.f32 %v5063_v21, %v5062_v0  ;;  %v5127_v2 = vpop.f32.mrb[117].mxu1  ;;  %v5065_v61 = vpop.f32.mrb[118].mxu0  ;;  %v5428_v21 = vld [vmem:[%s7890_s4 + $0x4] ss:$16 sps:$4 sm:$0xff]  }
 0x263   : > { %v5128_v31 = vadd.f32 %v5127_v2, %v5126_v28  ;;  %5346 = vrot.lane.b32.xlu0 %v7937_v45, %s5752_s11  ;;  %5351 = vrot.lane.b32.xlu1 %v5350_v58, %s5753_s12  ;;  %v5129_v50 = vpop.f32.mrb[118].mxu1  ;;  %v5066_v36 = vpop.f32.mrb[119].mxu0  ;;  %v5434_v2 = vld [vmem:[%s7890_s4 + $0x44] ss:$16 sps:$4 sm:$0xff]   ;;  %v5432_v45 = vld [vmem:[%s7890_s4 + $0x40] ss:$16 sps:$4 sm:$0xff]  }
 0x264   : > { %v5067_v13 = vadd.f32 %v5066_v36, %v5065_v61  ;;  %v5130_v19 = vpop.f32.mrb[119].mxu1  ;;  %3166 = vmatprep.subr.bf16.mxu1 %v5428_v21  ;;  %v6920_v61 = vld [vmem:[%s7890_s4 + $0xc] ss:$16 sps:$4 sm:$0xff]   ;;  %v5435_v36 = vld [vmem:[%s7890_s4 + $0x60] ss:$16 sps:$4 sm:$0xff]  }
 0x265   : > { %v2445_v25 = vadd.f32 %v5128_v31, %v5064_v11  ;;  %v5131_v43 = vadd.f32 %v5130_v19, %v5129_v50  ;;  %3167 = vmatpush1.bf16.msra.mxu1 %v5426_v6  ;;  %3279 = vmatprep.subr.bf16.mxu0 %v6920_v61  ;;  %v5437_v50 = vld [vmem:[%s7890_s4 + $0x64] ss:$16 sps:$4 sm:$0xff]   ;;  %v5438_v19 = vld [vmem:[%s7890_s4 + $0x80] ss:$16 sps:$4 sm:$0xff]  }
 0x266   : > { %3168 = vmatprep.subr.bf16.mxu1 %v5431_v15 }
 0x267   : > { %v2448_v46 = vadd.f32 %v5131_v43, %v5067_v13  ;;  %5361 = vrot.lane.b32.xlu1 %v7938_v47, %s5751_s20  ;;  %v5440_v13 = vld [vmem:[%s7890_s4 + $0x84] ss:$16 sps:$4 sm:$0xff]   ;;  %v5447_v43 = vld [vmem:[%s7890_s4 + $0xa0] ss:$16 sps:$4 sm:$0xff]  }
 0x268   : > { %v5068_v40 = vpop.f32.mrb[120].mxu0  ;;  %v5456_v47 = vld [vmem:[%s7890_s4 + $0xc0] ss:$16 sps:$4 sm:$0xff]  }
 0x269   : > { %v5132_v62 = vpop.f32.mrb[120].mxu1  ;;  %v5069_v41 = vpop.f32.mrb[121].mxu0  ;;  %v5355_v22 = vpack.i.bf16 %v2448_v46, %v2445_v25  ;;  %v5449_v25 = vld [vmem:[%s7890_s4 + $0xa4] ss:$16 sps:$4 sm:$0xff]  }
 0x26a   : > { %v5070_v59 = vadd.f32 %v5069_v41, %v5068_v40  ;;  %v5133_v48 = vpop.f32.mrb[121].mxu1  ;;  %v5071_v8 = vpop.f32.mrb[122].mxu0  ;;  %v5458_v46 = vld [vmem:[%s7890_s4 + $0xc4] ss:$16 sps:$4 sm:$0xff]  }
 0x26b   : > { %v5134_v18 = vadd.f32 %v5133_v48, %v5132_v62  ;;  %5371 = vrot.lane.b32.xlu1 %v7939_v51, %s5752_s11  ;;  %5356 = vrot.lane.b32.xlu0 %v5355_v22, %s5753_s12  ;;  %v5135_v57 = vpop.f32.mrb[122].mxu1  ;;  %v5072_v37 = vpop.f32.mrb[123].mxu0 }
 0x26c   : > { %v5073_v23 = vadd.f32 %v5072_v37, %v5071_v8  ;;  %v5136_v49 = vpop.f32.mrb[123].mxu1  ;;  %v5272_v40 = vpop.permute.xlu1 %5271 }
 0x26d   : > { %v2453_v54 = vadd.f32 %v5134_v18, %v5070_v59  ;;  %v5137_v1 = vadd.f32 %v5136_v49, %v5135_v57  ;;  %v5274_v41 = vunpack.i.h.bf16 %v5272_v40  ;;  %v5273_v22 = vunpack.i.l.bf16 %v5272_v40  ;;  %v5277_v8 = vpop.permute.xlu0 %5276 }
 0x26f   : > { %v2456_v55 = vadd.f32 %v5137_v1, %v5073_v23  ;;  %5366 = vrot.lane.b32.xlu0 %v7940_v20, %s5751_s20  ;;  %v2661_v51 = vsel %vm2659_vm0, %v6679_v42, %v5274_v41  ;;  %v2660_v57 = vsel %vm2659_vm0, %v6674_v39, %v5273_v22 }
 0x270   : > { %v5074_v24 = vpop.f32.mrb[124].mxu0 }
 0x271   : > { %v5138_v32 = vpop.f32.mrb[124].mxu1  ;;  %v5075_v12 = vpop.f32.mrb[125].mxu0  ;;  %v5380_v17 = vpack.i.bf16 %v2456_v55, %v2453_v54 }
 0x272   : > { %v5076_v38 = vadd.f32 %v5075_v12, %v5074_v24  ;;  %v5139_v33 = vpop.f32.mrb[125].mxu1  ;;  %v5077_v10 = vpop.f32.mrb[126].mxu0  ;;  %v5278_v12 = vunpack.i.l.bf16 %v5277_v8 }
 0x273   : > { %v5140_v5 = vadd.f32 %v5139_v33, %v5138_v32  ;;  %5376 = vrot.lane.b32.xlu0 %v5375_v14, %s5752_s11  ;;  %5381 = vrot.lane.b32.xlu1 %v5380_v17, %s5753_s12  ;;  %v5141_v52 = vpop.f32.mrb[126].mxu1  ;;  %v5078_v0 = vpop.f32.mrb[127].mxu0  ;;  %v5429_v14 = vld [vmem:[%s7890_s4 + $0x20] ss:$16 sps:$4 sm:$0xff]   ;;  %v5279_v32 = vunpack.i.h.bf16 %v5277_v8 }
 0x274   : > { %v5079_v28 = vadd.f32 %v5078_v0, %v5077_v10  ;;  %v5142_v35 = vpop.f32.mrb[127].mxu1  ;;  %3169 = vmatpush1.bf16.msra.mxu1 %v5429_v14  ;;  %v2662_v10 = vsel %vm2659_vm0, %v6692_v60, %v5278_v12  ;;  %v6976_v60 = vld [vmem:[%s7890_s4 + $0x2c] ss:$16 sps:$4 sm:$0xff]  }
 0x275   : > { %v2461_v58 = vadd.f32 %v5140_v5, %v5076_v38  ;;  %v5143_v11 = vadd.f32 %v5142_v35, %v5141_v52  ;;  %3170 = vmatprep.subr.bf16.mxu1 %v5434_v2  ;;  %v5282_v62 = vpop.permute.xlu1 %5281  ;;  %v2663_v33 = vsel %vm2659_vm0, %v6697_v7, %v5279_v32 }
 0x276   : > { %v5284_v59 = vunpack.i.h.bf16 %v5282_v62  ;;  %v5283_v48 = vunpack.i.l.bf16 %v5282_v62 }
 0x277   : > { %v2464_v16 = vadd.f32 %v5143_v11, %v5079_v28 }
 0x278   : > { %3171 = vmatpush1.bf16.msra.mxu1 %v5432_v45  ;;  %v2678_v49 = vsel %vm2676_vm1, %v2661_v51, %v5284_v59  ;;  %v2677_v54 = vsel %vm2676_vm1, %v2660_v57, %v5283_v48  ;;  %v7016_v51 = vld [vmem:[%s7890_s4 + $0x68] ss:$16 sps:$4 sm:$0xff]  }
 0x279   : > { %v5385_v31 = vpack.i.bf16 %v2464_v16, %v2461_v58  ;;  %3172 = vmatprep.subr.bf16.mxu1 %v5437_v50  ;;  %v6971_v58 = vld [vmem:[%s7890_s4 + $0x8] ss:$16 sps:$4 sm:$0xff]   ;;  %v6989_v50 = vld [vmem:[%s7890_s4 + $0x4c] ss:$16 sps:$4 sm:$0xff]  }
 0x27b   : > { %5386 = vrot.lane.b32.xlu0 %v5385_v31, %s5753_s12  ;;  %v6983_v31 = vld [vmem:[%s7890_s4 + $0x28] ss:$16 sps:$4 sm:$0xff]   ;;  %s3922_s12 = sshll.u32 %s7702_s30, 4  ;;  %s7831_s12 = int_to_ptr.vmem [resolvable:$true] %s3922_s12 }
 0x27c   : > { %3173 = vmatpush1.bf16.msra.mxu1 %v5435_v36  ;;  %s5666_s16 = scalar_lea.vmem %s7831_s12, 8192  ;;  %p5673_p1 = scmp.lt.s32.totalorder %s7831_s12, %s5671_s18 }
 0x27d   : > { %3174 = vmatprep.subr.bf16.mxu1 %v5440_v13  ;;  %v5287_v1 = vpop.permute.xlu0 %5286  ;;  %p5667_p12 = scmp.ne.s32.totalorder %s7831_s12, %s5666_s16  ;;  %p5674_p2 = scmp.lt.s32.totalorder %s5672_s19, %s5666_s16 }
 0x27e   : > { %v5289_v42 = vunpack.i.h.bf16 %v5287_v1  ;;  %v5288_v38 = vunpack.i.l.bf16 %v5287_v1 }
 0x27f   : > { %p5668_p13 = pnand %p5667_p12, %p5831_p4  ;;  %p5675_p3 = por %p5674_p2, %p5673_p1 }
 0x280   : > { %3175 = vmatpush1.bf16.msra.mxu1 %v5438_v19  ;;  %v2679_v0 = vsel %vm2676_vm1, %v2662_v10, %v5288_v38  ;;  %v2680_v28 = vsel %vm2676_vm1, %v2663_v33, %v5289_v42 }
 0x281   : > { %3176 = vmatprep.subr.bf16.mxu1 %v5449_v25  ;;  %p5669_p0 = pneg %p5668_p13 }
 0x283   : > { %p5676_p5 = pnand %p5675_p3, %p5669_p0 }
 0x284   : > { %3177 = vmatpush1.bf16.msra.mxu1 %v5447_v43 }
 0x285   : > { %3178 = vmatprep.subr.bf16.mxu1 %v5458_v46 }
 0x288   : > { %3179 = vmatpush1.bf16.msra.mxu1 %v5456_v47 }
 0x2b5   : > { %v5292_v18 = vpop.permute.xlu1 %5291 }
 0x2b6   : > { %v5294_v37 = vunpack.i.h.bf16 %v5292_v18  ;;  %v5293_v23 = vunpack.i.l.bf16 %v5292_v18 }
 0x2b8   : > { %v2695_v55 = vsel %vm2693_vm2, %v2678_v49, %v5294_v37  ;;  %v2694_v20 = vsel %vm2693_vm2, %v2677_v54, %v5293_v23  ;;  %v7022_v37 = vld [vmem:[%s7890_s4 + $0x8c] ss:$16 sps:$4 sm:$0xff]  }
 0x2b9   : > { %v2710_v24 = vpack.c.bf16 %v2695_v55, %v2694_v20  ;;  %v5302_v17 = vpop.permute.xlu1 %5301 }
 0x2ba   : > { %v5304_v11 = vunpack.i.h.bf16 %v5302_v17  ;;  %v5303_v15 = vunpack.i.l.bf16 %v5302_v17 }
 0x2bb   : > { %5164 = vmatprep.mubr.msk.bf16.mxu0 %vm2757_vm3, %v2710_v24 }
 0x2bc   : > { %v2665_v36 = vsel %vm2659_vm0, %v6715_v4, %v5304_v11  ;;  %v2664_v13 = vsel %vm2659_vm0, %v6710_v29, %v5303_v15  ;;  %v7003_v4 = vld [vmem:[%s7890_s4 + $0x48] ss:$16 sps:$4 sm:$0xff]   ;;  %v7009_v29 = vld [vmem:[%s7890_s4 + $0x6c] ss:$16 sps:$4 sm:$0xff]  }
 0x2bd   : > { %v5297_v39 = vpop.permute.xlu0 %5296  ;;  %v5312_v35 = vpop.permute.xlu1 %5311 }
 0x2be   : > { %v5299_v5 = vunpack.i.h.bf16 %v5297_v39  ;;  %v5298_v52 = vunpack.i.l.bf16 %v5297_v39  ;;  %v5314_v14 = vunpack.i.h.bf16 %v5312_v35  ;;  %v5313_v2 = vunpack.i.l.bf16 %v5312_v35 }
 0x2c0   : > { %v2696_v6 = vsel %vm2693_vm2, %v2679_v0, %v5298_v52  ;;  %v2697_v21 = vsel %vm2693_vm2, %v2680_v28, %v5299_v5  ;;  %v2681_v43 = vsel %vm2676_vm1, %v2664_v13, %v5313_v2  ;;  %v2682_v46 = vsel %vm2676_vm1, %v2665_v36, %v5314_v14  ;;  %v7049_v5 = vld [vmem:[%s7890_s4 + $0xa8] ss:$16 sps:$4 sm:$0xff]  }
 0x2c1   : > { %v2711_v7 = vpack.c.bf16 %v2697_v21, %v2696_v6  ;;  %v5307_v16 = vpop.permute.xlu0 %5306 }
 0x2c2   : > { %v5309_v22 = vunpack.i.h.bf16 %v5307_v16  ;;  %v5308_v59 = vunpack.i.l.bf16 %v5307_v16 }
 0x2c3   : > { %5165 = vmatmul.mubr.msk.bf16.vlgmr.msra.gmra.mrb[128].mxu0 %vm2757_vm3, %v2711_v7 }
 0x2c4   : > { %3280 = vmatpush1.bf16.msra.mxu0 %v6971_v58  ;;  %v2667_v23 = vsel %vm2659_vm0, %v6733_v56, %v5309_v22  ;;  %v2666_v49 = vsel %vm2659_vm0, %v6728_v26, %v5308_v59  ;;  %v7036_v56 = vld [vmem:[%s7890_s4 + $0x88] ss:$16 sps:$4 sm:$0xff]   ;;  %v7042_v26 = vld [vmem:[%s7890_s4 + $0xac] ss:$16 sps:$4 sm:$0xff]  }
 0x2c5   : > { %v5322_v45 = vpop.permute.xlu1 %5321  ;;  %3281 = vmatprep.subr.bf16.mxu0 %v6976_v60  ;;  %v5317_v62 = vpop.permute.xlu0 %5316 }
 0x2c6   : > { %v5324_v19 = vunpack.i.h.bf16 %v5322_v45  ;;  %v5323_v25 = vunpack.i.l.bf16 %v5322_v45  ;;  %v5319_v8 = vunpack.i.h.bf16 %v5317_v62  ;;  %v5318_v18 = vunpack.i.l.bf16 %v5317_v62 }
 0x2c8   : > { %v2699_v47 = vsel %vm2693_vm2, %v2682_v46, %v5324_v19  ;;  %v2698_v40 = vsel %vm2693_vm2, %v2681_v43, %v5323_v25  ;;  %3282 = vmatpush1.bf16.msra.mxu0 %v6983_v31  ;;  %v2683_v55 = vsel %vm2676_vm1, %v2666_v49, %v5318_v18  ;;  %v2684_v20 = vsel %vm2676_vm1, %v2667_v23, %v5319_v8 }
 0x2c9   : > { %v2712_v41 = vpack.c.bf16 %v2699_v47, %v2698_v40  ;;  %3283 = vmatprep.subr.bf16.mxu0 %v6989_v50  ;;  %v5332_v48 = vpop.permute.xlu1 %5331 }
 0x2ca   : > { %v5334_v42 = vunpack.i.h.bf16 %v5332_v48  ;;  %v5333_v38 = vunpack.i.l.bf16 %v5332_v48 }
 0x2cb   : > { %5168 = vmatprep.mubr.msk.bf16.mxu0 %vm2757_vm3, %v2712_v41 }
 0x2cc   : > { %3284 = vmatpush1.bf16.msra.mxu0 %v7003_v4  ;;  %v2669_v0 = vsel %vm2659_vm0, %v6744_v53, %v5334_v42  ;;  %v2668_v28 = vsel %vm2659_vm0, %v6740_v44, %v5333_v38 }
 0x2cd   : > { %v5327_v57 = vpop.permute.xlu0 %5326  ;;  %3285 = vmatprep.subr.bf16.mxu0 %v7009_v29  ;;  %v5342_v24 = vpop.permute.xlu1 %5341 }
 0x2ce   : > { %v5329_v54 = vunpack.i.h.bf16 %v5327_v57  ;;  %v5328_v1 = vunpack.i.l.bf16 %v5327_v57  ;;  %v5344_v33 = vunpack.i.h.bf16 %v5342_v24  ;;  %v5343_v10 = vunpack.i.l.bf16 %v5342_v24 }
 0x2d0   : > { %v2700_v32 = vsel %vm2693_vm2, %v2683_v55, %v5328_v1  ;;  %v2701_v12 = vsel %vm2693_vm2, %v2684_v20, %v5329_v54  ;;  %3286 = vmatpush1.bf16.msra.mxu0 %v7016_v51  ;;  %v2685_v21 = vsel %vm2676_vm1, %v2668_v28, %v5343_v10  ;;  %v2686_v7 = vsel %vm2676_vm1, %v2669_v0, %v5344_v33 }
 0x2d1   : > { %v2713_v17 = vpack.c.bf16 %v2701_v12, %v2700_v32  ;;  %3287 = vmatprep.subr.bf16.mxu0 %v7022_v37  ;;  %v5337_v39 = vpop.permute.xlu0 %5336 }
 0x2d2   : > { %v5339_v2 = vunpack.i.h.bf16 %v5337_v39  ;;  %v5338_v45 = vunpack.i.l.bf16 %v5337_v39 }
 0x2d3   : > { %5169 = vmatmul.mubr.msk.bf16.gmra.mrb[132].mxu0 %vm2757_vm3, %v2713_v17 }
 0x2d4   : > { %3288 = vmatpush1.bf16.msra.mxu0 %v7036_v56  ;;  %v2671_v19 = vsel %vm2659_vm0, %v6749_v9, %v5339_v2  ;;  %v2670_v25 = vsel %vm2659_vm0, %v6747_v63, %v5338_v45  ;;  %v7116_v2 = vld [vmem:[%s7890_s4 + $0xec] ss:$16 sps:$4 sm:$0xff]   ;;  %v7124_v45 = vld [vmem:[%s7889_s3] ss:$0 sm:$0xff] }
 0x2d5   : > { %v5352_v52 = vpop.permute.xlu1 %5351  ;;  %3289 = vmatprep.subr.bf16.mxu0 %v7042_v26  ;;  %v5347_v16 = vpop.permute.xlu0 %5346 }
 0x2d6   : > { %v5354_v35 = vunpack.i.h.bf16 %v5352_v52  ;;  %v5353_v6 = vunpack.i.l.bf16 %v5352_v52  ;;  %v5349_v36 = vunpack.i.h.bf16 %v5347_v16  ;;  %v5348_v13 = vunpack.i.l.bf16 %v5347_v16  ;;  %v7104_v16 = vld [vmem:[%s7890_s4 + $0xc8] ss:$16 sps:$4 sm:$0xff]  }
 0x2d8   : > { %v2703_v11 = vsel %vm2693_vm2, %v2686_v7, %v5354_v35  ;;  %v2702_v15 = vsel %vm2693_vm2, %v2685_v21, %v5353_v6  ;;  %3290 = vmatpush1.bf16.msra.mxu0 %v7049_v5  ;;  %v2687_v47 = vsel %vm2676_vm1, %v2670_v25, %v5348_v13  ;;  %v2688_v40 = vsel %vm2676_vm1, %v2671_v19, %v5349_v36 }
 0x2d9   : > { %v2714_v14 = vpack.c.bf16 %v2703_v11, %v2702_v15  ;;  %v5362_v53 = vpop.permute.xlu1 %5361  ;;  %v7941_v11 = vmov 0   ;;  %v7099_v15 = vld [vmem:[%s7890_s4 + $0xcc] ss:$16 sps:$4 sm:$0xff]  }
 0x2da   : > { %v5364_v48 = vunpack.i.h.bf16 %v5362_v53  ;;  %v5363_v8 = vunpack.i.l.bf16 %v5362_v53  ;;  %3291 = vmatprep.subr.bf16.mxu0 %v7099_v15 }
 0x2db   : > { %5172 = vmatprep.mubr.msk.bf16.mxu0 %vm2757_vm3, %v2714_v14  ;;  %v7111_v14 = vld [vmem:[%s7890_s4 + $0xe8] ss:$16 sps:$4 sm:$0xff]  }
 0x2dc   : > { %v2673_v23 = vsel %vm2659_vm0, %v6753_v3, %v5364_v48  ;;  %v2672_v49 = vsel %vm2659_vm0, %v6751_v34, %v5363_v8  ;;  %3292 = vmatpush1.bf16.msra.mxu0 %v7104_v16 }
 0x2dd   : > { %v5357_v44 = vpop.permute.xlu0 %5356  ;;  %v5372_v62 = vpop.permute.xlu1 %5371  ;;  %3293 = vmatprep.subr.bf16.mxu0 %v7116_v2 }
 0x2de   : > { %v5359_v43 = vunpack.i.h.bf16 %v5357_v44  ;;  %v5358_v46 = vunpack.i.l.bf16 %v5357_v44  ;;  %v5374_v57 = vunpack.i.h.bf16 %v5372_v62  ;;  %v5373_v9 = vunpack.i.l.bf16 %v5372_v62 }
 0x2e0   : > { %v2704_v41 = vsel %vm2693_vm2, %v2687_v47, %v5358_v46  ;;  %v2705_v22 = vsel %vm2693_vm2, %v2688_v40, %v5359_v43  ;;  %v2689_v55 = vsel %vm2676_vm1, %v2672_v49, %v5373_v9  ;;  %v2690_v20 = vsel %vm2676_vm1, %v2673_v23, %v5374_v57  ;;  %3294 = vmatpush1.bf16.msra.mxu0 %v7111_v14 }
 0x2e1   : > { %v2715_v59 = vpack.c.bf16 %v2705_v22, %v2704_v41  ;;  %v5367_v18 = vpop.permute.xlu0 %5366 }
 0x2e2   : > { %v5369_v42 = vunpack.i.h.bf16 %v5367_v18  ;;  %v5368_v38 = vunpack.i.l.bf16 %v5367_v18 }
 0x2e3   : > { %5173 = vmatmul.mubr.msk.bf16.gmra.mrb[136].mxu0 %vm2757_vm3, %v2715_v59 }
 0x2e4   : > { %v2675_v34 = vsel %vm2659_vm0, %v6757_v30, %v5369_v42  ;;  %v2674_v10 = vsel %vm2659_vm0, %v6755_v27, %v5368_v38  ;;  %v5465_v30 = vld [vmem:[%s7890_s4 + $0xe0] ss:$16 sps:$4 sm:$0xff]   ;;  %v5467_v27 = vld [vmem:[%s7890_s4 + $0xe4] ss:$16 sps:$4 sm:$0xff]  }
 0x2e5   : > { %v5382_v63 = vpop.permute.xlu1 %5381  ;;  %v5377_v12 = vpop.permute.xlu0 %5376  ;;  %3180 = vmatprep.subr.bf16.mxu1 %v5467_v27 }
 0x2e6   : > { %v5384_v54 = vunpack.i.h.bf16 %v5382_v63  ;;  %v5383_v1 = vunpack.i.l.bf16 %v5382_v63  ;;  %v5379_v39 = vunpack.i.h.bf16 %v5377_v12  ;;  %v5378_v33 = vunpack.i.l.bf16 %v5377_v12  ;;  %3181 = vmatpush1.bf16.msra.mxu1 %v5465_v30 }
 0x2e7   : > { %5180 = vmatprep.subr.bf16.mxu1 %v6920_v61  ;;  %v7942_v30 = vlaneseq }
 0x2e8   : > { %v2707_v24 = vsel %vm2693_vm2, %v2690_v20, %v5384_v54  ;;  %v2706_v32 = vsel %vm2693_vm2, %v2689_v55, %v5383_v1  ;;  %v2691_v28 = vsel %vm2676_vm1, %v2674_v10, %v5378_v33  ;;  %v2692_v35 = vsel %vm2676_vm1, %v2675_v34, %v5379_v39 }
 0x2e9   : > { %v2716_v17 = vpack.c.bf16 %v2707_v24, %v2706_v32  ;;  %v2987_v27 = vshrl.u32 %v7942_v30, 7 }
 0x2eb   : > { %5176 = vmatprep.mubr.msk.bf16.mxu0 %vm2757_vm3, %v2716_v17 }
 0x2ed   : > { %v5387_v3 = vpop.permute.xlu0 %5386 }
 0x2ee   : > { %v5389_v52 = vunpack.i.h.bf16 %v5387_v3  ;;  %v5388_v0 = vunpack.i.l.bf16 %v5387_v3 }
 0x2f0   : > { %v2708_v6 = vsel %vm2693_vm2, %v2691_v28, %v5388_v0  ;;  %v2709_v21 = vsel %vm2693_vm2, %v2692_v35, %v5389_v52 }
 0x2f1   : > { %v2717_v7 = vpack.c.bf16 %v2709_v21, %v2708_v6 }
 0x2f3   : > { %5177 = vmatmul.mubr.msk.bf16.gmra.mrb[140].mxu0 %vm2757_vm3, %v2717_v7 }
 0x2f4   : > { %3311 = vmatprep.mubr.bf16.mxu0 %v7941_v11 }
 0x396   : > { %v5166_v53 = vpop.f32.mrb[128].mxu0 }
 0x397   : > { %v2825_v36 = vadd.f32 %v5166_v53, %v7124_v45  ;;  %v2816_v13 = vpop.f32.mrb[129].mxu0 }
 0x398   : > { %v2817_v44 = vadd.f32 %v7124_v45, %v2816_v13  ;;  %v5167_v19 = vpop.f32.mrb[130].mxu0 }
 0x399   : > { %v2828_v25 = vadd.f32 %v5167_v19, %v7124_v45  ;;  %v2819_v43 = vpop.f32.mrb[131].mxu0  ;;  %v2881_v46 = vmax.f32 %v2825_v36, 0.0  ;;  %v3000_v36 = vsub.s32 3, %v2987_v27 }
 0x39a   : > { %v2820_v61 = vadd.f32 %v7124_v45, %v2819_v43  ;;  %v2879_v40 = vmax.f32 %v2817_v44, 0.0 }
 0x39b   : > { %v2882_v47 = vmax.f32 %v2828_v25, 0.0 }
 0x39c   : > { %v2880_v62 = vmax.f32 %v2820_v61, 0.0 }
 0x39d   : > { %v2896_v41 = vpack.c.bf16 %v2882_v47, %v2881_v46 }
 0x39e   : > { %v2895_v22 = vpack.c.bf16 %v2880_v62, %v2879_v40 }
 0x3a0   : > { %3199 = vmatmul.mubr.bf16.vlgmr.msra.gmra.mrb[128].mxu1 %v2895_v22  ;;  %3312 = vmatmul.mubr.bf16.vlgmr.msra.gmra.mrb[144].mxu0 %v2895_v22 }
 0x3a1   : > { %5188 = vmatpush1.bf16.msra.mxu1 %v6971_v58  ;;  %3208 = vmatprep.mubr.bf16.mxu1 %v7941_v11 }
 0x3a2   : > { %5181 = vmatprep.subr.bf16.mxu1 %v6976_v60  ;;  %3321 = vmatprep.mubr.bf16.mxu0 %v7941_v11 }
 0x3a5   : > { %5189 = vmatpush1.bf16.msra.mxu1 %v6983_v31 }
 0x3a6   : > { %v5170_v59 = vpop.f32.mrb[132].mxu0  ;;  %5182 = vmatprep.subr.bf16.mxu1 %v6989_v50 }
 0x3a7   : > { %v2841_v48 = vadd.f32 %v5170_v59, %v7124_v45  ;;  %v2832_v8 = vpop.f32.mrb[133].mxu0 }
 0x3a8   : > { %v2833_v18 = vadd.f32 %v7124_v45, %v2832_v8  ;;  %v5171_v57 = vpop.f32.mrb[134].mxu0  ;;  %3209 = vmatmul.mubr.bf16.gmra.mrb[132].mxu1 %v2896_v41  ;;  %3322 = vmatmul.mubr.bf16.gmra.mrb[148].mxu0 %v2896_v41 }
 0x3a9   : > { %v2844_v58 = vadd.f32 %v5171_v57, %v7124_v45  ;;  %v2835_v9 = vpop.f32.mrb[135].mxu0  ;;  %3218 = vmatprep.mubr.bf16.mxu1 %v7941_v11  ;;  %3331 = vmatprep.mubr.bf16.mxu0 %v7941_v11  ;;  %v2885_v31 = vmax.f32 %v2841_v48, 0.0 }
 0x3aa   : > { %v2836_v60 = vadd.f32 %v7124_v45, %v2835_v9  ;;  %5190 = vmatpush1.bf16.msra.mxu1 %v7003_v4  ;;  %v2883_v63 = vmax.f32 %v2833_v18, 0.0 }
 0x3ab   : > { %v2886_v50 = vmax.f32 %v2844_v58, 0.0  ;;  %5183 = vmatprep.subr.bf16.mxu1 %v7009_v29 }
 0x3ac   : > { %v2884_v23 = vmax.f32 %v2836_v60, 0.0 }
 0x3ad   : > { %v2898_v49 = vpack.c.bf16 %v2886_v50, %v2885_v31 }
 0x3ae   : > { %v2897_v54 = vpack.c.bf16 %v2884_v23, %v2883_v63  ;;  %5191 = vmatpush1.bf16.msra.mxu1 %v7016_v51 }
 0x3af   : > { %5184 = vmatprep.subr.bf16.mxu1 %v7022_v37 }
 0x3b0   : > { %3219 = vmatmul.mubr.bf16.gmra.mrb[136].mxu1 %v2897_v54  ;;  %3332 = vmatmul.mubr.bf16.gmra.mrb[152].mxu0 %v2897_v54 }
 0x3b1   : > { %3228 = vmatprep.mubr.bf16.mxu1 %v7941_v11  ;;  %3341 = vmatprep.mubr.bf16.mxu0 %v7941_v11 }
 0x3b2   : > { %5192 = vmatpush1.bf16.msra.mxu1 %v7036_v56 }
 0x3b3   : > { %5185 = vmatprep.subr.bf16.mxu1 %v7042_v26 }
 0x3b6   : > { %v5174_v4 = vpop.f32.mrb[136].mxu0  ;;  %5193 = vmatpush1.bf16.msra.mxu1 %v7049_v5 }
 0x3b7   : > { %v2857_v29 = vadd.f32 %v5174_v4, %v7124_v45  ;;  %v2848_v1 = vpop.f32.mrb[137].mxu0  ;;  %5186 = vmatprep.subr.bf16.mxu1 %v7099_v15  ;;  %v2988_v15 = vsub.s32 0, %v2987_v27 }
 0x3b8   : > { %v2849_v51 = vadd.f32 %v7124_v45, %v2848_v1  ;;  %v5175_v37 = vpop.f32.mrb[138].mxu0  ;;  %3229 = vmatmul.mubr.bf16.gmra.mrb[140].mxu1 %v2898_v49  ;;  %3342 = vmatmul.mubr.bf16.gmra.mrb[156].mxu0 %v2898_v49 }
 0x3b9   : > { %v2860_v55 = vadd.f32 %v5175_v37, %v7124_v45  ;;  %v2851_v20 = vpop.f32.mrb[139].mxu0  ;;  %3238 = vmatprep.mubr.bf16.mxu1 %v7941_v11  ;;  %3351 = vmatprep.mubr.bf16.mxu0 %v7941_v11  ;;  %v2889_v26 = vmax.f32 %v2857_v29, 0.0 }
 0x3ba   : > { %v2852_v56 = vadd.f32 %v7124_v45, %v2851_v20  ;;  %5194 = vmatpush1.bf16.msra.mxu1 %v7104_v16  ;;  %v2887_v24 = vmax.f32 %v2849_v51, 0.0  ;;  %v2984_v16 = vld [vmem:[%s7891_s5] sm:$0xf] }
 0x3bb   : > { %v2890_v5 = vmax.f32 %v2860_v55, 0.0  ;;  %5187 = vmatprep.subr.bf16.mxu1 %v7116_v2  ;;  %v2996_v2 = vsub.s32 2, %v2987_v27  ;;  %v7187_v46 = vrot.slane %v2984_v16, %v3000_v36 }
 0x3bc   : > { %v2888_v32 = vmax.f32 %v2852_v56, 0.0 }
 0x3bd   : > { %v2900_v12 = vpack.c.bf16 %v2890_v5, %v2889_v26  ;;  %v7179_v44 = vrot.slane %v2984_v16, %v2996_v2 }
 0x3be   : > { %v2899_v17 = vpack.c.bf16 %v2888_v32, %v2887_v24  ;;  %5195 = vmatpush1.bf16.msra.mxu1 %v7111_v14  ;;  %v2992_v14 = vsub.s32 1, %v2987_v27 }
 0x3c0   : > { %3239 = vmatmul.mubr.bf16.gmra.mrb[144].mxu1 %v2899_v17  ;;  %3352 = vmatmul.mubr.bf16.gmra.mrb[160].mxu0 %v2899_v17  ;;  %v7177_v53 = vrot.slane %v2984_v16, %v2992_v14 }
 0x3c1   : > { %3248 = vmatprep.mubr.bf16.mxu1 %v7941_v11  ;;  %3361 = vmatprep.mubr.bf16.mxu0 %v7941_v11 }
 0x3c6   : > { %v5178_v42 = vpop.f32.mrb[140].mxu0 }
 0x3c7   : > { %v2873_v38 = vadd.f32 %v5178_v42, %v7124_v45  ;;  %v2864_v39 = vpop.f32.mrb[141].mxu0 }
 0x3c8   : > { %v2865_v33 = vadd.f32 %v7124_v45, %v2864_v39  ;;  %v5179_v3 = vpop.f32.mrb[142].mxu0  ;;  %3249 = vmatmul.mubr.bf16.gmra.mrb[148].mxu1 %v2900_v12  ;;  %3362 = vmatmul.mubr.bf16.gmra.mrb[164].mxu0 %v2900_v12 }
 0x3c9   : > { %v2876_v34 = vadd.f32 %v5179_v3, %v7124_v45  ;;  %v2867_v10 = vpop.f32.mrb[143].mxu0  ;;  %3258 = vmatprep.mubr.bf16.mxu1 %v7941_v11  ;;  %v2893_v0 = vmax.f32 %v2873_v38, 0.0 }
 0x3ca   : > { %v2868_v52 = vadd.f32 %v7124_v45, %v2867_v10  ;;  %v2891_v35 = vmax.f32 %v2865_v33, 0.0  ;;  %v7175_v45 = vrot.slane %v2984_v16, %v2988_v15 }
 0x3cb   : > { %v2894_v28 = vmax.f32 %v2876_v34, 0.0 }
 0x3cc   : > { %v2892_v6 = vmax.f32 %v2868_v52, 0.0 }
 0x3cd   : > { %v2902_v21 = vpack.c.bf16 %v2894_v28, %v2893_v0 }
 0x3ce   : > { %v2901_v7 = vpack.c.bf16 %v2892_v6, %v2891_v35 }
 0x3d0   : > { %3259 = vmatmul.mubr.bf16.gmra.mrb[152].mxu1 %v2901_v7 }
 0x3d1   : > { %3268 = vmatprep.mubr.bf16.mxu1 %v7941_v11 }
 0x3d8   : > { %3269 = vmatmul.mubr.bf16.gmra.mrb[156].mxu1 %v2902_v21 }
 0x3d9   : > { %3371 = vmatprep.mubr.bf16.mxu1 %v7941_v11 }
 0x3e0   : > { %3372 = vmatmul.mubr.bf16.vlgmr.msra.gmra.mrb[160].mxu1 %v2901_v7 }
 0x3e1   : > { %3381 = vmatprep.mubr.bf16.mxu1 %v7941_v11 }
 0x3e8   : > { %3382 = vmatmul.mubr.bf16.gmra.mrb[164].mxu1 %v2902_v21 }
 0x473   : > { %v3200_v13 = vpop.f32.mrb[128].mxu1  ;;  %v3313_v19 = vpop.f32.mrb[144].mxu0 }
 0x474   : > { %v7182_v11 = vadd.f32 %v3200_v13, %v7175_v45  ;;  %v3202_v25 = vpop.f32.mrb[129].mxu1  ;;  %v3315_v43 = vpop.f32.mrb[145].mxu0  ;;  %v7193_v59 = vadd.f32 %v3313_v19, %v7179_v44 }
 0x475   : > { %v7185_v61 = vadd.f32 %v3202_v25, %v7177_v53  ;;  %v3204_v47 = vpop.f32.mrb[130].mxu1  ;;  %v3317_v40 = vpop.f32.mrb[146].mxu0  ;;  %v7201_v18 = vadd.f32 %v3315_v43, %v7187_v46 }
 0x476   : > { %v7190_v62 = vadd.f32 %v3204_v47, %v7175_v45  ;;  %v3206_v41 = vpop.f32.mrb[131].mxu1  ;;  %v3319_v22 = vpop.f32.mrb[147].mxu0  ;;  %v7204_v57 = vadd.f32 %v3317_v40, %v7179_v44 }
 0x477   : > { %v3392_v48 = vmax.f32 %v7182_v11, %v7185_v61  ;;  %v7198_v8 = vadd.f32 %v3206_v41, %v7177_v53  ;;  %v7210_v60 = vadd.f32 %v3319_v22, %v7187_v46 }
 0x479   : > { %v3397_v58 = vmax.f32 %v7190_v62, %v7198_v8  ;;  %v3393_v9 = vmax.f32 %v3392_v48, %v7193_v59 }
 0x47b   : > { %v3210_v31 = vpop.f32.mrb[132].mxu1  ;;  %v3323_v50 = vpop.f32.mrb[148].mxu0  ;;  %v3394_v63 = vmax.f32 %v3393_v9, %v7201_v18  ;;  %v3398_v23 = vmax.f32 %v3397_v58, %v7204_v57 }
 0x47c   : > { %v7215_v49 = vadd.f32 %v3210_v31, %v7175_v45  ;;  %v3212_v54 = vpop.f32.mrb[133].mxu1  ;;  %v3325_v4 = vpop.f32.mrb[149].mxu0  ;;  %v7225_v26 = vadd.f32 %v3323_v50, %v7179_v44 }
 0x47d   : > { %v7218_v29 = vadd.f32 %v3212_v54, %v7177_v53  ;;  %v3214_v1 = vpop.f32.mrb[134].mxu1  ;;  %v3327_v51 = vpop.f32.mrb[150].mxu0  ;;  %3395 = vmax.xlane.f32.xlu1 %v3394_v63  ;;  %v3399_v37 = vmax.f32 %v3398_v23, %v7210_v60  ;;  %v7233_v32 = vadd.f32 %v3325_v4, %v7187_v46 }
 0x47e   : > { %v7222_v55 = vadd.f32 %v3214_v1, %v7175_v45  ;;  %v3216_v20 = vpop.f32.mrb[135].mxu1  ;;  %v3329_v56 = vpop.f32.mrb[151].mxu0  ;;  %v7236_v12 = vadd.f32 %v3327_v51, %v7179_v44 }
 0x47f   : > { %v3402_v5 = vmax.f32 %v7215_v49, %v7218_v29  ;;  %v7230_v24 = vadd.f32 %v3216_v20, %v7177_v53  ;;  %3400 = vmax.xlane.f32.xlu0 %v3399_v37  ;;  %v7242_v38 = vadd.f32 %v3329_v56, %v7187_v46 }
 0x481   : > { %v3407_v17 = vmax.f32 %v7222_v55, %v7230_v24  ;;  %v3403_v42 = vmax.f32 %v3402_v5, %v7225_v26 }
 0x483   : > { %v3220_v39 = vpop.f32.mrb[136].mxu1  ;;  %v3333_v33 = vpop.f32.mrb[152].mxu0  ;;  %v3404_v3 = vmax.f32 %v3403_v42, %v7233_v32  ;;  %v3408_v34 = vmax.f32 %v3407_v17, %v7236_v12 }
 0x484   : > { %v7247_v10 = vadd.f32 %v3220_v39, %v7175_v45  ;;  %v3222_v52 = vpop.f32.mrb[137].mxu1  ;;  %v3335_v0 = vpop.f32.mrb[153].mxu0  ;;  %v7257_v15 = vadd.f32 %v3333_v33, %v7179_v44 }
 0x485   : > { %v7250_v28 = vadd.f32 %v3222_v52, %v7177_v53  ;;  %v3224_v35 = vpop.f32.mrb[138].mxu1  ;;  %v3337_v6 = vpop.f32.mrb[154].mxu0  ;;  %3405 = vmax.xlane.f32.xlu0 %v3404_v3  ;;  %v3409_v21 = vmax.f32 %v3408_v34, %v7242_v38  ;;  %v7265_v2 = vadd.f32 %v3335_v0, %v7187_v46 }
 0x486   : > { %v7254_v7 = vadd.f32 %v3224_v35, %v7175_v45  ;;  %v3226_v30 = vpop.f32.mrb[139].mxu1  ;;  %v3339_v27 = vpop.f32.mrb[155].mxu0  ;;  %v7268_v36 = vadd.f32 %v3337_v6, %v7179_v44 }
 0x487   : > { %v3412_v16 = vmax.f32 %v7247_v10, %v7250_v28  ;;  %v7262_v14 = vadd.f32 %v3226_v30, %v7177_v53  ;;  %3410 = vmax.xlane.f32.xlu1 %v3409_v21  ;;  %v7274_v25 = vadd.f32 %v3339_v27, %v7187_v46 }
 0x489   : > { %v3417_v13 = vmax.f32 %v7254_v7, %v7262_v14  ;;  %v3413_v19 = vmax.f32 %v3412_v16, %v7257_v15 }
 0x48b   : > { %v3230_v43 = vpop.f32.mrb[140].mxu1  ;;  %v3343_v47 = vpop.f32.mrb[156].mxu0  ;;  %v3414_v40 = vmax.f32 %v3413_v19, %v7265_v2  ;;  %v3418_v41 = vmax.f32 %v3417_v13, %v7268_v36 }
 0x48c   : > { %v7279_v22 = vadd.f32 %v3230_v43, %v7175_v45  ;;  %v3232_v48 = vpop.f32.mrb[141].mxu1  ;;  %v3345_v58 = vpop.f32.mrb[157].mxu0  ;;  %v7289_v1 = vadd.f32 %v3343_v47, %v7179_v44 }
 0x48d   : > { %v7282_v9 = vadd.f32 %v3232_v48, %v7177_v53  ;;  %v3234_v31 = vpop.f32.mrb[142].mxu1  ;;  %v3347_v50 = vpop.f32.mrb[158].mxu0  ;;  %3415 = vmax.xlane.f32.xlu0 %v3414_v40  ;;  %v3419_v63 = vmax.f32 %v3418_v41, %v7274_v25  ;;  %v7297_v20 = vadd.f32 %v3345_v58, %v7187_v46 }
 0x48e   : > { %v7286_v23 = vadd.f32 %v3234_v31, %v7175_v45  ;;  %v3236_v54 = vpop.f32.mrb[143].mxu1  ;;  %v3349_v4 = vpop.f32.mrb[159].mxu0  ;;  %v7300_v56 = vadd.f32 %v3347_v50, %v7179_v44 }
 0x48f   : > { %v3422_v51 = vmax.f32 %v7279_v22, %v7282_v9  ;;  %v7294_v37 = vadd.f32 %v3236_v54, %v7177_v53  ;;  %3420 = vmax.xlane.f32.xlu1 %v3419_v63  ;;  %v7306_v42 = vadd.f32 %v3349_v4, %v7187_v46 }
 0x491   : > { %v3427_v5 = vmax.f32 %v7286_v23, %v7294_v37  ;;  %v3423_v17 = vmax.f32 %v3422_v51, %v7289_v1 }
 0x493   : > { %v3240_v39 = vpop.f32.mrb[144].mxu1  ;;  %v3353_v33 = vpop.f32.mrb[160].mxu0  ;;  %v3424_v3 = vmax.f32 %v3423_v17, %v7297_v20  ;;  %v3428_v34 = vmax.f32 %v3427_v5, %v7300_v56 }
 0x494   : > { %v7311_v52 = vadd.f32 %v3240_v39, %v7175_v45  ;;  %v3242_v0 = vpop.f32.mrb[145].mxu1  ;;  %v3355_v35 = vpop.f32.mrb[161].mxu0  ;;  %v7321_v43 = vadd.f32 %v3353_v33, %v7179_v44 }
 0x495   : > { %v7314_v6 = vadd.f32 %v3242_v0, %v7177_v53  ;;  %v3244_v21 = vpop.f32.mrb[146].mxu1  ;;  %v3357_v30 = vpop.f32.mrb[162].mxu0  ;;  %3425 = vmax.xlane.f32.xlu0 %v3424_v3  ;;  %v3429_v27 = vmax.f32 %v3428_v34, %v7306_v42  ;;  %v7329_v41 = vadd.f32 %v3355_v35, %v7187_v46 }
 0x496   : > { %v7318_v16 = vadd.f32 %v3244_v21, %v7175_v45  ;;  %v3246_v13 = vpop.f32.mrb[147].mxu1  ;;  %v3359_v19 = vpop.f32.mrb[163].mxu0  ;;  %v7332_v48 = vadd.f32 %v3357_v30, %v7179_v44 }
 0x497   : > { %v3432_v47 = vmax.f32 %v7311_v52, %v7314_v6  ;;  %v7326_v40 = vadd.f32 %v3246_v13, %v7177_v53  ;;  %3430 = vmax.xlane.f32.xlu1 %v3429_v27  ;;  %v7338_v50 = vadd.f32 %v3359_v19, %v7187_v46 }
 0x499   : > { %v3437_v58 = vmax.f32 %v7318_v16, %v7326_v40  ;;  %v3433_v31 = vmax.f32 %v3432_v47, %v7321_v43 }
 0x49b   : > { %v3438_v63 = vmax.f32 %v3437_v58, %v7332_v48  ;;  %v3250_v54 = vpop.f32.mrb[148].mxu1  ;;  %v3363_v4 = vpop.f32.mrb[164].mxu0  ;;  %v3434_v51 = vmax.f32 %v3433_v31, %v7329_v41 }
 0x49c   : > { %v7343_v5 = vadd.f32 %v3250_v54, %v7175_v45  ;;  %v3252_v17 = vpop.f32.mrb[149].mxu1  ;;  %v3365_v39 = vpop.f32.mrb[165].mxu0  ;;  %v7353_v27 = vadd.f32 %v3363_v4, %v7179_v44 }
 0x49d   : > { %v3439_v33 = vmax.f32 %v3438_v63, %v7338_v50  ;;  %v7347_v3 = vadd.f32 %v3252_v17, %v7177_v53  ;;  %v3254_v34 = vpop.f32.mrb[150].mxu1  ;;  %v3367_v0 = vpop.f32.mrb[166].mxu0  ;;  %3435 = vmax.xlane.f32.xlu0 %v3434_v51  ;;  %v7361_v47 = vadd.f32 %v3365_v39, %v7187_v46 }
 0x49e   : > { %v7350_v35 = vadd.f32 %v3254_v34, %v7175_v45  ;;  %v3256_v21 = vpop.f32.mrb[151].mxu1  ;;  %v3369_v30 = vpop.f32.mrb[167].mxu0  ;;  %v7364_v58 = vadd.f32 %v3367_v0, %v7179_v44 }
 0x49f   : > { %v3442_v13 = vmax.f32 %v7343_v5, %v7347_v3  ;;  %v7358_v19 = vadd.f32 %v3256_v21, %v7177_v53  ;;  %3440 = vmax.xlane.f32.xlu1 %v3439_v33  ;;  %7945 = vst [vmem:[#allocation10_spill] sm:$0xff] %v7361_v47  ;;  %v7370_v54 = vadd.f32 %v3369_v30, %v7187_v46 }
 0x4a0   : > { %7943 = vst [vmem:[#allocation8_spill] sm:$0xff] %v7350_v35  ;;  %7946 = vst [vmem:[#allocation11_spill] sm:$0xff] %v7364_v58 }
 0x4a1   : > { %7944 = vst [vmem:[#allocation9_spill] sm:$0xff] %v7358_v19  ;;  %v3447_v31 = vmax.f32 %v7350_v35, %v7358_v19  ;;  %v3443_v63 = vmax.f32 %v3442_v13, %v7353_v27  ;;  %7947 = vst [vmem:[#allocation12_spill] sm:$0xff] %v7370_v54 }
 0x4a3   : > { %v3448_v4 = vmax.f32 %v3447_v31, %v7364_v58  ;;  %v3260_v51 = vpop.f32.mrb[152].mxu1  ;;  %v3444_v17 = vmax.f32 %v3443_v63, %v7361_v47 }
 0x4a4   : > { %v3262_v33 = vpop.f32.mrb[153].mxu1 }
 0x4a5   : > { %v3449_v39 = vmax.f32 %v3448_v4, %v7370_v54  ;;  %v3264_v34 = vpop.f32.mrb[154].mxu1  ;;  %3445 = vmax.xlane.f32.xlu0 %v3444_v17 }
 0x4a6   : > { %v7376_v0 = vadd.f32 %v3264_v34, %v7175_v45  ;;  %v3266_v21 = vpop.f32.mrb[155].mxu1 }
 0x4a7   : > { %v7379_v19 = vadd.f32 %v3266_v21, %v7177_v53  ;;  %3450 = vmax.xlane.f32.xlu1 %v3449_v39  ;;  %v7394_v21 = vadd.f32 %v3260_v51, %v7175_v45  ;;  %v7397_v39 = vadd.f32 %v3262_v33, %v7177_v53 }
 0x4a8   : > { %7948 = vst [vmem:[#allocation13_spill] sm:$0xff] %v7376_v0 }
 0x4a9   : > { %7949 = vst [vmem:[#allocation14_spill] sm:$0xff] %v7379_v19  ;;  %7953 = vst [vmem:[#allocation18_spill] sm:$0xff] %v7394_v21  ;;  %v3452_v54 = vmax.f32 %v7394_v21, %v7397_v39 }
 0x4aa   : > { %7954 = vst [vmem:[#allocation19_spill] sm:$0xff] %v7397_v39 }
 0x4ab   : > { %v3270_v30 = vpop.f32.mrb[156].mxu1 }
 0x4ac   : > { %v7382_v13 = vadd.f32 %v3270_v30, %v7175_v45  ;;  %v3272_v31 = vpop.f32.mrb[157].mxu1 }
 0x4ad   : > { %v7385_v63 = vadd.f32 %v3272_v31, %v7177_v53  ;;  %v3274_v58 = vpop.f32.mrb[158].mxu1 }
 0x4ae   : > { %7950 = vst [vmem:[#allocation15_spill] sm:$0xff] %v7382_v13  ;;  %v7388_v4 = vadd.f32 %v3274_v58, %v7175_v45  ;;  %v3276_v17 = vpop.f32.mrb[159].mxu1 }
 0x4af   : > { %7951 = vst [vmem:[#allocation16_spill] sm:$0xff] %v7385_v63  ;;  %v7391_v34 = vadd.f32 %v3276_v17, %v7177_v53  ;;  %v3457_v17 = vmax.f32 %v7376_v0, %v7379_v19  ;;  %v3462_v19 = vmax.f32 %v7382_v13, %v7385_v63 }
 0x4b1   : > { %7952 = vst [vmem:[#allocation17_spill] sm:$0xff] %v7391_v34 }
 0x4b3   : > { %v3373_v30 = vpop.f32.mrb[160].mxu1 }
 0x4b4   : > { %v7402_v31 = vadd.f32 %v3373_v30, %v7179_v44  ;;  %v3375_v35 = vpop.f32.mrb[161].mxu1 }
 0x4b5   : > { %v7405_v58 = vadd.f32 %v3375_v35, %v7187_v46  ;;  %v3377_v47 = vpop.f32.mrb[162].mxu1 }
 0x4b6   : > { %v3453_v45 = vmax.f32 %v3452_v54, %v7402_v31  ;;  %v7411_v53 = vadd.f32 %v3377_v47, %v7179_v44  ;;  %v3379_v51 = vpop.f32.mrb[163].mxu1 }
 0x4b7   : > { %v7414_v33 = vadd.f32 %v3379_v51, %v7187_v46 }
 0x4b8   : > { %v3454_v30 = vmax.f32 %v3453_v45, %v7405_v58  ;;  %v3458_v39 = vmax.f32 %v3457_v17, %v7411_v53  ;;  %v3467_v45 = vmax.f32 %v7388_v4, %v7391_v34 }
 0x4ba   : > { %v3459_v35 = vmax.f32 %v3458_v39, %v7414_v33  ;;  %3455 = vmax.xlane.f32.xlu0 %v3454_v30 }
 0x4bb   : > { %v3383_v21 = vpop.f32.mrb[164].mxu1 }
 0x4bc   : > { %v7422_v54 = vadd.f32 %v3383_v21, %v7179_v44  ;;  %v3385_v47 = vpop.f32.mrb[165].mxu1  ;;  %3460 = vmax.xlane.f32.xlu1 %v3459_v35 }
 0x4bd   : > { %v7425_v0 = vadd.f32 %v3385_v47, %v7187_v46  ;;  %v3387_v51 = vpop.f32.mrb[166].mxu1 }
 0x4be   : > { %v3463_v17 = vmax.f32 %v3462_v19, %v7422_v54  ;;  %v7431_v39 = vadd.f32 %v3387_v51, %v7179_v44  ;;  %v3389_v30 = vpop.f32.mrb[167].mxu1 }
 0x4bf   : > { %v7434_v63 = vadd.f32 %v3389_v30, %v7187_v46 }
 0x4c0   : > { %v3464_v21 = vmax.f32 %v3463_v17, %v7425_v0  ;;  %v3468_v35 = vmax.f32 %v3467_v45, %v7431_v39 }
 0x4c2   : > { %v3469_v47 = vmax.f32 %v3468_v35, %v7434_v63  ;;  %3465 = vmax.xlane.f32.xlu0 %v3464_v21 }
 0x4c4   : > { %3470 = vmax.xlane.f32.xlu1 %v3469_v47 }
 0x50a   : > { %v3396_v13 = vpop.xlane.xlu1 %3395 }
 0x50b   : > { %v7440_v34 = vsub.f32 %v7182_v11, %v3396_v13  ;;  %v7443_v19 = vsub.f32 %v7185_v61, %v3396_v13  ;;  %v7446_v44 = vsub.f32 %v7193_v59, %v3396_v13  ;;  %v7449_v46 = vsub.f32 %v7201_v18, %v3396_v13 }
 0x50c   : > { %v3401_v51 = vpop.xlane.xlu0 %3400 }
 0x50d   : > { %v3536_v45 = vmul.f32 1.442695, %v7440_v34  ;;  %v3538_v17 = vmul.f32 1.442695, %v7443_v19  ;;  %v3540_v30 = vmul.f32 1.442695, %v7446_v44  ;;  %v7455_v21 = vsub.f32 %v7190_v62, %v3401_v51 }
 0x50e   : > { %v3542_v11 = vmul.f32 1.442695, %v7449_v46  ;;  %v7459_v61 = vsub.f32 %v7198_v8, %v3401_v51  ;;  %v7462_v59 = vsub.f32 %v7204_v57, %v3401_v51  ;;  %v7465_v18 = vsub.f32 %v7210_v60, %v3401_v51 }
 0x50f   : > { %5474 = vpow2.f32 %v3536_v45  ;;  %v3544_v13 = vmul.f32 1.442695, %v7455_v21 }
 0x510   : > { %5476 = vpow2.f32 %v3538_v17  ;;  %v3546_v35 = vmul.f32 1.442695, %v7459_v61  ;;  %v3548_v62 = vmul.f32 1.442695, %v7462_v59  ;;  %v3550_v47 = vmul.f32 1.442695, %v7465_v18 }
 0x511   : > { %5478 = vpow2.f32 %v3540_v30 }
 0x512   : > { %5480 = vpow2.f32 %v3542_v11  ;;  %v3406_v8 = vpop.xlane.xlu0 %3405 }
 0x513   : > { %5482 = vpow2.f32 %v3544_v13  ;;  %v7472_v57 = vsub.f32 %v7215_v49, %v3406_v8  ;;  %v7475_v60 = vsub.f32 %v7218_v29, %v3406_v8  ;;  %v7478_v51 = vsub.f32 %v7225_v26, %v3406_v8 }
 0x514   : > { %5484 = vpow2.f32 %v3546_v35  ;;  %v7481_v45 = vsub.f32 %v7233_v32, %v3406_v8  ;;  %v3411_v17 = vpop.xlane.xlu1 %3410 }
 0x515   : > { %7955 = vst [vmem:[#allocation20_spill] sm:$0xff] %v7478_v51  ;;  %5486 = vpow2.f32 %v3548_v62  ;;  %v3552_v30 = vmul.f32 1.442695, %v7472_v57  ;;  %v3554_v11 = vmul.f32 1.442695, %v7475_v60  ;;  %v7488_v29 = vsub.f32 %v7222_v55, %v3411_v17 }
 0x516   : > { %7956 = vst [vmem:[#allocation21_spill] sm:$0xff] %v7481_v45  ;;  %v3556_v13 = vmul.f32 1.442695, %v7478_v51  ;;  %5488 = vpow2.f32 %v3550_v47  ;;  %v3558_v49 = vmul.f32 1.442695, %v7481_v45  ;;  %v7491_v26 = vsub.f32 %v7230_v24, %v3411_v17 }
 0x517   : > { %7957 = vst [vmem:[#allocation22_spill] sm:$0xff] %v7488_v29  ;;  %5490 = vpow2.f32 %v3552_v30  ;;  %v7494_v32 = vsub.f32 %v7236_v12, %v3411_v17  ;;  %v7497_v35 = vsub.f32 %v7242_v38, %v3411_v17  ;;  %v3560_v62 = vmul.f32 1.442695, %v7488_v29 }
 0x518   : > { %7958 = vst [vmem:[#allocation23_spill] sm:$0xff] %v7491_v26  ;;  %5492 = vpow2.f32 %v3554_v11  ;;  %v3562_v47 = vmul.f32 1.442695, %v7491_v26 }
 0x519   : > { %7959 = vst [vmem:[#allocation24_spill] sm:$0xff] %v7494_v32  ;;  %7960 = vst [vmem:[#allocation25_spill] sm:$0xff] %v7497_v35  ;;  %v5475_v8 = vpop.eup %5474  ;;  %5494 = vpow2.f32 %v3556_v13  ;;  %v3564_v55 = vmul.f32 1.442695, %v7494_v32  ;;  %v3566_v24 = vmul.f32 1.442695, %v7497_v35 }
 0x51a   : > { %v5477_v45 = vpop.eup %5476  ;;  %5496 = vpow2.f32 %v3558_v49  ;;  %v3416_v30 = vpop.xlane.xlu0 %3415 }
 0x51b   : > { %v5479_v51 = vpop.eup %5478  ;;  %5498 = vpow2.f32 %v3560_v62  ;;  %v7504_v12 = vsub.f32 %v7247_v10, %v3416_v30  ;;  %v7507_v38 = vsub.f32 %v7250_v28, %v3416_v30  ;;  %v7510_v17 = vsub.f32 %v7257_v15, %v3416_v30 }
 0x51c   : > { %v5481_v11 = vpop.eup %5480  ;;  %5500 = vpow2.f32 %v3562_v47  ;;  %v7513_v13 = vsub.f32 %v7265_v2, %v3416_v30  ;;  %v3421_v49 = vpop.xlane.xlu1 %3420  ;;  %v3664_v32 = vadd.f32 %v5477_v45, %v5475_v8 }
 0x51d   : > { %7961 = vst [vmem:[#allocation26_spill] sm:$0xff] %v7504_v12  ;;  %7962 = vst [vmem:[#allocation27_spill] sm:$0xff] %v7507_v38  ;;  %v5483_v35 = vpop.eup %5482  ;;  %5502 = vpow2.f32 %v3564_v55  ;;  %v3568_v62 = vmul.f32 1.442695, %v7504_v12  ;;  %v3570_v10 = vmul.f32 1.442695, %v7507_v38  ;;  %v7520_v29 = vsub.f32 %v7254_v7, %v3421_v49 }
 0x51e   : > { %7963 = vst [vmem:[#allocation28_spill] sm:$0xff] %v7510_v17  ;;  %7964 = vst [vmem:[#allocation29_spill] sm:$0xff] %v7513_v13  ;;  %v3572_v26 = vmul.f32 1.442695, %v7510_v17  ;;  %v5485_v28 = vpop.eup %5484  ;;  %5504 = vpow2.f32 %v3566_v24  ;;  %v3574_v15 = vmul.f32 1.442695, %v7513_v13  ;;  %v7523_v2 = vsub.f32 %v7262_v14, %v3421_v49 }
 0x51f   : > { %v5487_v47 = vpop.eup %5486  ;;  %5506 = vpow2.f32 %v3568_v62  ;;  %v7526_v45 = vsub.f32 %v7268_v36, %v3421_v49  ;;  %v7529_v8 = vsub.f32 %v7274_v25, %v3421_v49  ;;  %v3665_v55 = vadd.f32 %v5479_v51, %v3664_v32 }
 0x520   : > { %v5489_v30 = vpop.eup %5488  ;;  %5508 = vpow2.f32 %v3570_v10  ;;  %v3576_v24 = vmul.f32 1.442695, %v7520_v29  ;;  %v3578_v13 = vmul.f32 1.442695, %v7523_v2  ;;  %v3669_v7 = vadd.f32 %v5485_v28, %v5483_v35 }
 0x521   : > { %v5491_v17 = vpop.eup %5490  ;;  %5510 = vpow2.f32 %v3572_v26  ;;  %v3580_v14 = vmul.f32 1.442695, %v7526_v45  ;;  %v3666_v38 = vadd.f32 %v5481_v11, %v3665_v55  ;;  %v3582_v36 = vmul.f32 1.442695, %v7529_v8 }
 0x522   : > { %v5493_v62 = vpop.eup %5492  ;;  %5512 = vpow2.f32 %v3574_v15  ;;  %v3426_v12 = vpop.xlane.xlu0 %3425  ;;  %v3670_v25 = vadd.f32 %v5487_v47, %v3669_v7 }
 0x523   : > { %v5495_v49 = vpop.eup %5494  ;;  %5514 = vpow2.f32 %v3576_v24  ;;  %3667 = vadd.xlane.f32.xlu0 %v3666_v38  ;;  %v7536_v51 = vsub.f32 %v7279_v22, %v3426_v12  ;;  %v7539_v32 = vsub.f32 %v7282_v9, %v3426_v12  ;;  %v7542_v26 = vsub.f32 %v7289_v1, %v3426_v12 }
 0x524   : > { %v5497_v35 = vpop.eup %5496  ;;  %5516 = vpow2.f32 %v3578_v13  ;;  %v7545_v11 = vsub.f32 %v7297_v20, %v3426_v12  ;;  %v3671_v10 = vadd.f32 %v5489_v30, %v3670_v25  ;;  %v3431_v28 = vpop.xlane.xlu1 %3430  ;;  %v3674_v15 = vadd.f32 %v5493_v62, %v5491_v17 }
 0x525   : > { %v5499_v47 = vpop.eup %5498  ;;  %5518 = vpow2.f32 %v3580_v14  ;;  %v3584_v38 = vmul.f32 1.442695, %v7536_v51  ;;  %v3586_v22 = vmul.f32 1.442695, %v7539_v32  ;;  %v3588_v9 = vmul.f32 1.442695, %v7542_v26 }
 0x526   : > { %v5501_v55 = vpop.eup %5500  ;;  %5520 = vpow2.f32 %v3582_v36  ;;  %v3590_v1 = vmul.f32 1.442695, %v7545_v11  ;;  %3672 = vadd.xlane.f32.xlu1 %v3671_v10  ;;  %v7552_v13 = vsub.f32 %v7286_v23, %v3431_v28  ;;  %v7555_v20 = vsub.f32 %v7294_v37, %v3431_v28 }
 0x527   : > { %v5503_v12 = vpop.eup %5502  ;;  %5522 = vpow2.f32 %v3584_v38  ;;  %v7558_v17 = vsub.f32 %v7300_v56, %v3431_v28  ;;  %v7561_v30 = vsub.f32 %v7306_v42, %v3431_v28  ;;  %v3675_v24 = vadd.f32 %v5495_v49, %v3674_v15 }
 0x528   : > { %v5505_v7 = vpop.eup %5504  ;;  %5524 = vpow2.f32 %v3586_v22  ;;  %v3592_v14 = vmul.f32 1.442695, %v7552_v13  ;;  %v3594_v62 = vmul.f32 1.442695, %v7555_v20  ;;  %v3679_v23 = vadd.f32 %v5501_v55, %v5499_v47 }
 0x529   : > { %v5507_v36 = vpop.eup %5506  ;;  %5526 = vpow2.f32 %v3588_v9  ;;  %v3596_v37 = vmul.f32 1.442695, %v7558_v17  ;;  %v3676_v25 = vadd.f32 %v5497_v35, %v3675_v24  ;;  %v3598_v56 = vmul.f32 1.442695, %v7561_v30 }
 0x52a   : > { %v5509_v10 = vpop.eup %5508  ;;  %5528 = vpow2.f32 %v3590_v1  ;;  %v3436_v38 = vpop.xlane.xlu0 %3435  ;;  %v3680_v42 = vadd.f32 %v5503_v12, %v3679_v23 }
 0x52b   : > { %v5511_v28 = vpop.eup %5510  ;;  %5530 = vpow2.f32 %v3592_v14  ;;  %3677 = vadd.xlane.f32.xlu0 %v3676_v25  ;;  %v7568_v49 = vsub.f32 %v7311_v52, %v3436_v38  ;;  %v7571_v15 = vsub.f32 %v7314_v6, %v3436_v38  ;;  %v7574_v47 = vsub.f32 %v7321_v43, %v3436_v38 }
 0x52c   : > { %v5513_v22 = vpop.eup %5512  ;;  %5532 = vpow2.f32 %v3594_v62  ;;  %v7577_v35 = vsub.f32 %v7329_v41, %v3436_v38  ;;  %v3681_v9 = vadd.f32 %v5505_v7, %v3680_v42  ;;  %v3441_v55 = vpop.xlane.xlu1 %3440  ;;  %v3684_v1 = vadd.f32 %v5509_v10, %v5507_v36 }
 0x52d   : > { %v5515_v12 = vpop.eup %5514  ;;  %5534 = vpow2.f32 %v3596_v37  ;;  %v3600_v24 = vmul.f32 1.442695, %v7568_v49  ;;  %v3602_v52 = vmul.f32 1.442695, %v7571_v15  ;;  %v3604_v6 = vmul.f32 1.442695, %v7574_v47 }
 0x52e   : > { %v5517_v14 = vpop.eup %5516  ;;  %5536 = vpow2.f32 %v3598_v56  ;;  %v3606_v43 = vmul.f32 1.442695, %v7577_v35  ;;  %3682 = vadd.xlane.f32.xlu1 %v3681_v9  ;;  %v7584_v62 = vsub.f32 %v7318_v16, %v3441_v55  ;;  %v7587_v41 = vsub.f32 %v7326_v40, %v3441_v55 }
 0x52f   : > { %v5519_v7 = vpop.eup %5518  ;;  %5538 = vpow2.f32 %v3600_v24  ;;  %v7590_v23 = vsub.f32 %v7332_v48, %v3441_v55  ;;  %v7593_v36 = vsub.f32 %v7338_v50, %v3441_v55  ;;  %v3685_v37 = vadd.f32 %v5511_v28, %v3684_v1 }
 0x530   : > { %v5521_v25 = vpop.eup %5520  ;;  %5540 = vpow2.f32 %v3602_v52  ;;  %v3608_v10 = vmul.f32 1.442695, %v7584_v62  ;;  %v3610_v56 = vmul.f32 1.442695, %v7587_v41  ;;  %v3689_v16 = vadd.f32 %v5517_v14, %v5515_v12 }
 0x531   : > { %7965 = vst [vmem:[#allocation30_spill] sm:$0xff] %v7593_v36  ;;  %v5523_v38 = vpop.eup %5522  ;;  %5542 = vpow2.f32 %v3604_v6  ;;  %v3612_v40 = vmul.f32 1.442695, %v7590_v23  ;;  %v3686_v42 = vadd.f32 %v5513_v22, %v3685_v37  ;;  %v3614_v48 = vmul.f32 1.442695, %v7593_v36  ;;  %v7969_v22 = vld [vmem:[#allocation10_spill] sm:$0xff] }
 0x532   : > { %v5525_v9 = vpop.eup %5524  ;;  %5544 = vpow2.f32 %v3606_v43  ;;  %v3446_v24 = vpop.xlane.xlu0 %3445  ;;  %v3690_v50 = vadd.f32 %v5519_v7, %v3689_v16 }
 0x533   : > { %v5527_v55 = vpop.eup %5526  ;;  %5546 = vpow2.f32 %v3608_v10  ;;  %3687 = vadd.xlane.f32.xlu0 %v3686_v42  ;;  %v7600_v28 = vsub.f32 %v7343_v5, %v3446_v24  ;;  %v7603_v1 = vsub.f32 %v7347_v3, %v3446_v24  ;;  %v7606_v12 = vsub.f32 %v7353_v27, %v3446_v24 }
 0x534   : > { %v5529_v52 = vpop.eup %5528  ;;  %5548 = vpow2.f32 %v3610_v56  ;;  %v7609_v6 = vsub.f32 %v7969_v22, %v3446_v24  ;;  %v3691_v14 = vadd.f32 %v5521_v25, %v3690_v50  ;;  %v3451_v43 = vpop.xlane.xlu1 %3450  ;;  %v3694_v7 = vadd.f32 %v5525_v9, %v5523_v38  ;;  %v7971_v56 = vld [vmem:[#allocation8_spill] sm:$0xff]  ;;  %v7972_v24 = vld [vmem:[#allocation9_spill] sm:$0xff] }
 0x535   : > { %7966 = vst [vmem:[#allocation31_spill] sm:$0xff] %v7600_v28  ;;  %7967 = vst [vmem:[#allocation32_spill] sm:$0xff] %v7603_v1  ;;  %v5531_v37 = vpop.eup %5530  ;;  %5550 = vpow2.f32 %v3612_v40  ;;  %v3616_v10 = vmul.f32 1.442695, %v7600_v28  ;;  %v3618_v5 = vmul.f32 1.442695, %v7603_v1  ;;  %v7616_v42 = vsub.f32 %v7971_v56, %v3451_v43 }
 0x536   : > { %7968 = vst [vmem:[#allocation33_spill] sm:$0xff] %v7606_v12  ;;  %7970 = vst [vmem:[#allocation10_spill] sm:$0xff] %v7609_v6  ;;  %v3620_v3 = vmul.f32 1.442695, %v7606_v12  ;;  %v5533_v16 = vpop.eup %5532  ;;  %5552 = vpow2.f32 %v3614_v48  ;;  %v3622_v27 = vmul.f32 1.442695, %v7609_v6  ;;  %3692 = vadd.xlane.f32.xlu1 %v3691_v14  ;;  %v7619_v25 = vsub.f32 %v7972_v24, %v3451_v43 }
 0x537   : > { %v5535_v38 = vpop.eup %5534  ;;  %5554 = vpow2.f32 %v3616_v10  ;;  %v7974_v40 = vld [vmem:[#allocation11_spill] sm:$0xff]  ;;  %v3695_v50 = vadd.f32 %v5527_v55, %v3694_v7  ;;  %v3624_v12 = vmul.f32 1.442695, %v7616_v42  ;;  %v3699_v6 = vadd.f32 %v5533_v16, %v5531_v37  ;;  %v7975_v56 = vld [vmem:[#allocation12_spill] sm:$0xff] }
 0x538   : > { %7973 = vst [vmem:[#allocation8_spill] sm:$0xff] %v7619_v25  ;;  %v7622_v9 = vsub.f32 %v7974_v40, %v3451_v43  ;;  %v5537_v22 = vpop.eup %5536  ;;  %5556 = vpow2.f32 %v3618_v5  ;;  %v3626_v48 = vmul.f32 1.442695, %v7619_v25  ;;  %v7627_v1 = vsub.f32 %v7975_v56, %v3451_v43 }
 0x539   : > { %v5539_v14 = vpop.eup %5538  ;;  %5558 = vpow2.f32 %v3620_v3  ;;  %v3696_v24 = vadd.f32 %v5529_v52, %v3695_v50  ;;  %v3700_v40 = vadd.f32 %v5535_v38, %v3699_v6 }
 0x53a   : > { %v5541_v28 = vpop.eup %5540  ;;  %5560 = vpow2.f32 %v3622_v27  ;;  %v3628_v10 = vmul.f32 1.442695, %v7622_v9  ;;  %v3630_v37 = vmul.f32 1.442695, %v7627_v1 }
 0x53b   : > { %v5543_v36 = vpop.eup %5542  ;;  %5562 = vpow2.f32 %v3624_v12  ;;  %3697 = vadd.xlane.f32.xlu0 %v3696_v24  ;;  %v3704_v55 = vadd.f32 %v5541_v28, %v5539_v14  ;;  %v3701_v5 = vadd.f32 %v5537_v22, %v3700_v40 }
 0x53c   : > { %v5545_v7 = vpop.eup %5544  ;;  %5564 = vpow2.f32 %v3626_v48 }
 0x53d   : > { %v5547_v25 = vpop.eup %5546  ;;  %v3705_v3 = vadd.f32 %v5543_v36, %v3704_v55  ;;  %5566 = vpow2.f32 %v3628_v10  ;;  %3702 = vadd.xlane.f32.xlu1 %v3701_v5 }
 0x53e   : > { %v5549_v16 = vpop.eup %5548  ;;  %5568 = vpow2.f32 %v3630_v37 }
 0x53f   : > { %v5551_v52 = vpop.eup %5550  ;;  %v3706_v43 = vadd.f32 %v5545_v7, %v3705_v3  ;;  %v3709_v27 = vadd.f32 %v5549_v16, %v5547_v25  ;;  %v7976_v7 = vld [vmem:[#allocation18_spill] sm:$0xff]  ;;  %v7977_v3 = vld [vmem:[#allocation19_spill] sm:$0xff] }
 0x540   : > { %v5553_v50 = vpop.eup %5552 }
 0x541   : > { %v5555_v56 = vpop.eup %5554  ;;  %3707 = vadd.xlane.f32.xlu0 %v3706_v43  ;;  %v3710_v12 = vadd.f32 %v5551_v52, %v3709_v27 }
 0x542   : > { %v5557_v6 = vpop.eup %5556 }
 0x543   : > { %v5559_v28 = vpop.eup %5558  ;;  %v3711_v38 = vadd.f32 %v5553_v50, %v3710_v12  ;;  %v3714_v48 = vadd.f32 %v5557_v6, %v5555_v56  ;;  %v7978_v6 = vld [vmem:[#allocation13_spill] sm:$0xff] }
 0x544   : > { %v5561_v22 = vpop.eup %5560 }
 0x545   : > { %v5563_v14 = vpop.eup %5562  ;;  %3712 = vadd.xlane.f32.xlu1 %v3711_v38  ;;  %v3715_v24 = vadd.f32 %v5559_v28, %v3714_v48 }
 0x546   : > { %v5565_v36 = vpop.eup %5564 }
 0x547   : > { %v3456_v40 = vpop.xlane.xlu0 %3455  ;;  %v3716_v10 = vadd.f32 %v5561_v22, %v3715_v24  ;;  %v3719_v55 = vadd.f32 %v5565_v36, %v5563_v14  ;;  %v5567_v5 = vpop.eup %5566 }
 0x548   : > { %v7632_v25 = vsub.f32 %v7976_v7, %v3456_v40  ;;  %v7635_v37 = vsub.f32 %v7977_v3, %v3456_v40  ;;  %v7638_v16 = vsub.f32 %v7402_v31, %v3456_v40  ;;  %v7641_v52 = vsub.f32 %v7405_v58, %v3456_v40  ;;  %v5569_v38 = vpop.eup %5568  ;;  %v7979_v31 = vld [vmem:[#allocation14_spill] sm:$0xff] }
 0x549   : > { %3717 = vadd.xlane.f32.xlu0 %v3716_v10  ;;  %v3461_v43 = vpop.xlane.xlu1 %3460  ;;  %v3720_v27 = vadd.f32 %v5567_v5, %v3719_v55 }
 0x54a   : > { %v3632_v50 = vmul.f32 1.442695, %v7632_v25  ;;  %v3634_v56 = vmul.f32 1.442695, %v7635_v37  ;;  %v3636_v12 = vmul.f32 1.442695, %v7638_v16  ;;  %v7647_v28 = vsub.f32 %v7978_v6, %v3461_v43 }
 0x54b   : > { %v3638_v48 = vmul.f32 1.442695, %v7641_v52  ;;  %v7651_v22 = vsub.f32 %v7979_v31, %v3461_v43  ;;  %v7654_v58 = vsub.f32 %v7411_v53, %v3461_v43  ;;  %v7657_v14 = vsub.f32 %v7414_v33, %v3461_v43  ;;  %v7980_v53 = vld [vmem:[#allocation15_spill] sm:$0xff]  ;;  %v7981_v33 = vld [vmem:[#allocation16_spill] sm:$0xff] }
 0x54c   : > { %5570 = vpow2.f32 %v3632_v50  ;;  %v3640_v24 = vmul.f32 1.442695, %v7647_v28  ;;  %v3721_v36 = vadd.f32 %v5569_v38, %v3720_v27 }
 0x54d   : > { %5572 = vpow2.f32 %v3634_v56  ;;  %v3642_v40 = vmul.f32 1.442695, %v7651_v22  ;;  %v3644_v10 = vmul.f32 1.442695, %v7654_v58  ;;  %v3646_v55 = vmul.f32 1.442695, %v7657_v14 }
 0x54e   : > { %5574 = vpow2.f32 %v3636_v12  ;;  %3722 = vadd.xlane.f32.xlu1 %v3721_v36 }
 0x54f   : > { %5576 = vpow2.f32 %v3638_v48  ;;  %v3466_v5 = vpop.xlane.xlu0 %3465 }
 0x550   : > { %5578 = vpow2.f32 %v3640_v24  ;;  %v7664_v7 = vsub.f32 %v7980_v53, %v3466_v5  ;;  %v7667_v3 = vsub.f32 %v7981_v33, %v3466_v5  ;;  %v7670_v43 = vsub.f32 %v7422_v54, %v3466_v5  ;;  %v7984_v54 = vld [vmem:[#allocation17_spill] sm:$0xff] }
 0x551   : > { %5580 = vpow2.f32 %v3642_v40  ;;  %v7673_v27 = vsub.f32 %v7425_v0, %v3466_v5  ;;  %v3471_v50 = vpop.xlane.xlu1 %3470 }
 0x552   : > { %5582 = vpow2.f32 %v3644_v10  ;;  %v3648_v56 = vmul.f32 1.442695, %v7664_v7  ;;  %v3650_v12 = vmul.f32 1.442695, %v7667_v3  ;;  %v3652_v6 = vmul.f32 1.442695, %v7670_v43 }
 0x553   : > { %7982 = vst [vmem:[#allocation9_spill] sm:$0xff] %v7673_v27  ;;  %5584 = vpow2.f32 %v3646_v55  ;;  %v3654_v38 = vmul.f32 1.442695, %v7673_v27  ;;  %v7680_v48 = vsub.f32 %v7388_v4, %v3471_v50  ;;  %v7683_v31 = vsub.f32 %v7984_v54, %v3471_v50 }
 0x554   : > { %5586 = vpow2.f32 %v3648_v56  ;;  %v7686_v0 = vsub.f32 %v7431_v39, %v3471_v50  ;;  %v7689_v24 = vsub.f32 %v7434_v63, %v3471_v50 }
 0x555   : > { %7983 = vst [vmem:[#allocation11_spill] sm:$0xff] %v7680_v48  ;;  %7985 = vst [vmem:[#allocation12_spill] sm:$0xff] %v7683_v31  ;;  %5588 = vpow2.f32 %v3650_v12  ;;  %v3656_v36 = vmul.f32 1.442695, %v7680_v48  ;;  %v3658_v40 = vmul.f32 1.442695, %v7683_v31 }
 0x556   : > { %7986 = vst [vmem:[#allocation18_spill] sm:$0xff] %v7686_v0  ;;  %7987 = vst [vmem:[#allocation19_spill] sm:$0xff] %v7689_v24  ;;  %v5571_v10 = vpop.eup %5570  ;;  %5590 = vpow2.f32 %v3652_v6  ;;  %v3660_v4 = vmul.f32 1.442695, %v7686_v0  ;;  %v3662_v39 = vmul.f32 1.442695, %v7689_v24 }
 0x557   : > { %v5573_v55 = vpop.eup %5572  ;;  %5592 = vpow2.f32 %v3654_v38 }
 0x558   : > { %v5575_v5 = vpop.eup %5574  ;;  %5594 = vpow2.f32 %v3656_v36  ;;  %v3724_v53 = vadd.f32 %v5573_v55, %v5571_v10 }
 0x559   : > { %v5577_v33 = vpop.eup %5576  ;;  %5596 = vpow2.f32 %v3658_v40 }
 0x55a   : > { %v5579_v56 = vpop.eup %5578  ;;  %v3725_v63 = vadd.f32 %v5575_v5, %v3724_v53  ;;  %5598 = vpow2.f32 %v3660_v4 }
 0x55b   : > { %v5581_v50 = vpop.eup %5580  ;;  %5600 = vpow2.f32 %v3662_v39 }
 0x55c   : > { %v5583_v12 = vpop.eup %5582  ;;  %v3726_v54 = vadd.f32 %v5577_v33, %v3725_v63  ;;  %v3729_v31 = vadd.f32 %v5581_v50, %v5579_v56 }
 0x55d   : > { %v5585_v48 = vpop.eup %5584 }
 0x55e   : > { %v5587_v6 = vpop.eup %5586  ;;  %3727 = vadd.xlane.f32.xlu0 %v3726_v54  ;;  %v3730_v38 = vadd.f32 %v5583_v12, %v3729_v31 }
 0x55f   : > { %v5589_v0 = vpop.eup %5588 }
 0x560   : > { %v5591_v27 = vpop.eup %5590  ;;  %v3731_v36 = vadd.f32 %v5585_v48, %v3730_v38  ;;  %v3734_v10 = vadd.f32 %v5589_v0, %v5587_v6 }
 0x561   : > { %v5593_v55 = vpop.eup %5592 }
 0x562   : > { %v5595_v40 = vpop.eup %5594  ;;  %3732 = vadd.xlane.f32.xlu1 %v3731_v36  ;;  %v3735_v24 = vadd.f32 %v5591_v27, %v3734_v10 }
 0x563   : > { %v5597_v5 = vpop.eup %5596 }
 0x564   : > { %v3736_v4 = vadd.f32 %v5593_v55, %v3735_v24  ;;  %v3739_v53 = vadd.f32 %v5597_v5, %v5595_v40  ;;  %v5599_v33 = vpop.eup %5598 }
 0x565   : > { %v5601_v39 = vpop.eup %5600 }
 0x566   : > { %3737 = vadd.xlane.f32.xlu0 %v3736_v4  ;;  %v3740_v56 = vadd.f32 %v5599_v33, %v3739_v53  ;;  %v7989_v33 = vld [vmem:[#allocation21_spill] sm:$0xff] }
 0x568   : > { %v3741_v63 = vadd.f32 %v5601_v39, %v3740_v56 }
 0x56a   : > { %3742 = vadd.xlane.f32.xlu1 %v3741_v63 }
 0x5b0   : > { %v3668_v31 = vpop.xlane.xlu0 %3667 }
 0x5b1   : > { %5602 = vlog2.f32 %v3668_v31  ;;  %v7990_v31 = vld [vmem:[#allocation22_spill] sm:$0xff] }
 0x5b3   : > { %v3673_v50 = vpop.xlane.xlu1 %3672 }
 0x5b4   : > { %5604 = vlog2.f32 %v3673_v50 }
 0x5b8   : > { %v3678_v48 = vpop.xlane.xlu0 %3677 }
 0x5b9   : > { %5606 = vlog2.f32 %v3678_v48  ;;  %v7991_v48 = vld [vmem:[#allocation23_spill] sm:$0xff] }
 0x5bb   : > { %v5603_v27 = vpop.eup %5602  ;;  %v3683_v0 = vpop.xlane.xlu1 %3682 }
 0x5bc   : > { %v3745_v12 = vmul.f32 0.6931472, %v5603_v27  ;;  %5608 = vlog2.f32 %v3683_v0 }
 0x5be   : > { %v5605_v24 = vpop.eup %5604  ;;  %v3776_v54 = vsub.f32 %v7440_v34, %v3745_v12  ;;  %v3777_v6 = vsub.f32 %v7443_v19, %v3745_v12  ;;  %v3778_v38 = vsub.f32 %v7446_v44, %v3745_v12  ;;  %v3779_v36 = vsub.f32 %v7449_v46, %v3745_v12  ;;  %v7993_v12 = vld [vmem:[#allocation25_spill] sm:$0xff] }
 0x5bf   : > { %v3747_v10 = vmul.f32 0.6931472, %v5605_v24 }
 0x5c0   : > { %3840 = vst [vmem:[%s7702_s30] sm:$0xff] %v3776_v54  ;;  %3841 = vst [vmem:[%s7702_s30 + $0x8] sm:$0xff] %v3777_v6  ;;  %v3688_v34 = vpop.xlane.xlu0 %3687 }
 0x5c1   : > { %3842 = vst [vmem:[%s7702_s30 + $0x10] sm:$0xff] %v3778_v38  ;;  %3843 = vst [vmem:[%s7702_s30 + $0x18] sm:$0xff] %v3779_v36  ;;  %v3780_v19 = vsub.f32 %v7455_v21, %v3747_v10  ;;  %v3781_v44 = vsub.f32 %v7459_v61, %v3747_v10  ;;  %v3782_v46 = vsub.f32 %v7462_v59, %v3747_v10  ;;  %5610 = vlog2.f32 %v3688_v34 }
 0x5c2   : > { %v3783_v55 = vsub.f32 %v7465_v18, %v3747_v10  ;;  %v7988_v18 = vld [vmem:[#allocation20_spill] sm:$0xff]  ;;  %v7994_v10 = vld [vmem:[#allocation26_spill] sm:$0xff] }
 0x5c3   : > { %v5607_v40 = vpop.eup %5606  ;;  %3844 = vst [vmem:[%s7702_s30 + $0x20] sm:$0xff] %v3780_v19  ;;  %3845 = vst [vmem:[%s7702_s30 + $0x28] sm:$0xff] %v3781_v44  ;;  %v3693_v5 = vpop.xlane.xlu1 %3692  ;;  %v7995_v19 = vld [vmem:[#allocation27_spill] sm:$0xff] }
 0x5c4   : > { %3846 = vst [vmem:[%s7702_s30 + $0x30] sm:$0xff] %v3782_v46  ;;  %3847 = vst [vmem:[%s7702_s30 + $0x38] sm:$0xff] %v3783_v55  ;;  %v3749_v4 = vmul.f32 0.6931472, %v5607_v40  ;;  %5612 = vlog2.f32 %v3693_v5  ;;  %v7996_v46 = vld [vmem:[#allocation28_spill] sm:$0xff]  ;;  %v7997_v40 = vld [vmem:[#allocation29_spill] sm:$0xff] }
 0x5c6   : > { %v5609_v21 = vpop.eup %5608  ;;  %v3784_v61 = vsub.f32 %v7472_v57, %v3749_v4  ;;  %v3785_v59 = vsub.f32 %v7475_v60, %v3749_v4  ;;  %v3786_v53 = vsub.f32 %v7988_v18, %v3749_v4  ;;  %v3787_v56 = vsub.f32 %v7989_v33, %v3749_v4  ;;  %v7992_v57 = vld [vmem:[#allocation24_spill] sm:$0xff] }
 0x5c7   : > { %v3751_v39 = vmul.f32 0.6931472, %v5609_v21 }
 0x5c8   : > { %3848 = vst [vmem:[%s7702_s30 + $0x40] sm:$0xff] %v3784_v61  ;;  %3849 = vst [vmem:[%s7702_s30 + $0x48] sm:$0xff] %v3785_v59  ;;  %v3698_v63 = vpop.xlane.xlu0 %3697 }
 0x5c9   : > { %3850 = vst [vmem:[%s7702_s30 + $0x50] sm:$0xff] %v3786_v53  ;;  %3851 = vst [vmem:[%s7702_s30 + $0x58] sm:$0xff] %v3787_v56  ;;  %v3788_v50 = vsub.f32 %v7990_v31, %v3751_v39  ;;  %v3789_v27 = vsub.f32 %v7991_v48, %v3751_v39  ;;  %v3790_v0 = vsub.f32 %v7992_v57, %v3751_v39  ;;  %5614 = vlog2.f32 %v3698_v63 }
 0x5ca   : > { %v3791_v60 = vsub.f32 %v7993_v12, %v3751_v39  ;;  %v3703_v24 = vpop.xlane.xlu1 %3702 }
 0x5cb   : > { %3852 = vst [vmem:[%s7702_s30 + $0x60] sm:$0xff] %v3788_v50  ;;  %3853 = vst [vmem:[%s7702_s30 + $0x68] sm:$0xff] %v3789_v27  ;;  %v5611_v54 = vpop.eup %5610  ;;  %5616 = vlog2.f32 %v3703_v24 }
 0x5cc   : > { %3854 = vst [vmem:[%s7702_s30 + $0x70] sm:$0xff] %v3790_v0  ;;  %3855 = vst [vmem:[%s7702_s30 + $0x78] sm:$0xff] %v3791_v60  ;;  %v3753_v6 = vmul.f32 0.6931472, %v5611_v54  ;;  %v7999_v54 = vld [vmem:[#allocation31_spill] sm:$0xff] }
 0x5ce   : > { %v5613_v38 = vpop.eup %5612  ;;  %v3708_v36 = vpop.xlane.xlu0 %3707  ;;  %v3792_v34 = vsub.f32 %v7994_v10, %v3753_v6  ;;  %v3793_v44 = vsub.f32 %v7995_v19, %v3753_v6  ;;  %v3794_v55 = vsub.f32 %v7996_v46, %v3753_v6  ;;  %v3795_v5 = vsub.f32 %v7997_v40, %v3753_v6  ;;  %v8003_v46 = vld [vmem:[#allocation8_spill] sm:$0xff] }
 0x5cf   : > { %v3755_v4 = vmul.f32 0.6931472, %v5613_v38  ;;  %5618 = vlog2.f32 %v3708_v36 }
 0x5d0   : > { %3856 = vst [vmem:[%s7702_s30 + $0x80] sm:$0xff] %v3792_v34  ;;  %3857 = vst [vmem:[%s7702_s30 + $0x88] sm:$0xff] %v3793_v44 }
 0x5d1   : > { %3858 = vst [vmem:[%s7702_s30 + $0x90] sm:$0xff] %v3794_v55  ;;  %3859 = vst [vmem:[%s7702_s30 + $0x98] sm:$0xff] %v3795_v5  ;;  %v3796_v21 = vsub.f32 %v7520_v29, %v3755_v4  ;;  %v3797_v61 = vsub.f32 %v7523_v2, %v3755_v4  ;;  %v3798_v59 = vsub.f32 %v7526_v45, %v3755_v4 }
 0x5d2   : > { %v3799_v18 = vsub.f32 %v7529_v8, %v3755_v4  ;;  %v3713_v53 = vpop.xlane.xlu1 %3712 }
 0x5d3   : > { %5620 = vlog2.f32 %v3713_v53  ;;  %v5615_v33 = vpop.eup %5614  ;;  %3860 = vst [vmem:[%s7702_s30 + $0xa0] sm:$0xff] %v3796_v21  ;;  %3861 = vst [vmem:[%s7702_s30 + $0xa8] sm:$0xff] %v3797_v61 }
 0x5d4   : > { %3862 = vst [vmem:[%s7702_s30 + $0xb0] sm:$0xff] %v3798_v59  ;;  %3863 = vst [vmem:[%s7702_s30 + $0xb8] sm:$0xff] %v3799_v18  ;;  %v3757_v56 = vmul.f32 0.6931472, %v5615_v33 }
 0x5d5   : > { %v5617_v39 = vpop.eup %5616 }
 0x5d6   : > { %v3718_v29 = vpop.xlane.xlu0 %3717  ;;  %v3800_v2 = vsub.f32 %v7536_v51, %v3757_v56  ;;  %v3801_v45 = vsub.f32 %v7539_v32, %v3757_v56  ;;  %v3802_v8 = vsub.f32 %v7542_v26, %v3757_v56  ;;  %v3803_v63 = vsub.f32 %v7545_v11, %v3757_v56 }
 0x5d7   : > { %v3759_v31 = vmul.f32 0.6931472, %v5617_v39  ;;  %5622 = vlog2.f32 %v3718_v29 }
 0x5d8   : > { %3864 = vst [vmem:[%s7702_s30 + $0xc0] sm:$0xff] %v3800_v2  ;;  %3865 = vst [vmem:[%s7702_s30 + $0xc8] sm:$0xff] %v3801_v45 }
 0x5d9   : > { %3866 = vst [vmem:[%s7702_s30 + $0xd0] sm:$0xff] %v3802_v8  ;;  %3867 = vst [vmem:[%s7702_s30 + $0xd8] sm:$0xff] %v3803_v63  ;;  %v5619_v50 = vpop.eup %5618  ;;  %v3804_v48 = vsub.f32 %v7552_v13, %v3759_v31  ;;  %v3805_v51 = vsub.f32 %v7555_v20, %v3759_v31  ;;  %v3806_v32 = vsub.f32 %v7558_v17, %v3759_v31  ;;  %v8004_v8 = vld [vmem:[#allocation9_spill] sm:$0xff]  ;;  %v8006_v63 = vld [vmem:[#allocation12_spill] sm:$0xff] }
 0x5da   : > { %v3807_v26 = vsub.f32 %v7561_v30, %v3759_v31  ;;  %v3761_v11 = vmul.f32 0.6931472, %v5619_v50  ;;  %v8007_v50 = vld [vmem:[#allocation18_spill] sm:$0xff] }
 0x5db   : > { %v3723_v27 = vpop.xlane.xlu1 %3722  ;;  %3868 = vst [vmem:[%s7702_s30 + $0xe0] sm:$0xff] %v3804_v48  ;;  %3869 = vst [vmem:[%s7702_s30 + $0xe8] sm:$0xff] %v3805_v51  ;;  %v8008_v51 = vld [vmem:[#allocation19_spill] sm:$0xff] }
 0x5dc   : > { %3870 = vst [vmem:[%s7702_s30 + $0xf0] sm:$0xff] %v3806_v32  ;;  %3871 = vst [vmem:[%s7702_s30 + $0xf8] sm:$0xff] %v3807_v26  ;;  %5624 = vlog2.f32 %v3723_v27  ;;  %v3808_v13 = vsub.f32 %v7568_v49, %v3761_v11  ;;  %v3809_v20 = vsub.f32 %v7571_v15, %v3761_v11  ;;  %v3810_v17 = vsub.f32 %v7574_v47, %v3761_v11  ;;  %v7998_v15 = vld [vmem:[#allocation30_spill] sm:$0xff] }
 0x5dd   : > { %v5621_v57 = vpop.eup %5620  ;;  %v3811_v30 = vsub.f32 %v7577_v35, %v3761_v11 }
 0x5de   : > { %v3763_v0 = vmul.f32 0.6931472, %v5621_v57  ;;  %3872 = vst [vmem:[%s7702_s30 + $0x100] sm:$0xff] %v3808_v13  ;;  %3873 = vst [vmem:[%s7702_s30 + $0x108] sm:$0xff] %v3809_v20 }
 0x5df   : > { %3874 = vst [vmem:[%s7702_s30 + $0x110] sm:$0xff] %v3810_v17  ;;  %3875 = vst [vmem:[%s7702_s30 + $0x118] sm:$0xff] %v3811_v30 }
 0x5e0   : > { %v3812_v12 = vsub.f32 %v7584_v62, %v3763_v0  ;;  %v3813_v60 = vsub.f32 %v7587_v41, %v3763_v0  ;;  %v3814_v49 = vsub.f32 %v7590_v23, %v3763_v0  ;;  %v3815_v24 = vsub.f32 %v7998_v15, %v3763_v0  ;;  %v8000_v62 = vld [vmem:[#allocation32_spill] sm:$0xff]  ;;  %v8001_v41 = vld [vmem:[#allocation33_spill] sm:$0xff]  ;;  %v8002_v23 = vld [vmem:[#allocation10_spill] sm:$0xff] }
 0x5e1   : > { %v5623_v47 = vpop.eup %5622 }
 0x5e2   : > { %3876 = vst [vmem:[%s7702_s30 + $0x120] sm:$0xff] %v3812_v12  ;;  %3877 = vst [vmem:[%s7702_s30 + $0x128] sm:$0xff] %v3813_v60  ;;  %v3765_v35 = vmul.f32 0.6931472, %v5623_v47 }
 0x5e3   : > { %3878 = vst [vmem:[%s7702_s30 + $0x130] sm:$0xff] %v3814_v49  ;;  %3879 = vst [vmem:[%s7702_s30 + $0x138] sm:$0xff] %v3815_v24 }
 0x5e4   : > { %v3816_v6 = vsub.f32 %v7999_v54, %v3765_v35  ;;  %v3817_v38 = vsub.f32 %v8000_v62, %v3765_v35  ;;  %v3818_v36 = vsub.f32 %v8001_v41, %v3765_v35  ;;  %v3819_v10 = vsub.f32 %v8002_v23, %v3765_v35 }
 0x5e6   : > { %v5625_v34 = vpop.eup %5624  ;;  %3880 = vst [vmem:[%s7702_s30 + $0x140] sm:$0xff] %v3816_v6  ;;  %3881 = vst [vmem:[%s7702_s30 + $0x148] sm:$0xff] %v3817_v38 }
 0x5e7   : > { %3882 = vst [vmem:[%s7702_s30 + $0x150] sm:$0xff] %v3818_v36  ;;  %3883 = vst [vmem:[%s7702_s30 + $0x158] sm:$0xff] %v3819_v10  ;;  %v3767_v19 = vmul.f32 0.6931472, %v5625_v34 }
 0x5e9   : > { %v3820_v44 = vsub.f32 %v7616_v42, %v3767_v19  ;;  %v3821_v55 = vsub.f32 %v8003_v46, %v3767_v19  ;;  %v3822_v40 = vsub.f32 %v7622_v9, %v3767_v19  ;;  %v3823_v5 = vsub.f32 %v7627_v1, %v3767_v19 }
 0x5eb   : > { %3884 = vst [vmem:[%s7702_s30 + $0x160] sm:$0xff] %v3820_v44  ;;  %3885 = vst [vmem:[%s7702_s30 + $0x168] sm:$0xff] %v3821_v55  ;;  %v3728_v4 = vpop.xlane.xlu0 %3727 }
 0x5ec   : > { %3886 = vst [vmem:[%s7702_s30 + $0x170] sm:$0xff] %v3822_v40  ;;  %3887 = vst [vmem:[%s7702_s30 + $0x178] sm:$0xff] %v3823_v5  ;;  %5626 = vlog2.f32 %v3728_v4 }
 0x5ef   : > { %v3733_v21 = vpop.xlane.xlu1 %3732 }
 0x5f0   : > { %5628 = vlog2.f32 %v3733_v21 }
 0x5f3   : > { %v3738_v61 = vpop.xlane.xlu0 %3737 }
 0x5f4   : > { %5630 = vlog2.f32 %v3738_v61 }
 0x5f6   : > { %v5627_v42 = vpop.eup %5626 }
 0x5f7   : > { %v3769_v59 = vmul.f32 0.6931472, %v5627_v42  ;;  %v3743_v18 = vpop.xlane.xlu1 %3742 }
 0x5f8   : > { %5632 = vlog2.f32 %v3743_v18 }
 0x5f9   : > { %v3824_v1 = vsub.f32 %v7632_v25, %v3769_v59  ;;  %v3825_v9 = vsub.f32 %v7635_v37, %v3769_v59  ;;  %v3826_v53 = vsub.f32 %v7638_v16, %v3769_v59  ;;  %v3827_v33 = vsub.f32 %v7641_v52, %v3769_v59 }
 0x5fa   : > { %v5629_v56 = vpop.eup %5628 }
 0x5fb   : > { %3888 = vst [vmem:[%s7702_s30 + $0x180] sm:$0xff] %v3824_v1  ;;  %3889 = vst [vmem:[%s7702_s30 + $0x188] sm:$0xff] %v3825_v9  ;;  %v3771_v39 = vmul.f32 0.6931472, %v5629_v56 }
 0x5fc   : > { %3890 = vst [vmem:[%s7702_s30 + $0x190] sm:$0xff] %v3826_v53  ;;  %3891 = vst [vmem:[%s7702_s30 + $0x198] sm:$0xff] %v3827_v33 }
 0x5fd   : > { %v3828_v29 = vsub.f32 %v7647_v28, %v3771_v39  ;;  %v3829_v25 = vsub.f32 %v7651_v22, %v3771_v39  ;;  %v3830_v37 = vsub.f32 %v7654_v58, %v3771_v39  ;;  %v3831_v16 = vsub.f32 %v7657_v14, %v3771_v39 }
 0x5fe   : > { %v5631_v52 = vpop.eup %5630 }
 0x5ff   : > { %3892 = vst [vmem:[%s7702_s30 + $0x1a0] sm:$0xff] %v3828_v29  ;;  %3893 = vst [vmem:[%s7702_s30 + $0x1a8] sm:$0xff] %v3829_v25  ;;  %v3773_v2 = vmul.f32 0.6931472, %v5631_v52 }
 0x600   : > { %3894 = vst [vmem:[%s7702_s30 + $0x1b0] sm:$0xff] %v3830_v37  ;;  %3895 = vst [vmem:[%s7702_s30 + $0x1b8] sm:$0xff] %v3831_v16 }
 0x601   : > { %v3832_v45 = vsub.f32 %v7664_v7, %v3773_v2  ;;  %v3833_v28 = vsub.f32 %v7667_v3, %v3773_v2  ;;  %v3834_v22 = vsub.f32 %v7670_v43, %v3773_v2  ;;  %v3835_v58 = vsub.f32 %v8004_v8, %v3773_v2  ;;  %v8005_v3 = vld [vmem:[#allocation11_spill] sm:$0xff] }
 0x602   : > { %v5633_v14 = vpop.eup %5632 }
 0x603   : > { %3896 = vst [vmem:[%s7702_s30 + $0x1c0] sm:$0xff] %v3832_v45  ;;  %3897 = vst [vmem:[%s7702_s30 + $0x1c8] sm:$0xff] %v3833_v28  ;;  %v3775_v7 = vmul.f32 0.6931472, %v5633_v14 }
 0x604   : > { %3898 = vst [vmem:[%s7702_s30 + $0x1d0] sm:$0xff] %v3834_v22  ;;  %3899 = vst [vmem:[%s7702_s30 + $0x1d8] sm:$0xff] %v3835_v58 }
 0x605   : > { %v3836_v43 = vsub.f32 %v8005_v3, %v3775_v7  ;;  %v3837_v31 = vsub.f32 %v8006_v63, %v3775_v7  ;;  %v3838_v48 = vsub.f32 %v8007_v50, %v3775_v7  ;;  %v3839_v32 = vsub.f32 %v8008_v51, %v3775_v7 }
 0x607   : > { %3900 = vst [vmem:[%s7702_s30 + $0x1e0] sm:$0xff] %v3836_v43  ;;  %3901 = vst [vmem:[%s7702_s30 + $0x1e8] sm:$0xff] %v3837_v31 }
 0x608   : > { %3902 = vst [vmem:[%s7702_s30 + $0x1f0] sm:$0xff] %v3838_v48  ;;  %3903 = vst [vmem:[%s7702_s30 + $0x1f8] sm:$0xff] %v3839_v32 }
 0x609   : > { %5679 = shalt.err (!%p5676_p5)
}
 0x60a   : > { %s5680_s20 = scalar_lea.hbm %s7825_s15, 8192  ;;  %s5684_s30 = scalar_lea.hbm %s7892_s6, 16384 }
 0x60b   : > { %p5681_p6 = scmp.ne.s32.totalorder %s7825_s15, %s5680_s20  ;;  %p5685_p10 = scmp.lt.u32.totalorder %s7825_s15, %s7892_s6 }
 0x60c   : > { %p5686_p11 = scmp.lt.u32.totalorder %s5684_s30, %s5680_s20  ;;  %p5688_p13 = scmp.lt.u32.totalorder %s5680_s20, %s7825_s15 }
 0x60d   : > { %p5682_p7 = pnand %p5681_p6, %p5831_p4 }
 0x60e   : > { %p5687_p12 = por %p5686_p11, %p5685_p10 }
 0x60f   : > { %p5683_p9 = pneg %p5682_p7 }
 0x610   : > { %p5689_p0 = por %p5688_p13, %p5687_p12 }
 0x612   : > { %p5690_p1 = pnand %p5689_p0, %p5683_p9 }
 0x614   : > { %5693 = shalt.err (!%p5690_p1)
}
 0x615   : > { %s5755_s14 = smov 512  }
 0x616   : > { %5196 = dma.vmem_to_hbm [thread:$0]  (%p5831_p4), %s7831_s12, 8192, %s7825_s15, %s7839_s24, %s5755_s14, %s5755_s14, %s5752_s11  }
 0x617 PF: > { %p5202_p2 = scmp.ge.s32.totalorder %s5744_s26, 2  ;;  %s3937_s16 = sand.u32 1, %s5724_s21  }
 0x618   : > { %s3938_s17 = scalar_lea.sflag [#allocation6], %s3937_s16 }
 0x619   : > { %p5199_p3 = pnand %p5202_p2, %p5838_p8 }
 0x61b   : > { %5719 = dma.done.wait (!%p5199_p3), %s3938_s17, 8192  }
 0x61c   : > { %5721 = vsyncadd (!%p5199_p3), %s3938_s17, 4294959104  ;;  %s19_s26 = sadd.s32 1, %s5744_s26   ;;  %s8009_s21 = smov %s5728_s22 }
 0x61d   : > { %p16_p5 = scmp.ge.s32.totalorder %s19_s26, 4   ;;  %s8010_s22 = smov %s5732_s23 }
 0x61e   : > { %s8011_s23 = smov %s5844_s10  ;;  %s8012_s24 = smov %s5740_s25 }
 0x61f   : > { %s8013_s25 = smov %s8015_s29  ;;  %18 = sbr.rel (!%p16_p5) target bundleno = 4 (0x4), region = 89 }
 0x626   :  { %3943 = vsyncpa [#allocation6], 1 }
 0x627   :  { %3945 = vsyncpa [#allocation6 + $0x1], 1 }

</bundles_post_ra>
